<compile_context>
chip_gen: v5e
topology: v5e:2x2
jax: 0.10.0
libtpu: 0.0.40
codegen_flags: <defaults>
</compile_context>

<pallas_src>
import jax
import jax.numpy as jnp
from jax import lax
from jax.experimental import pallas as pl
from jax.experimental.pallas import tpu as pltpu


def _im2col(xpad, H, W):
    """xpad: (H+2, W+2, C) f32 value -> (H*W, 9*C) im2col slab, taps ordered (dy, dx, c)."""
    C = xpad.shape[-1]
    cols = []
    for dy in range(3):
        for dx in range(3):
            cols.append(xpad[dy:dy + H, dx:dx + W, :].reshape(H * W, C))
    return jnp.concatenate(cols, axis=-1)


def downsample_kernel(x_ref, w1_ref, b1_ref, w2_ref, b2_ref,
                      xout_ref, pout_ref, pad_ref):
    Bblk, Hp, Wp, _ = x_ref.shape
    _, H, W, Cpad = xout_ref.shape
    H2, W2 = pout_ref.shape[1], pout_ref.shape[2]
    Cmid = pad_ref.shape[3]                 # real conv channel count carried between convs
    M = H * W

    # ---- conv1: single fused im2col matmul over the whole batch block ----
    slab1 = jnp.concatenate([_im2col(x_ref[b], H, W) for b in range(Bblk)], axis=0)
    h1 = jnp.dot(slab1.astype(jnp.bfloat16), w1_ref[...],
                 preferred_element_type=jnp.float32)          # (Bblk*M, Cpad), f32 acc
    h1 = jnp.maximum(h1 + b1_ref[...], 0.0)

    # ---- zero-pad h1 (real channels only) into VMEM scratch for conv2 ----
    # Only the 1-pixel border needs zeros; the interior is fully overwritten every step,
    # so this is correct regardless of stale data and of megacore grid sharding.
    zrow = jnp.zeros((Bblk, 1, Wp, Cmid), jnp.float32)
    zcol = jnp.zeros((Bblk, Hp, 1, Cmid), jnp.float32)
    pad_ref[:, 0:1, :, :] = zrow
    pad_ref[:, Hp - 1:Hp, :, :] = zrow
    pad_ref[:, :, 0:1, :] = zcol
    pad_ref[:, :, Wp - 1:Wp, :] = zcol
    pad_ref[:, 1:H + 1, 1:W + 1, :] = h1[:, :Cmid].reshape(Bblk, H, W, Cmid)

    # ---- conv2: single fused im2col matmul ----
    slab2 = jnp.concatenate([_im2col(pad_ref[b], H, W) for b in range(Bblk)], axis=0)
    h2 = jnp.dot(slab2.astype(jnp.bfloat16), w2_ref[...],
                 preferred_element_type=jnp.float32)          # (Bblk*M, Cpad)
    h2 = jnp.maximum(h2 + b2_ref[...], 0.0)

    # ---- conv output store + 2x2/stride-2 max-pool, all lane-dense, no scratch ----
    for b in range(Bblk):
        h2i = h2[b * M:(b + 1) * M]                           # (M, Cpad)
        xout_ref[b] = h2i.reshape(H, W, Cpad)
        t = h2i.reshape(H2, 2, W, Cpad)                       # row y = 2a + b
        hmax = jnp.maximum(t[:, 0], t[:, 1])                  # (H2, W, Cpad)
        wv = hmax.reshape(H2 * W2, 2, Cpad)                   # col x = 2c + d
        pmax = jnp.maximum(wv[:, 0], wv[:, 1])                # (H2*W2, Cpad)
        pout_ref[b] = pmax.reshape(H2, W2, Cpad)


def _pick_block_b(batch):
    """Largest per-step batch block that still leaves >= 2 grid steps (v7x megacore)."""
    if batch <= 1:
        return 1
    best = 1
    for bb in range(1, batch + 1):
        if batch % bb == 0 and batch // bb >= 2:
            best = bb
    return best


def downsample_block(x_nchw, params, *, block_b=None):
    """Returns (x, p) in NCHW, matching the PyTorch downsample_block.forward."""
    w1, b1, w2, b2 = params                 # w1: (Cout, Cin, 3, 3), w2: (Cout, Cout, 3, 3)
    B, Cin, H, W = x_nchw.shape
    Cout = w1.shape[0]
    assert H % 2 == 0 and W % 2 == 0, "2x2 max-pool needs even spatial dims"
    Hp, Wp = H + 2, W + 2
    H2, W2 = H // 2, W // 2
    Cpad = ((Cout + 127) // 128) * 128      # lane-dense channel padding for compute/stores

    if block_b is None:
        block_b = _pick_block_b(B)
    assert B % block_b == 0
    grid = (B // block_b,)

    # NCHW -> NHWC and 1-pixel spatial zero pad (plain XLA glue)
    x = jnp.transpose(x_nchw, (0, 2, 3, 1)).astype(jnp.float32)
    xpad = jnp.pad(x, ((0, 0), (1, 1), (1, 1), (0, 0)))

    # (O, I, 3, 3) -> (9*I, Cpad), taps ordered (dy, dx, cin); zero-pad O; cast bf16.
    def pack_w(w, cin):
        wk = jnp.transpose(w, (2, 3, 1, 0)).reshape(9 * cin, Cout)
        return jnp.pad(wk, ((0, 0), (0, Cpad - Cout))).astype(jnp.bfloat16)

    w1k = pack_w(w1, Cin)
    w2k = pack_w(w2, Cout)
    b1k = jnp.pad(b1.reshape(1, Cout), ((0, 0), (0, Cpad - Cout))).astype(jnp.float32)
    b2k = jnp.pad(b2.reshape(1, Cout), ((0, 0), (0, Cpad - Cout))).astype(jnp.float32)

    out_shapes = (
        jax.ShapeDtypeStruct((B, H, W, Cpad), jnp.float32),
        jax.ShapeDtypeStruct((B, H2, W2, Cpad), jnp.float32),
    )

    x_out, p_out = pl.pallas_call(
        downsample_kernel,
        out_shape=out_shapes,
        grid_spec=pltpu.PrefetchScalarGridSpec(
            num_scalar_prefetch=0,
            grid=grid,
            in_specs=[
                pl.BlockSpec((block_b, Hp, Wp, Cin), lambda i: (i, 0, 0, 0)),
                pl.BlockSpec((9 * Cin, Cpad), lambda i: (0, 0)),
                pl.BlockSpec((1, Cpad), lambda i: (0, 0)),
                pl.BlockSpec((9 * Cout, Cpad), lambda i: (0, 0)),
                pl.BlockSpec((1, Cpad), lambda i: (0, 0)),
            ],
            out_specs=[
                pl.BlockSpec((block_b, H, W, Cpad), lambda i: (i, 0, 0, 0)),
                pl.BlockSpec((block_b, H2, W2, Cpad), lambda i: (i, 0, 0, 0)),
            ],
            scratch_shapes=[
                pltpu.VMEM((block_b, Hp, Wp, Cout), jnp.float32),
            ],
        ),
        compiler_params=pltpu.CompilerParams(
            dimension_semantics=("parallel",),
            vmem_limit_bytes=32 * 1024 * 1024,
        ),
    )(xpad, w1k, b1k, w2k, b2k)

    # drop channel padding, NHWC -> NCHW
    x_out = jnp.transpose(x_out[..., :Cout], (0, 3, 1, 2))
    p_out = jnp.transpose(p_out[..., :Cout], (0, 3, 1, 2))
    return x_out, p_out


def reference_forward(x, params):
    """Pure-JAX f32 reference (mirrors the PyTorch module) for a correctness check."""
    w1, b1, w2, b2 = params

    def conv(h, w, b):
        y = lax.conv_general_dilated(
            h, w, window_strides=(1, 1), padding=((1, 1), (1, 1)),
            dimension_numbers=("NCHW", "OIHW", "NCHW"),
            precision=lax.Precision.HIGHEST)
        return y + b.reshape(1, -1, 1, 1)

    h = jax.nn.relu(conv(x, w1, b1))
    h = jax.nn.relu(conv(h, w2, b2))
    p = lax.reduce_window(h, -jnp.inf, lax.max,
                          window_dimensions=(1, 1, 2, 2),
                          window_strides=(1, 1, 2, 2),
                          padding="VALID")
    return h, p


def init_params(key, inp, out):
    """Deterministic PyTorch-style uniform init for the two conv layers."""
    k1, k2, k3, k4 = jax.random.split(key, 4)
    bound1 = 1.0 / (inp * 9) ** 0.5
    bound2 = 1.0 / (out * 9) ** 0.5
    w1 = jax.random.uniform(k1, (out, inp, 3, 3), jnp.float32, -bound1, bound1)
    b1 = jax.random.uniform(k2, (out,), jnp.float32, -bound1, bound1)
    w2 = jax.random.uniform(k3, (out, out, 3, 3), jnp.float32, -bound2, bound2)
    b2 = jax.random.uniform(k4, (out,), jnp.float32, -bound2, bound2)
    return (w1, b1, w2, b2)


if __name__ == "__main__":
    B, Cin, Cout, H, W = 2, 4, 8, 16, 16

    key = jax.random.PRNGKey(0)
    kp, kx = jax.random.split(key)
    params = init_params(kp, Cin, Cout)
    x = jax.random.normal(kx, (B, Cin, H, W), jnp.float32)

    x_out, p_out = downsample_block(x, params)
    jax.block_until_ready(x_out)
    jax.block_until_ready(p_out)

    x_ref, p_ref = reference_forward(x, params)
    assert x_out.shape == (B, Cout, H, W)
    assert p_out.shape == (B, Cout, H // 2, W // 2)
    # Kernel uses single-pass bf16 MXU matmuls with f32 accumulation (per perf review),
    # so compare against the f32 reference with a bf16-appropriate tolerance.
    assert jnp.allclose(x_out, x_ref, atol=2e-2, rtol=2e-2), \
        float(jnp.max(jnp.abs(x_out - x_ref)))
    assert jnp.allclose(p_out, p_ref, atol=2e-2, rtol=2e-2), \
        float(jnp.max(jnp.abs(p_out - p_ref)))

    print("KERNEL_OK")
</pallas_src>

<mosaic_0001>
module attributes {stable_mosaic.version = 11 : i64} {
  func.func @downsample_kernel(%arg0: i32, %arg1: memref<1x18x18x4xf32, #tpu.memory_space<vmem>>, %arg2: memref<36x128xbf16, #tpu.memory_space<vmem>>, %arg3: memref<1x128xf32, #tpu.memory_space<vmem>>, %arg4: memref<72x128xbf16, #tpu.memory_space<vmem>>, %arg5: memref<1x128xf32, #tpu.memory_space<vmem>>, %arg6: memref<1x16x16x128xf32, #tpu.memory_space<vmem>>, %arg7: memref<1x8x8x128xf32, #tpu.memory_space<vmem>>, %arg8: memref<1x18x18x8xf32, #tpu.memory_space<vmem>>) attributes {dimension_semantics = [#tpu.dimension_semantics<parallel>], iteration_bounds = array<i64: 2>, scalar_prefetch = 0 : i64, scratch_operands = 1 : i64, tpu.core_type = #tpu.core_type<tc>, window_params = [{transform_indices = @transform_0, window_bounds = array<i64: 1, 18, 18, 4>}, {pipeline_mode = #tpu.pipeline_mode<synchronous>, transform_indices = @transform_1, window_bounds = array<i64: 36, 128>}, {pipeline_mode = #tpu.pipeline_mode<synchronous>, transform_indices = @transform_2, window_bounds = array<i64: 1, 128>}, {pipeline_mode = #tpu.pipeline_mode<synchronous>, transform_indices = @transform_3, window_bounds = array<i64: 72, 128>}, {pipeline_mode = #tpu.pipeline_mode<synchronous>, transform_indices = @transform_4, window_bounds = array<i64: 1, 128>}, {transform_indices = @transform_5, window_bounds = array<i64: 1, 16, 16, 128>}, {transform_indices = @transform_6, window_bounds = array<i64: 1, 8, 8, 128>}]} {
    %c0 = arith.constant 0 : index
    %c0_0 = arith.constant 0 : index
    %c0_1 = arith.constant 0 : index
    %c0_2 = arith.constant 0 : index
    %0 = vector.load %arg1[%c0, %c0_0, %c0_1, %c0_2] : memref<1x18x18x4xf32, #tpu.memory_space<vmem>>, vector<1x18x18x4xf32>
    %1 = vector.shape_cast %0 : vector<1x18x18x4xf32> to vector<18x18x4xf32>
    %2 = vector.extract_strided_slice %1 {offsets = [0, 0, 0], sizes = [16, 16, 4], strides = [1, 1, 1]} : vector<18x18x4xf32> to vector<16x16x4xf32>
    %3 = vector.shape_cast %2 : vector<16x16x4xf32> to vector<256x4xf32>
    %4 = vector.extract_strided_slice %1 {offsets = [0, 1, 0], sizes = [16, 16, 4], strides = [1, 1, 1]} : vector<18x18x4xf32> to vector<16x16x4xf32>
    %5 = vector.shape_cast %4 : vector<16x16x4xf32> to vector<256x4xf32>
    %6 = vector.extract_strided_slice %1 {offsets = [0, 2, 0], sizes = [16, 16, 4], strides = [1, 1, 1]} : vector<18x18x4xf32> to vector<16x16x4xf32>
    %7 = vector.shape_cast %6 : vector<16x16x4xf32> to vector<256x4xf32>
    %8 = vector.extract_strided_slice %1 {offsets = [1, 0, 0], sizes = [16, 16, 4], strides = [1, 1, 1]} : vector<18x18x4xf32> to vector<16x16x4xf32>
    %9 = vector.shape_cast %8 : vector<16x16x4xf32> to vector<256x4xf32>
    %10 = vector.extract_strided_slice %1 {offsets = [1, 1, 0], sizes = [16, 16, 4], strides = [1, 1, 1]} : vector<18x18x4xf32> to vector<16x16x4xf32>
    %11 = vector.shape_cast %10 : vector<16x16x4xf32> to vector<256x4xf32>
    %12 = vector.extract_strided_slice %1 {offsets = [1, 2, 0], sizes = [16, 16, 4], strides = [1, 1, 1]} : vector<18x18x4xf32> to vector<16x16x4xf32>
    %13 = vector.shape_cast %12 : vector<16x16x4xf32> to vector<256x4xf32>
    %14 = vector.extract_strided_slice %1 {offsets = [2, 0, 0], sizes = [16, 16, 4], strides = [1, 1, 1]} : vector<18x18x4xf32> to vector<16x16x4xf32>
    %15 = vector.shape_cast %14 : vector<16x16x4xf32> to vector<256x4xf32>
    %16 = vector.extract_strided_slice %1 {offsets = [2, 1, 0], sizes = [16, 16, 4], strides = [1, 1, 1]} : vector<18x18x4xf32> to vector<16x16x4xf32>
    %17 = vector.shape_cast %16 : vector<16x16x4xf32> to vector<256x4xf32>
    %18 = vector.extract_strided_slice %1 {offsets = [2, 2, 0], sizes = [16, 16, 4], strides = [1, 1, 1]} : vector<18x18x4xf32> to vector<16x16x4xf32>
    %19 = vector.shape_cast %18 : vector<16x16x4xf32> to vector<256x4xf32>
    %20 = tpu.concatenate %3, %5, %7, %9, %11, %13, %15, %17, %19 in 1 : vector<256x4xf32>, vector<256x4xf32>, vector<256x4xf32>, vector<256x4xf32>, vector<256x4xf32>, vector<256x4xf32>, vector<256x4xf32>, vector<256x4xf32>, vector<256x4xf32> -> vector<256x36xf32>
    %21 = arith.truncf %20 : vector<256x36xf32> to vector<256x36xbf16>
    %c0_3 = arith.constant 0 : index
    %c0_4 = arith.constant 0 : index
    %22 = vector.load %arg2[%c0_3, %c0_4] : memref<36x128xbf16, #tpu.memory_space<vmem>>, vector<36x128xbf16>
    %cst = arith.constant dense<0.000000e+00> : vector<256x128xf32>
    %23 = tpu.matmul %21, %22, %cst {dimension_numbers = #tpu.dot_dimension_numbers<[1], [0], [0], [1], [0, 0, 1, 1], [], []>} : vector<256x36xbf16>, vector<36x128xbf16>, vector<256x128xf32> -> vector<256x128xf32>
    %c0_5 = arith.constant 0 : index
    %c0_6 = arith.constant 0 : index
    %24 = vector.load %arg3[%c0_5, %c0_6] : memref<1x128xf32, #tpu.memory_space<vmem>>, vector<1x128xf32>
    %25 = vector.broadcast %24 : vector<1x128xf32> to vector<256x128xf32>
    %26 = arith.addf %23, %25 : vector<256x128xf32>
    %cst_7 = arith.constant 0.000000e+00 : f32
    %27 = vector.broadcast %cst_7 : f32 to vector<256x128xf32>
    %28 = arith.maximumf %26, %27 : vector<256x128xf32>
    %cst_8 = arith.constant 0.000000e+00 : f32
    %29 = vector.broadcast %cst_8 : f32 to vector<1x1x18x8xf32>
    %cst_9 = arith.constant 0.000000e+00 : f32
    %30 = vector.broadcast %cst_9 : f32 to vector<1x18x1x8xf32>
    %c0_10 = arith.constant 0 : index
    %c0_11 = arith.constant 0 : index
    %c0_12 = arith.constant 0 : index
    %c0_13 = arith.constant 0 : index
    %31 = vector.load %arg8[%c0_10, %c0_11, %c0_12, %c0_13] : memref<1x18x18x8xf32, #tpu.memory_space<vmem>>, vector<1x1x18x8xf32>
    tpu.vector_store %arg8[%c0_10, %c0_11, %c0_12, %c0_13], %29 {strides = array<i32>} : memref<1x18x18x8xf32, #tpu.memory_space<vmem>>, vector<1x1x18x8xf32>,
    %c0_14 = arith.constant 0 : index
    %c17 = arith.constant 17 : index
    %c0_15 = arith.constant 0 : index
    %c0_16 = arith.constant 0 : index
    %32 = vector.load %arg8[%c0_14, %c17, %c0_15, %c0_16] : memref<1x18x18x8xf32, #tpu.memory_space<vmem>>, vector<1x1x18x8xf32>
    tpu.vector_store %arg8[%c0_14, %c17, %c0_15, %c0_16], %29 {strides = array<i32>} : memref<1x18x18x8xf32, #tpu.memory_space<vmem>>, vector<1x1x18x8xf32>,
    %c0_17 = arith.constant 0 : index
    %c0_18 = arith.constant 0 : index
    %c0_19 = arith.constant 0 : index
    %c0_20 = arith.constant 0 : index
    %33 = vector.load %arg8[%c0_17, %c0_18, %c0_19, %c0_20] : memref<1x18x18x8xf32, #tpu.memory_space<vmem>>, vector<1x18x1x8xf32>
    tpu.vector_store %arg8[%c0_17, %c0_18, %c0_19, %c0_20], %30 {strides = array<i32>} : memref<1x18x18x8xf32, #tpu.memory_space<vmem>>, vector<1x18x1x8xf32>,
    %c0_21 = arith.constant 0 : index
    %c0_22 = arith.constant 0 : index
    %c17_23 = arith.constant 17 : index
    %c0_24 = arith.constant 0 : index
    %34 = vector.load %arg8[%c0_21, %c0_22, %c17_23, %c0_24] : memref<1x18x18x8xf32, #tpu.memory_space<vmem>>, vector<1x18x1x8xf32>
    tpu.vector_store %arg8[%c0_21, %c0_22, %c17_23, %c0_24], %30 {strides = array<i32>} : memref<1x18x18x8xf32, #tpu.memory_space<vmem>>, vector<1x18x1x8xf32>,
    %35 = vector.extract_strided_slice %28 {offsets = [0, 0], sizes = [256, 8], strides = [1, 1]} : vector<256x128xf32> to vector<256x8xf32>
    %36 = vector.shape_cast %35 : vector<256x8xf32> to vector<1x16x16x8xf32>
    %c0_25 = arith.constant 0 : index
    %c1 = arith.constant 1 : index
    %c1_26 = arith.constant 1 : index
    %c0_27 = arith.constant 0 : index
    %37 = vector.load %arg8[%c0_25, %c1, %c1_26, %c0_27] : memref<1x18x18x8xf32, #tpu.memory_space<vmem>>, vector<1x16x16x8xf32>
    tpu.vector_store %arg8[%c0_25, %c1, %c1_26, %c0_27], %36 {strides = array<i32>} : memref<1x18x18x8xf32, #tpu.memory_space<vmem>>, vector<1x16x16x8xf32>,
    %c0_28 = arith.constant 0 : index
    %c0_29 = arith.constant 0 : index
    %c0_30 = arith.constant 0 : index
    %c0_31 = arith.constant 0 : index
    %38 = vector.load %arg8[%c0_28, %c0_29, %c0_30, %c0_31] : memref<1x18x18x8xf32, #tpu.memory_space<vmem>>, vector<1x18x18x8xf32>
    %39 = vector.shape_cast %38 : vector<1x18x18x8xf32> to vector<18x18x8xf32>
    %40 = vector.extract_strided_slice %39 {offsets = [0, 0, 0], sizes = [16, 16, 8], strides = [1, 1, 1]} : vector<18x18x8xf32> to vector<16x16x8xf32>
    %41 = vector.shape_cast %40 : vector<16x16x8xf32> to vector<256x8xf32>
    %42 = vector.extract_strided_slice %39 {offsets = [0, 1, 0], sizes = [16, 16, 8], strides = [1, 1, 1]} : vector<18x18x8xf32> to vector<16x16x8xf32>
    %43 = vector.shape_cast %42 : vector<16x16x8xf32> to vector<256x8xf32>
    %44 = vector.extract_strided_slice %39 {offsets = [0, 2, 0], sizes = [16, 16, 8], strides = [1, 1, 1]} : vector<18x18x8xf32> to vector<16x16x8xf32>
    %45 = vector.shape_cast %44 : vector<16x16x8xf32> to vector<256x8xf32>
    %46 = vector.extract_strided_slice %39 {offsets = [1, 0, 0], sizes = [16, 16, 8], strides = [1, 1, 1]} : vector<18x18x8xf32> to vector<16x16x8xf32>
    %47 = vector.shape_cast %46 : vector<16x16x8xf32> to vector<256x8xf32>
    %48 = vector.extract_strided_slice %39 {offsets = [1, 1, 0], sizes = [16, 16, 8], strides = [1, 1, 1]} : vector<18x18x8xf32> to vector<16x16x8xf32>
    %49 = vector.shape_cast %48 : vector<16x16x8xf32> to vector<256x8xf32>
    %50 = vector.extract_strided_slice %39 {offsets = [1, 2, 0], sizes = [16, 16, 8], strides = [1, 1, 1]} : vector<18x18x8xf32> to vector<16x16x8xf32>
    %51 = vector.shape_cast %50 : vector<16x16x8xf32> to vector<256x8xf32>
    %52 = vector.extract_strided_slice %39 {offsets = [2, 0, 0], sizes = [16, 16, 8], strides = [1, 1, 1]} : vector<18x18x8xf32> to vector<16x16x8xf32>
    %53 = vector.shape_cast %52 : vector<16x16x8xf32> to vector<256x8xf32>
    %54 = vector.extract_strided_slice %39 {offsets = [2, 1, 0], sizes = [16, 16, 8], strides = [1, 1, 1]} : vector<18x18x8xf32> to vector<16x16x8xf32>
    %55 = vector.shape_cast %54 : vector<16x16x8xf32> to vector<256x8xf32>
    %56 = vector.extract_strided_slice %39 {offsets = [2, 2, 0], sizes = [16, 16, 8], strides = [1, 1, 1]} : vector<18x18x8xf32> to vector<16x16x8xf32>
    %57 = vector.shape_cast %56 : vector<16x16x8xf32> to vector<256x8xf32>
    %58 = tpu.concatenate %41, %43, %45, %47, %49, %51, %53, %55, %57 in 1 : vector<256x8xf32>, vector<256x8xf32>, vector<256x8xf32>, vector<256x8xf32>, vector<256x8xf32>, vector<256x8xf32>, vector<256x8xf32>, vector<256x8xf32>, vector<256x8xf32> -> vector<256x72xf32>
    %59 = arith.truncf %58 : vector<256x72xf32> to vector<256x72xbf16>
    %c0_32 = arith.constant 0 : index
    %c0_33 = arith.constant 0 : index
    %60 = vector.load %arg4[%c0_32, %c0_33] : memref<72x128xbf16, #tpu.memory_space<vmem>>, vector<72x128xbf16>
    %cst_34 = arith.constant dense<0.000000e+00> : vector<256x128xf32>
    %61 = tpu.matmul %59, %60, %cst_34 {dimension_numbers = #tpu.dot_dimension_numbers<[1], [0], [0], [1], [0, 0, 1, 1], [], []>} : vector<256x72xbf16>, vector<72x128xbf16>, vector<256x128xf32> -> vector<256x128xf32>
    %c0_35 = arith.constant 0 : index
    %c0_36 = arith.constant 0 : index
    %62 = vector.load %arg5[%c0_35, %c0_36] : memref<1x128xf32, #tpu.memory_space<vmem>>, vector<1x128xf32>
    %63 = vector.broadcast %62 : vector<1x128xf32> to vector<256x128xf32>
    %64 = arith.addf %61, %63 : vector<256x128xf32>
    %cst_37 = arith.constant 0.000000e+00 : f32
    %65 = vector.broadcast %cst_37 : f32 to vector<256x128xf32>
    %66 = arith.maximumf %64, %65 : vector<256x128xf32>
    %67 = vector.shape_cast %66 : vector<256x128xf32> to vector<16x16x128xf32>
    %c0_38 = arith.constant 0 : index
    %c0_39 = arith.constant 0 : index
    %c0_40 = arith.constant 0 : index
    %c0_41 = arith.constant 0 : index
    %68 = vector.load %arg6[%c0_38, %c0_39, %c0_40, %c0_41] : memref<1x16x16x128xf32, #tpu.memory_space<vmem>>, vector<1x16x16x128xf32>
    %69 = vector.shape_cast %68 : vector<1x16x16x128xf32> to vector<16x16x128xf32>
    %70 = vector.shape_cast %67 : vector<16x16x128xf32> to vector<1x16x16x128xf32>
    tpu.vector_store %arg6[%c0_38, %c0_39, %c0_40, %c0_41], %70 {strides = array<i32>} : memref<1x16x16x128xf32, #tpu.memory_space<vmem>>, vector<1x16x16x128xf32>,
    %71 = vector.shape_cast %66 : vector<256x128xf32> to vector<8x2x16x128xf32>
    %72 = vector.extract_strided_slice %71 {offsets = [0, 0, 0, 0], sizes = [8, 1, 16, 128], strides = [1, 1, 1, 1]} : vector<8x2x16x128xf32> to vector<8x1x16x128xf32>
    %73 = vector.shape_cast %72 : vector<8x1x16x128xf32> to vector<8x16x128xf32>
    %74 = vector.extract_strided_slice %71 {offsets = [0, 1, 0, 0], sizes = [8, 1, 16, 128], strides = [1, 1, 1, 1]} : vector<8x2x16x128xf32> to vector<8x1x16x128xf32>
    %75 = vector.shape_cast %74 : vector<8x1x16x128xf32> to vector<8x16x128xf32>
    %76 = arith.maximumf %73, %75 : vector<8x16x128xf32>
    %77 = vector.shape_cast %76 : vector<8x16x128xf32> to vector<64x2x128xf32>
    %78 = vector.extract_strided_slice %77 {offsets = [0, 0, 0], sizes = [64, 1, 128], strides = [1, 1, 1]} : vector<64x2x128xf32> to vector<64x1x128xf32>
    %79 = vector.shape_cast %78 : vector<64x1x128xf32> to vector<64x128xf32>
    %80 = vector.extract_strided_slice %77 {offsets = [0, 1, 0], sizes = [64, 1, 128], strides = [1, 1, 1]} : vector<64x2x128xf32> to vector<64x1x128xf32>
    %81 = vector.shape_cast %80 : vector<64x1x128xf32> to vector<64x128xf32>
    %82 = arith.maximumf %79, %81 : vector<64x128xf32>
    %83 = vector.shape_cast %82 : vector<64x128xf32> to vector<8x8x128xf32>
    %c0_42 = arith.constant 0 : index
    %c0_43 = arith.constant 0 : index
    %c0_44 = arith.constant 0 : index
    %c0_45 = arith.constant 0 : index
    %84 = vector.load %arg7[%c0_42, %c0_43, %c0_44, %c0_45] : memref<1x8x8x128xf32, #tpu.memory_space<vmem>>, vector<1x8x8x128xf32>
    %85 = vector.shape_cast %84 : vector<1x8x8x128xf32> to vector<8x8x128xf32>
    %86 = vector.shape_cast %83 : vector<8x8x128xf32> to vector<1x8x8x128xf32>
    tpu.vector_store %arg7[%c0_42, %c0_43, %c0_44, %c0_45], %86 {strides = array<i32>} : memref<1x8x8x128xf32, #tpu.memory_space<vmem>>, vector<1x8x8x128xf32>,
    return
  }
  func.func @transform_0(%arg0: i32) -> (i32, i32, i32, i32) {
    %c0_i32 = arith.constant 0 : i32
    %c0_i32_0 = arith.constant 0 : i32
    %c0_i32_1 = arith.constant 0 : i32
    %c0_i32_2 = arith.constant 0 : i32
    return %arg0, %c0_i32, %c0_i32_0, %c0_i32_1 : i32, i32, i32, i32
  }
  func.func @transform_1(%arg0: i32) -> (i32, i32) {
    %c0_i32 = arith.constant 0 : i32
    %c0_i32_0 = arith.constant 0 : i32
    %c0_i32_1 = arith.constant 0 : i32
    return %c0_i32, %c0_i32_0 : i32, i32
  }
  func.func @transform_2(%arg0: i32) -> (i32, i32) {
    %c0_i32 = arith.constant 0 : i32
    %c0_i32_0 = arith.constant 0 : i32
    %c0_i32_1 = arith.constant 0 : i32
    return %c0_i32, %c0_i32_0 : i32, i32
  }
  func.func @transform_3(%arg0: i32) -> (i32, i32) {
    %c0_i32 = arith.constant 0 : i32
    %c0_i32_0 = arith.constant 0 : i32
    %c0_i32_1 = arith.constant 0 : i32
    return %c0_i32, %c0_i32_0 : i32, i32
  }
  func.func @transform_4(%arg0: i32) -> (i32, i32) {
    %c0_i32 = arith.constant 0 : i32
    %c0_i32_0 = arith.constant 0 : i32
    %c0_i32_1 = arith.constant 0 : i32
    return %c0_i32, %c0_i32_0 : i32, i32
  }
  func.func @transform_5(%arg0: i32) -> (i32, i32, i32, i32) {
    %c0_i32 = arith.constant 0 : i32
    %c0_i32_0 = arith.constant 0 : i32
    %c0_i32_1 = arith.constant 0 : i32
    %c0_i32_2 = arith.constant 0 : i32
    return %arg0, %c0_i32, %c0_i32_0, %c0_i32_1 : i32, i32, i32, i32
  }
  func.func @transform_6(%arg0: i32) -> (i32, i32, i32, i32) {
    %c0_i32 = arith.constant 0 : i32
    %c0_i32_0 = arith.constant 0 : i32
    %c0_i32_1 = arith.constant 0 : i32
    %c0_i32_2 = arith.constant 0 : i32
    return %arg0, %c0_i32, %c0_i32_0, %c0_i32_1 : i32, i32, i32, i32
  }
}

</mosaic_0001>

<bundles_post_ra>
// kernel: tpu_custom_call.1
= control target key start
LH: loop header
LB: loop body
LE: loop exit
PB: predicated region body
PF: predicated region fallthrough
CT: control target
= control target key end

     0   :  { %12 = vsyncpa [#allocation4], 0  ;;  %s9106_s0 = inlined_call_operand.vmem [shape: f32[2,18,18,4], index: 0, kind: input, shape index: {}]   ;;  %s9107_s1 = inlined_call_operand.vmem [shape: bf16[36,128], index: 1, kind: input, shape index: {}]   ;;  %s9108_s2 = inlined_call_operand.vmem [shape: f32[1,128], index: 2, kind: input, shape index: {}]   ;;  %s9109_s3 = inlined_call_operand.vmem [shape: bf16[72,128], index: 3, kind: input, shape index: {}]   ;;  %s9110_s4 = inlined_call_operand.vmem [shape: f32[1,128], index: 4, kind: input, shape index: {}]   ;;  %s9111_s5 = inlined_call_operand.hbm [shape: f32[2,16,16,128], index: 5, kind: output, shape index: {0}]   ;;  %s9112_s6 = inlined_call_operand.hbm [shape: f32[2,8,8,128], index: 6, kind: output, shape index: {1}]  }
   0x1   :  { %14 = vsyncpa [#allocation4 + $0x1], 0 }
   0x2   :  { %15 = vsyncpa [#allocation6], 0 }
   0x3   :  { %17 = vsyncpa [#allocation6 + $0x1], 0  ;;  %s5879_s21 = smov 0   ;;  %s5881_s22 = smov 0  }
   0x4   :  { %s5883_s23 = smov 0   ;;  %s5885_s24 = smov 0  }
   0x5 LB: > { %s5900_s25 = sadd.s32 4294967295, %s5828_s24   ;;  %s4178_s26 = sadd.s32 4294967294, %s5828_s24   ;;  %s5828_s24 = sphi %s5885_s24, %s9471_s24   ;;  %s5824_s23 = sphi %s5883_s23, %s9470_s23   ;;  %s5820_s22 = sphi %s5881_s22, %s9469_s22   ;;  %s5816_s21 = sphi %s5879_s21, %s9468_s21  }
   0x6   : > { %s5904_s27 = sadd.s32 1, %s5828_s24   ;;  %s140_s28 = sadd.s32 1, %s5824_s23 }
   0x7   : > { %s137_s29 = ssub.s32 %s5828_s24, %s5904_s27  ;;  %p150_p0 = scmp.ne.s32.totalorder %s5824_s23, %s5820_s22 }
   0x8   : > { %p138_p1 = scmp.eq.s32.totalorder %s137_s29, 0  ;;  %p151_p2 = scmp.eq.s32.totalorder %s5900_s25, 1 }
   0x9   : > { %p156_p3 = scmp.ne.s32.totalorder %s5820_s22, %s5816_s21  ;;  %p157_p4 = scmp.eq.s32.totalorder %s4178_s26, 1 }
   0xa   : > { %s5915_s30 = scalar_select %p138_p1, %s5824_s23, %s140_s28  }
   0xb   : > { %p5917_p5 = por %p151_p2, %p150_p0  ;;  %p5921_p6 = por %p157_p4, %p156_p3 }
   0xc   : > { %p4181_p7 = scmp.ge.s32.totalorder %s5828_s24, 1  ;;  %p221_p8 = scmp.lt.s32.totalorder %s5828_s24, 3 }
   0xe   : > { %p222_p9 = pnand %p4181_p7, %p221_p8 }
  0x10   : > { %225 = sbr.rel (%p222_p9) target bundleno = 1291 (0x50b), region = 40 }
  0x15   : > { %p256_p10 = scmp.lt.s32.totalorder %s5900_s25, 1  ;;  %vm364_vm0 = vcmask 1046528   ;;  %s5830_s14 = smov 4   ;;  %vm445_vm1 = vcmask 1045504   ;;  %vm1673_vm2 = vcmask 1041408   ;;  %vm1320_vm3 = vcmask 31744  }
  0x16   : > { %s5831_s15 = smov 8   ;;  %s5832_s16 = smov 12   ;;  %vm1386_vm4 = vcmask 97280   ;;  %vm1353_vm5 = vcmask 64512   ;;  %vm1419_vm6 = vcmask 130048   ;;  %vm1485_vm7 = vcmask 195584  }
  0x17   : > { %s257_s9 = scalar_select %p256_p10, %s5900_s25, 1  ;;  %vm1452_vm8 = vcmask 162816   ;;  %vm1518_vm9 = vcmask 228352   ;;  %vm1551_vm10 = vcmask 261120   ;;  %vm1624_vm11 = vcmask 293888  }
  0x18   : > { %s5833_s17 = smov 16   ;;  %s5834_s18 = smov 20   ;;  %vm1806_vm12 = vcmask 57344   ;;  %vm1800_vm13 = vcmask 58368   ;;  %vm3297_vm14 = vcmask 1043456   ;;  %vm3060_vm15 = vcmask 326656  }
  0x19   : > { %s4329_s10 = smul.u32 432, %s257_s9  ;;  %s5835_s19 = smov 24  }
  0x1a   : > { %s5836_s20 = smov 28   ;;  %s5837_s26 = smov 32  }
  0x1b   : > { %s5932_s13 = scalar_lea.vmem %s9106_s0, %s4329_s10  ;;  %s4319_s29 = sshll.u32 %s5900_s25, 8 }
  0x1c   : > { %v5935_v0 = vld [vmem:[%s5932_s13 + $0x60] sm:$0xff]  ;;  %v5938_v1 = vld [vmem:[%s5932_s13 + $0x68] sm:$0xff]  ;;  %v5941_v2 = vld [vmem:[%s5932_s13 + $0x70] sm:$0x3]  ;;  %s4062_s11 = scalar_lea.hbm %s9111_s5, %s4319_s29 }
  0x1d   : > { %v385_v3 = vrot.slane %v5935_v0, 1  ;;  %v386_v4 = vrot.slane %v5938_v1, 1  ;;  %v388_v5 = vrot.slane %v5941_v2, 1  ;;  %v5947_v6 = vld [vmem:[%s5932_s13 + $0x30] sm:$0xff]  ;;  %v5950_v7 = vld [vmem:[%s5932_s13 + $0x38] sm:$0xff]  ;;  %v5958_v11 = vld [vmem:[%s5932_s13] sm:$0xff] }
  0x1e   : > { %v5953_v8 = vld [vmem:[%s5932_s13 + $0x40] sm:$0x3]  ;;  %v375_v9 = vrot.slane %v5947_v6, 1  ;;  %v376_v10 = vrot.slane %v5950_v7, 1  ;;  %v5961_v12 = vld [vmem:[%s5932_s13 + $0x8] sm:$0xff]  ;;  %v5970_v17 = vld [vmem:[%s5932_s13 + $0x78] sm:$0xff] }
  0x1f   : > { %v387_v13 = vsel %vm364_vm0, %v385_v3, %v386_v4  ;;  %v389_v14 = vsel %vm364_vm0, %v386_v4, %v388_v5  ;;  %v378_v15 = vrot.slane %v5953_v8, 1  ;;  %v5967_v16 = vld [vmem:[%s5932_s13 + $0x10] sm:$0x3]  ;;  %v5973_v18 = vld [vmem:[%s5932_s13 + $0x80] sm:$0xff]  ;;  %v365_v21 = vrot.slane %v5958_v11, 1  ;;  %v5984_v24 = vld [vmem:[%s5932_s13 + $0x48] sm:$0xff] }
  0x20   : > { %v5975_v19 = vpack.i.bf16 %v389_v14, %v387_v13  ;;  %v377_v20 = vsel %vm364_vm0, %v375_v9, %v376_v10  ;;  %v366_v22 = vrot.slane %v5961_v12, 1  ;;  %v5981_v23 = vld [vmem:[%s5932_s13 + $0x88] sm:$0x3]  ;;  %v5987_v25 = vld [vmem:[%s5932_s13 + $0x50] sm:$0xff]  ;;  %v368_v27 = vrot.slane %v5967_v16, 1  ;;  %v5996_v30 = vld [vmem:[%s5932_s13 + $0x18] sm:$0xff] }
  0x21   : > { %v379_v26 = vsel %vm364_vm0, %v376_v10, %v378_v15  ;;  %v390_v28 = vrot.slane %v5970_v17, 1  ;;  %v5993_v29 = vld [vmem:[%s5932_s13 + $0x58] sm:$0x3]  ;;  %v391_v33 = vrot.slane %v5973_v18, 1  ;;  %v393_v34 = vrot.slane %v5981_v23, 1  ;;  %v6006_v35 = vld [vmem:[%s5932_s13 + $0x20] sm:$0xff] }
  0x22   : > { %9246 = vst [vmem:[#allocation9_spill] sm:$0xff] %v5975_v19  ;;  %4409 = vrot.lane.b32.xlu2 %v5975_v19, %s5830_s14  ;;  %v6000_v31 = vpack.i.bf16 %v379_v26, %v377_v20  ;;  %v367_v32 = vsel %vm364_vm0, %v365_v21, %v366_v22  ;;  %v6009_v36 = vld [vmem:[%s5932_s13 + $0x28] sm:$0x3]  ;;  %v369_v37 = vsel %vm364_vm0, %v366_v22, %v368_v27  ;;  %v380_v38 = vrot.slane %v5984_v24, 1  ;;  %v6016_v41 = vld [vmem:[%s5932_s13 + $0xc0] sm:$0xff]  ;;  %v6042_v56 = vld [vmem:[%s5932_s13 + $0xb0] sm:$0xff] }
  0x23   : > { %v381_v39 = vrot.slane %v5987_v25, 1  ;;  %v383_v40 = vrot.slane %v5993_v29, 1  ;;  %v6019_v42 = vld [vmem:[%s5932_s13 + $0xc8] sm:$0xff]  ;;  %v4388_v43 = vpack.i.bf16 %v369_v37, %v367_v32  ;;  %v392_v44 = vsel %vm364_vm0, %v390_v28, %v391_v33  ;;  %v6027_v47 = vld [vmem:[%s5932_s13 + $0xd0] sm:$0x3]  ;;  %v6056_v63 = vld [vmem:[%s5932_s13 + $0x98] sm:$0xff] }
  0x24   : > { %9247 = vst [vmem:[#allocation10_spill] sm:$0xff] %v6000_v31  ;;  %4399 = vrot.lane.b32.xlu1 %v6000_v31, %s5830_s14  ;;  %v394_v45 = vsel %vm364_vm0, %v391_v33, %v393_v34  ;;  %v370_v46 = vrot.slane %v5996_v30, 1  ;;  %v371_v50 = vrot.slane %v6006_v35, 1  ;;  %v6033_v51 = vld [vmem:[%s5932_s13 + $0xa8] sm:$0xff]  ;;  %v373_v53 = vrot.slane %v6009_v36, 1  ;;  %v6053_v62 = vld [vmem:[%s5932_s13 + $0x90] sm:$0xff] }
  0x25   : > { %v382_v48 = vsel %vm364_vm0, %v380_v38, %v381_v39  ;;  %v384_v49 = vsel %vm364_vm0, %v381_v39, %v383_v40  ;;  %4389 = vrot.lane.b32.xlu0 %v4388_v43, %s5830_s14  ;;  %v6036_v52 = vpack.i.bf16 %v394_v45, %v392_v44  ;;  %v405_v54 = vrot.slane %v6016_v41, 1  ;;  %v6045_v57 = vld [vmem:[%s5932_s13 + $0xb8] sm:$0x3]  ;;  %v6059_v3 = vld [vmem:[%s5932_s13 + $0xa0] sm:$0x3]  ;;  %v6074_v22 = vld [vmem:[%s5932_s13 + $0x108] sm:$0xff] }
  0x26   : > { %v406_v55 = vrot.slane %v6019_v42, 1  ;;  %v372_v58 = vsel %vm364_vm0, %v370_v46, %v371_v50  ;;  %v408_v59 = vrot.slane %v6027_v47, 1  ;;  %v6049_v60 = vpack.i.bf16 %v384_v49, %v382_v48  ;;  %v6077_v26 = vld [vmem:[%s5932_s13 + $0x110] sm:$0xff]  ;;  %v6082_v27 = vld [vmem:[%s5932_s13 + $0x118] sm:$0x3]  ;;  %v6110_v49 = vld [vmem:[%s5932_s13 + $0xe0] sm:$0xff] }
  0x27   : > { %9248 = vst [vmem:[#allocation11_spill] sm:$0xff] %v6036_v52  ;;  %v374_v61 = vsel %vm364_vm0, %v371_v50, %v373_v53  ;;  %v400_v4 = vrot.slane %v6033_v51, 1  ;;  %v401_v5 = vrot.slane %v6042_v56, 1  ;;  %v403_v9 = vrot.slane %v6045_v57, 1  ;;  %v6093_v38 = vld [vmem:[%s5932_s13 + $0xf0] sm:$0xff]  ;;  %v6096_v39 = vld [vmem:[%s5932_s13 + $0xf8] sm:$0xff] }
  0x28   : > { %v6066_v10 = vpack.i.bf16 %v374_v61, %v372_v58  ;;  %v407_v13 = vsel %vm364_vm0, %v405_v54, %v406_v55  ;;  %v409_v14 = vsel %vm364_vm0, %v406_v55, %v408_v59  ;;  %v395_v15 = vrot.slane %v6053_v62, 1  ;;  %v6099_v40 = vld [vmem:[%s5932_s13 + $0x100] sm:$0x3]  ;;  %v6107_v48 = vld [vmem:[%s5932_s13 + $0xd8] sm:$0xff]  ;;  %v6113_v50 = vld [vmem:[%s5932_s13 + $0xe8] sm:$0x3] }
  0x29   : > { %v396_v20 = vrot.slane %v6056_v63, 1  ;;  %v398_v21 = vrot.slane %v6059_v3, 1  ;;  %v402_v28 = vsel %vm364_vm0, %v400_v4, %v401_v5  ;;  %v404_v32 = vsel %vm364_vm0, %v401_v5, %v403_v9 }
  0x2a   : > { %4414 = vrot.lane.b32.xlu2 %v6036_v52, %s5830_s14  ;;  %9249 = vst [vmem:[#allocation12_spill] sm:$0xff] %v6066_v10  ;;  %v6088_v33 = vpack.i.bf16 %v409_v14, %v407_v13  ;;  %v420_v34 = vrot.slane %v6074_v22, 1  ;;  %v421_v37 = vrot.slane %v6077_v26, 1  ;;  %v423_v45 = vrot.slane %v6082_v27, 1  ;;  %v6128_v13 = vld [vmem:[%s5932_s13 + $0x150] sm:$0xff]  ;;  %v6131_v14 = vld [vmem:[%s5932_s13 + $0x158] sm:$0xff] }
  0x2b   : > { %v397_v43 = vsel %vm364_vm0, %v395_v15, %v396_v20  ;;  %v399_v44 = vsel %vm364_vm0, %v396_v20, %v398_v21  ;;  %v6104_v46 = vpack.i.bf16 %v404_v32, %v402_v28  ;;  %v415_v53 = vrot.slane %v6093_v38, 1  ;;  %v6136_v15 = vld [vmem:[%s5932_s13 + $0x160] sm:$0x3] }
  0x2c   : > { %4404 = vrot.lane.b32.xlu1 %v6049_v60, %s5830_s14  ;;  %9250 = vst [vmem:[#allocation13_spill] sm:$0xff] %v6088_v33  ;;  %v416_v54 = vrot.slane %v6096_v39, 1  ;;  %v418_v55 = vrot.slane %v6099_v40, 1  ;;  %v6120_v58 = vpack.i.bf16 %v399_v44, %v397_v43  ;;  %v422_v59 = vsel %vm364_vm0, %v420_v34, %v421_v37  ;;  %v6150_v43 = vld [vmem:[%s5932_s13 + $0x140] sm:$0xff]  ;;  %v6153_v44 = vld [vmem:[%s5932_s13 + $0x148] sm:$0x3] }
  0x2d   : > { %4394 = vrot.lane.b32.xlu0 %v6066_v10, %s5830_s14  ;;  %9251 = vst [vmem:[#allocation14_spill] sm:$0xff] %v6104_v46  ;;  %v424_v61 = vsel %vm364_vm0, %v421_v37, %v423_v45  ;;  %v410_v4 = vrot.slane %v6107_v48, 1  ;;  %v411_v5 = vrot.slane %v6110_v49, 1  ;;  %v413_v9 = vrot.slane %v6113_v50, 1  ;;  %v6147_v37 = vld [vmem:[%s5932_s13 + $0x138] sm:$0xff] }
  0x2e   : > { %9252 = vst [vmem:[#allocation15_spill] sm:$0xff] %v6120_v58  ;;  %v417_v20 = vsel %vm364_vm0, %v415_v53, %v416_v54  ;;  %v419_v21 = vsel %vm364_vm0, %v416_v54, %v418_v55  ;;  %v6142_v28 = vpack.i.bf16 %v424_v61, %v422_v59  ;;  %v435_v32 = vrot.slane %v6128_v13, 1  ;;  %v6161_v59 = vld [vmem:[%s5932_s13 + $0x120] sm:$0xff]  ;;  %v6164_v61 = vld [vmem:[%s5932_s13 + $0x128] sm:$0xff] }
  0x2f   : > { %v436_v34 = vrot.slane %v6131_v14, 1  ;;  %v412_v45 = vsel %vm364_vm0, %v410_v4, %v411_v5  ;;  %v414_v53 = vsel %vm364_vm0, %v411_v5, %v413_v9  ;;  %v438_v54 = vrot.slane %v6136_v15, 1 }
  0x30   : > { %9253 = vst [vmem:[#allocation16_spill] sm:$0xff] %v6142_v28  ;;  %v6158_v55 = vpack.i.bf16 %v419_v21, %v417_v20  ;;  %v431_v19 = vrot.slane %v6150_v43, 1  ;;  %v433_v52 = vrot.slane %v6153_v44, 1  ;;  %v6174_v4 = vpack.i.bf16 %v414_v53, %v412_v45 }
  0x31   : > { %v437_v5 = vsel %vm364_vm0, %v435_v32, %v436_v34  ;;  %v439_v9 = vsel %vm364_vm0, %v436_v34, %v438_v54  ;;  %v425_v20 = vrot.slane %v6161_v59, 1  ;;  %v426_v21 = vrot.slane %v6164_v61, 1 }
  0x32   : > { %4429 = vrot.lane.b32.xlu2 %v6088_v33, %s5830_s14  ;;  %9254 = vst [vmem:[#allocation17_spill] sm:$0xff] %v6158_v55  ;;  %v430_v33 = vrot.slane %v6147_v37, 1  ;;  %v434_v45 = vsel %vm364_vm0, %v431_v19, %v433_v52  ;;  %v6187_v32 = vpack.i.bf16 %v439_v9, %v437_v5  ;;  %v451_v34 = vrot.slane %v5996_v30, 2  ;;  %v6203_v52 = vld [vmem:[%s5932_s13 + $0x178] sm:$0x3] }
  0x33   : > { %9255 = vst [vmem:[#allocation18_spill] sm:$0xff] %v6174_v4  ;;  %v452_v53 = vrot.slane %v6006_v35, 2  ;;  %v427_v54 = vsel %vm364_vm0, %v425_v20, %v426_v21  ;;  %v449_v5 = vrot.slane %v5967_v16, 2  ;;  %v446_v9 = vrot.slane %v5958_v11, 2 }
  0x34   : > { %4424 = vrot.lane.b32.xlu1 %v6104_v46, %s5830_s14  ;;  %v6167_v46 = vld [vmem:[%s5932_s13 + $0x130] sm:$0x3]  ;;  %v469_v16 = vrot.slane %v5941_v2, 2  ;;  %v464_v2 = vrot.slane %v5993_v29, 2 }
  0x35   : > { %4419 = vrot.lane.b32.xlu0 %v6120_v58, %s5830_s14  ;;  %v428_v58 = vrot.slane %v6167_v46, 1 }
  0x37   : > { %v429_v10 = vsel %vm364_vm0, %v426_v21, %v428_v58 }
  0x38   : > { %v6210_v58 = vpack.i.bf16 %v429_v10, %v427_v54  ;;  %v467_v54 = vrot.slane %v5938_v1, 2 }
  0x3a   : > { %4444 = vrot.lane.b32.xlu2 %v6142_v28, %s5830_s14  ;;  %v432_v28 = vsel %vm364_vm0, %v430_v33, %v431_v19  ;;  %v6197_v33 = vld [vmem:[%s5932_s13 + $0x168] sm:$0xff]  ;;  %v6200_v19 = vld [vmem:[%s5932_s13 + $0x170] sm:$0xff] }
  0x3b   : > { %v6194_v31 = vpack.i.bf16 %v434_v45, %v432_v28  ;;  %v440_v20 = vrot.slane %v6197_v33, 1  ;;  %v441_v21 = vrot.slane %v6200_v19, 1  ;;  %v443_v45 = vrot.slane %v6203_v52, 1 }
  0x3c   : > { %4439 = vrot.lane.b32.xlu1 %v6158_v55, %s5830_s14  ;;  %v454_v55 = vrot.slane %v6009_v36, 2  ;;  %v453_v36 = vsel %vm445_vm1, %v451_v34, %v452_v53 }
  0x3d   : > { %4434 = vrot.lane.b32.xlu0 %v6174_v4, %s5830_s14  ;;  %9256 = vst [vmem:[#allocation19_spill] sm:$0xff] %v6194_v31  ;;  %v447_v4 = vrot.slane %v5961_v12, 2  ;;  %v444_v34 = vsel %vm364_vm0, %v441_v21, %v443_v45  ;;  %v457_v45 = vrot.slane %v5950_v7, 2 }
  0x3e   : > { %v455_v28 = vsel %vm445_vm1, %v452_v53, %v454_v55  ;;  %v442_v55 = vsel %vm364_vm0, %v440_v20, %v441_v21  ;;  %v466_v53 = vrot.slane %v5935_v0, 2  ;;  %v470_v20 = vsel %vm445_vm1, %v467_v54, %v469_v16 }
  0x3f   : > { %v448_v11 = vsel %vm445_vm1, %v446_v9, %v447_v4  ;;  %v450_v12 = vsel %vm445_vm1, %v447_v4, %v449_v5  ;;  %v6224_v10 = vpack.i.bf16 %v455_v28, %v453_v36  ;;  %v461_v9 = vrot.slane %v5984_v24, 2 }
  0x40   : > { %v462_v4 = vrot.slane %v5987_v25, 2  ;;  %v459_v5 = vrot.slane %v5953_v8, 2  ;;  %v6236_v36 = vpack.i.bf16 %v444_v34, %v442_v55  ;;  %v468_v28 = vsel %vm445_vm1, %v466_v53, %v467_v54 }
  0x41   : > { %v456_v21 = vrot.slane %v5947_v6, 2  ;;  %v482_v34 = vrot.slane %v6042_v56, 2  ;;  %v484_v53 = vrot.slane %v6045_v57, 2  ;;  %v476_v54 = vrot.slane %v6053_v62, 2 }
  0x42   : > { %4459 = vrot.lane.b32.xlu2 %v6187_v32, %s5830_s14  ;;  %v463_v29 = vsel %vm445_vm1, %v461_v9, %v462_v4  ;;  %v465_v8 = vsel %vm445_vm1, %v462_v4, %v464_v2  ;;  %v460_v16 = vsel %vm445_vm1, %v457_v45, %v459_v5  ;;  %v477_v9 = vrot.slane %v6056_v63, 2 }
  0x43   : > { %v458_v55 = vsel %vm445_vm1, %v456_v21, %v457_v45  ;;  %v479_v4 = vrot.slane %v6059_v3, 2  ;;  %v472_v57 = vrot.slane %v5973_v18, 2  ;;  %v474_v21 = vrot.slane %v5981_v23, 2 }
  0x44   : > { %4454 = vrot.lane.b32.xlu1 %v6194_v31, %s5830_s14  ;;  %v4468_v31 = vpack.i.bf16 %v450_v12, %v448_v11  ;;  %v6247_v11 = vpack.i.bf16 %v470_v20, %v468_v28  ;;  %v481_v12 = vrot.slane %v6033_v51, 2  ;;  %v6261_v2 = vpack.i.bf16 %v460_v16, %v458_v55 }
  0x45   : > { %4449 = vrot.lane.b32.xlu0 %v6210_v58, %s5830_s14  ;;  %v471_v28 = vrot.slane %v5970_v17, 2  ;;  %v485_v20 = vsel %vm445_vm1, %v482_v34, %v484_v53  ;;  %v478_v3 = vsel %vm445_vm1, %v476_v54, %v477_v9  ;;  %v480_v45 = vsel %vm445_vm1, %v477_v9, %v479_v4 }
  0x46   : > { %v483_v5 = vsel %vm445_vm1, %v481_v12, %v482_v34  ;;  %v497_v12 = vrot.slane %v6096_v39, 2  ;;  %v475_v23 = vsel %vm445_vm1, %v472_v57, %v474_v21  ;;  %v499_v16 = vrot.slane %v6099_v40, 2 }
  0x47   : > { %v473_v55 = vsel %vm445_vm1, %v471_v28, %v472_v57  ;;  %v6281_v34 = vpack.i.bf16 %v480_v45, %v478_v3  ;;  %v491_v53 = vrot.slane %v6107_v48, 2  ;;  %v492_v54 = vrot.slane %v6110_v49, 2 }
  0x48   : > { %v494_v9 = vrot.slane %v6113_v50, 2  ;;  %v6288_v4 = vpack.i.bf16 %v475_v23, %v473_v55  ;;  %v500_v28 = vsel %vm445_vm1, %v497_v12, %v499_v16  ;;  %v487_v40 = vrot.slane %v6019_v42, 2 }
  0x49   : > { %v489_v57 = vrot.slane %v6027_v47, 2  ;;  %v493_v50 = vsel %vm445_vm1, %v491_v53, %v492_v54  ;;  %v511_v45 = vrot.slane %v6147_v37, 2  ;;  %v514_v55 = vrot.slane %v6153_v44, 2 }
  0x4a   : > { %4474 = vrot.lane.b32.xlu2 %v6224_v10, %s5831_s15  ;;  %v495_v21 = vsel %vm445_vm1, %v492_v54, %v494_v9  ;;  %v506_v16 = vrot.slane %v6161_v59, 2  ;;  %v507_v53 = vrot.slane %v6164_v61, 2  ;;  %v509_v54 = vrot.slane %v6167_v46, 2 }
  0x4b   : > { %v490_v47 = vsel %vm445_vm1, %v487_v40, %v489_v57  ;;  %v6308_v23 = vpack.i.bf16 %v495_v21, %v493_v50  ;;  %v502_v44 = vrot.slane %v6077_v26, 2 }
  0x4c   : > { %4469 = vrot.lane.b32.xlu1 %v4468_v31, %s5831_s15  ;;  %v6254_v31 = vpack.i.bf16 %v465_v8, %v463_v29  ;;  %v6274_v29 = vpack.i.bf16 %v485_v20, %v483_v5  ;;  %v496_v8 = vrot.slane %v6093_v38, 2  ;;  %v486_v20 = vrot.slane %v6016_v41, 2 }
  0x4d   : > { %4464 = vrot.lane.b32.xlu0 %v6236_v36, %s5830_s14  ;;  %v508_v46 = vsel %vm445_vm1, %v506_v16, %v507_v53  ;;  %v510_v57 = vsel %vm445_vm1, %v507_v53, %v509_v54  ;;  %v516_v16 = vrot.slane %v6128_v13, 2  ;;  %v517_v53 = vrot.slane %v6131_v14, 2 }
  0x4e   : > { %v498_v5 = vsel %vm445_vm1, %v496_v8, %v497_v12  ;;  %v512_v8 = vrot.slane %v6150_v43, 2  ;;  %v488_v12 = vsel %vm445_vm1, %v486_v20, %v487_v40  ;;  %v501_v20 = vrot.slane %v6074_v22, 2 }
  0x4f   : > { %v6301_v3 = vpack.i.bf16 %v500_v28, %v498_v5  ;;  %v6315_v9 = vpack.i.bf16 %v490_v47, %v488_v12  ;;  %v504_v40 = vrot.slane %v6082_v27, 2  ;;  %v521_v27 = vrot.slane %v6197_v33, 2 }
  0x50   : > { %v513_v5 = vsel %vm445_vm1, %v511_v45, %v512_v8  ;;  %v515_v28 = vsel %vm445_vm1, %v512_v8, %v514_v55  ;;  %v503_v21 = vsel %vm445_vm1, %v501_v20, %v502_v44  ;;  %v6332_v8 = vpack.i.bf16 %v510_v57, %v508_v46 }
  0x51   : > { %v6328_v50 = vpack.i.bf16 %v515_v28, %v513_v5  ;;  %v505_v45 = vsel %vm445_vm1, %v502_v44, %v504_v40  ;;  %v522_v12 = vrot.slane %v6200_v19, 2  ;;  %v524_v47 = vrot.slane %v6203_v52, 2 }
  0x52   : > { %4489 = vrot.lane.b32.xlu2 %v6247_v11, %s5831_s15  ;;  %v6339_v55 = vpack.i.bf16 %v505_v45, %v503_v21  ;;  %v519_v54 = vrot.slane %v6136_v15, 2  ;;  %v4548_v52 = vpack.i.bf16 %v6006_v35, %v5996_v30  ;;  %v518_v20 = vsel %vm445_vm1, %v516_v16, %v517_v53  ;;  %v9266_v21 = vld [vmem:[#allocation11_spill] sm:$0xff]  ;;  %v9271_v16 = vld [vmem:[#allocation18_spill] sm:$0xff] }
  0x53   : > { %v523_v5 = vsel %vm445_vm1, %v521_v27, %v522_v12  ;;  %v525_v28 = vsel %vm445_vm1, %v522_v12, %v524_v47  ;;  %v6365_v30 = vpack.i.bf16 %v5938_v1, %v5935_v0  ;;  %v6369_v35 = vpack.i.bf16 %v5987_v25, %v5984_v24  ;;  %v9268_v27 = vld [vmem:[#allocation9_spill] sm:$0xff] }
  0x54   : > { %4484 = vrot.lane.b32.xlu1 %v6254_v31, %s5831_s15  ;;  %v520_v44 = vsel %vm445_vm1, %v517_v53, %v519_v54  ;;  %v6354_v40 = vpack.i.bf16 %v525_v28, %v523_v5  ;;  %v6375_v46 = vpack.i.bf16 %v5950_v7, %v5947_v6  ;;  %v6385_v0 = vpack.i.bf16 %v6042_v56, %v6033_v51  ;;  %v9272_v53 = vld [vmem:[#allocation13_spill] sm:$0xff]  ;;  %v9274_v5 = vld [vmem:[#allocation14_spill] sm:$0xff] }
  0x55   : > { %4479 = vrot.lane.b32.xlu0 %v6261_v2, %s5831_s15  ;;  %v6357_v15 = vpack.i.bf16 %v520_v44, %v518_v20  ;;  %v6389_v1 = vpack.i.bf16 %v6056_v63, %v6053_v62  ;;  %v6395_v6 = vpack.i.bf16 %v5973_v18, %v5970_v17  ;;  %v6405_v24 = vpack.i.bf16 %v6096_v39, %v6093_v38  ;;  %v6441_v62 = vld [vmem:[%s5932_s13 + $0x188] sm:$0xff] }
  0x56   : > { %v6409_v25 = vpack.i.bf16 %v6110_v49, %v6107_v48  ;;  %v6415_v17 = vpack.i.bf16 %v6019_v42, %v6016_v41  ;;  %v6425_v51 = vpack.i.bf16 %v6150_v43, %v6147_v37  ;;  %v6429_v56 = vpack.i.bf16 %v6164_v61, %v6161_v59  ;;  %v6438_v42 = vld [vmem:[%s5932_s13 + $0x180] sm:$0xff]  ;;  %v9260_v59 = vld [vmem:[#allocation10_spill] sm:$0xff]  ;;  %v9277_v20 = vld [vmem:[#allocation16_spill] sm:$0xff] }
  0x57   : > { %v6435_v41 = vpack.i.bf16 %v6077_v26, %v6074_v22  ;;  %v6453_v39 = vpack.i.bf16 %v6441_v62, %v6438_v42  ;;  %v6459_v26 = vpack.i.bf16 %v6200_v19, %v6197_v33  ;;  %v6465_v48 = vpack.i.bf16 %v6131_v14, %v6128_v13  ;;  %v9262_v14 = vld [vmem:[#allocation12_spill] sm:$0xff]  ;;  %v9265_v19 = vld [vmem:[#allocation15_spill] sm:$0xff] }
  0x5a   : > { %4504 = vrot.lane.b32.xlu2 %v6274_v29, %s5831_s15 }
  0x5c   : > { %4499 = vrot.lane.b32.xlu1 %v6281_v34, %s5831_s15 }
  0x5d   : > { %4494 = vrot.lane.b32.xlu0 %v6288_v4, %s5831_s15 }
  0x62   : > { %4519 = vrot.lane.b32.xlu2 %v6301_v3, %s5831_s15 }
  0x64   : > { %4514 = vrot.lane.b32.xlu1 %v6308_v23, %s5831_s15 }
  0x65   : > { %4509 = vrot.lane.b32.xlu0 %v6315_v9, %s5831_s15 }
  0x6a   : > { %4534 = vrot.lane.b32.xlu2 %v6328_v50, %s5831_s15 }
  0x6c   : > { %4529 = vrot.lane.b32.xlu1 %v6332_v8, %s5831_s15 }
  0x6d   : > { %4524 = vrot.lane.b32.xlu0 %v6339_v55, %s5831_s15 }
  0x72   : > { %4549 = vrot.lane.b32.xlu2 %v4548_v52, %s5832_s16 }
  0x74   : > { %4544 = vrot.lane.b32.xlu1 %v6354_v40, %s5831_s15 }
  0x75   : > { %4539 = vrot.lane.b32.xlu0 %v6357_v15, %s5831_s15 }
  0x7a   : > { %4564 = vrot.lane.b32.xlu2 %v6365_v30, %s5832_s16 }
  0x7c   : > { %4559 = vrot.lane.b32.xlu1 %v6369_v35, %s5832_s16  ;;  %v6379_v57 = vpop.permute.xlu2 %4409 }
  0x7d   : > { %4554 = vrot.lane.b32.xlu0 %v6375_v46, %s5832_s16 }
  0x82   : > { %4579 = vrot.lane.b32.xlu2 %v6385_v0, %s5832_s16 }
  0x84   : > { %4574 = vrot.lane.b32.xlu1 %v6389_v1, %s5832_s16  ;;  %v6399_v7 = vpop.permute.xlu2 %4414 }
  0x85   : > { %4569 = vrot.lane.b32.xlu0 %v6395_v6, %s5832_s16 }
  0x8a   : > { %4594 = vrot.lane.b32.xlu2 %v6405_v24, %s5832_s16 }
  0x8c   : > { %4589 = vrot.lane.b32.xlu1 %v6409_v25, %s5832_s16  ;;  %v6419_v18 = vpop.permute.xlu2 %4429 }
  0x8d   : > { %9257 = vst [vmem:[#allocation20_spill] sm:$0xff] %v6419_v18  ;;  %4584 = vrot.lane.b32.xlu0 %v6415_v17, %s5832_s16 }
  0x92   : > { %4609 = vrot.lane.b32.xlu2 %v6425_v51, %s5832_s16 }
  0x94   : > { %4604 = vrot.lane.b32.xlu1 %v6429_v56, %s5832_s16  ;;  %v6445_v63 = vpop.permute.xlu2 %4444 }
  0x95   : > { %4599 = vrot.lane.b32.xlu0 %v6435_v41, %s5832_s16 }
  0x96   : > { %v6449_v38 = vpop.permute.xlu1 %4399 }
  0x97   : > { %v6455_v22 = vpop.permute.xlu0 %4389 }
  0x9a   : > { %4624 = vrot.lane.b32.xlu2 %v6453_v39, %s5832_s16 }
  0x9c   : > { %4619 = vrot.lane.b32.xlu1 %v6459_v26, %s5832_s16  ;;  %v6469_v49 = vpop.permute.xlu2 %4459 }
  0x9d   : > { %9258 = vst [vmem:[#allocation21_spill] sm:$0xff] %v6469_v49  ;;  %4614 = vrot.lane.b32.xlu0 %v6465_v48, %s5832_s16  ;;  %s5839_s16 = smov 40  }
  0x9e   : > { %v6473_v37 = vpop.permute.xlu1 %4404 }
  0x9f   : > { %9259 = vst [vmem:[#allocation22_spill] sm:$0xff] %v6473_v37  ;;  %v6475_v43 = vpop.permute.xlu0 %4394 }
  0xa2   : > { %4639 = vrot.lane.b32.xlu2 %v6049_v60, %s5833_s17 }
  0xa4   : > { %4634 = vrot.lane.b32.xlu1 %v9260_v59, %s5833_s17  ;;  %v6481_v13 = vpop.permute.xlu2 %4474 }
  0xa5   : > { %9261 = vst [vmem:[#allocation10_spill] sm:$0xff] %v6481_v13  ;;  %4629 = vrot.lane.b32.xlu0 %v9262_v14, %s5833_s17  ;;  %v9279_v14 = vld [vmem:[#allocation17_spill] sm:$0xff] }
  0xa6   : > { %v6485_v61 = vpop.permute.xlu1 %4424 }
  0xa7   : > { %9263 = vst [vmem:[#allocation12_spill] sm:$0xff] %v6485_v61  ;;  %v6487_v33 = vpop.permute.xlu0 %4419  ;;  %v312_v61 = vld [vmem:[%s5932_s13 + $0x190] sm:$0x3] }
  0xa8   : > { %9264 = vst [vmem:[#allocation23_spill] sm:$0xff] %v6487_v33 }
  0xaa   : > { %4654 = vrot.lane.b32.xlu2 %v9265_v19, %s5833_s17 }
  0xac   : > { %4649 = vrot.lane.b32.xlu1 %v9266_v21, %s5833_s17  ;;  %v6493_v45 = vpop.permute.xlu2 %4489 }
  0xad   : > { %9267 = vst [vmem:[#allocation15_spill] sm:$0xff] %v6493_v45  ;;  %4644 = vrot.lane.b32.xlu0 %v9268_v27, %s5833_s17  ;;  %v532_v45 = vrot.slane %v312_v61, 1 }
  0xae   : > { %v6497_v12 = vpop.permute.xlu1 %4439 }
  0xaf   : > { %9269 = vst [vmem:[#allocation11_spill] sm:$0xff] %v6497_v12  ;;  %v6499_v47 = vpop.permute.xlu0 %4434 }
  0xb0   : > { %9270 = vst [vmem:[#allocation9_spill] sm:$0xff] %v6499_v47 }
  0xb2   : > { %4669 = vrot.lane.b32.xlu2 %v9271_v16, %s5833_s17 }
  0xb4   : > { %4664 = vrot.lane.b32.xlu1 %v9272_v53, %s5833_s17  ;;  %v6505_v54 = vpop.permute.xlu2 %4504 }
  0xb5   : > { %9273 = vst [vmem:[#allocation18_spill] sm:$0xff] %v6505_v54  ;;  %4659 = vrot.lane.b32.xlu0 %v9274_v5, %s5833_s17 }
  0xb6   : > { %v6509_v28 = vpop.permute.xlu1 %4454 }
  0xb7   : > { %9275 = vst [vmem:[#allocation13_spill] sm:$0xff] %v6509_v28  ;;  %v6511_v52 = vpop.permute.xlu0 %4449  ;;  %v529_v28 = vrot.slane %v6438_v42, 1 }
  0xb8   : > { %9276 = vst [vmem:[#allocation14_spill] sm:$0xff] %v6511_v52  ;;  %v530_v52 = vrot.slane %v6441_v62, 1 }
  0xba   : > { %4684 = vrot.lane.b32.xlu2 %v6210_v58, %s5833_s17  ;;  %v533_v37 = vsel %vm364_vm0, %v530_v52, %v532_v45 }
  0xbc   : > { %4679 = vrot.lane.b32.xlu1 %v9277_v20, %s5833_s17  ;;  %v6517_v44 = vpop.permute.xlu2 %4519 }
  0xbd   : > { %9278 = vst [vmem:[#allocation16_spill] sm:$0xff] %v6517_v44  ;;  %4674 = vrot.lane.b32.xlu0 %v9279_v14, %s5833_s17  ;;  %v9282_v44 = vld [vmem:[#allocation19_spill] sm:$0xff] }
  0xbe   : > { %v6521_v33 = vpop.permute.xlu1 %4469 }
  0xbf   : > { %v6523_v54 = vpop.permute.xlu0 %4464 }
  0xc0   : > { %9280 = vst [vmem:[#allocation17_spill] sm:$0xff] %v6523_v54  ;;  %v531_v54 = vsel %vm364_vm0, %v529_v28, %v530_v52 }
  0xc1   : > { %v6544_v13 = vpack.i.bf16 %v533_v37, %v531_v54 }
  0xc2   : > { %4699 = vrot.lane.b32.xlu2 %v6236_v36, %s5833_s17 }
  0xc4   : > { %4694 = vrot.lane.b32.xlu1 %v6187_v32, %s5833_s17  ;;  %v6532_v49 = vpop.permute.xlu2 %4534 }
  0xc5   : > { %9281 = vst [vmem:[#allocation24_spill] sm:$0xff] %v6532_v49  ;;  %4689 = vrot.lane.b32.xlu0 %v9282_v44, %s5833_s17 }
  0xc6   : > { %v6536_v12 = vpop.permute.xlu1 %4484 }
  0xc7   : > { %9283 = vst [vmem:[#allocation19_spill] sm:$0xff] %v6536_v12  ;;  %v6540_v47 = vpop.permute.xlu0 %4479 }
  0xc8   : > { %9284 = vst [vmem:[#allocation25_spill] sm:$0xff] %v6540_v47 }
  0xca   : > { %4714 = vrot.lane.b32.xlu2 %v6261_v2, %s5834_s18 }
  0xcc   : > { %4709 = vrot.lane.b32.xlu1 %v6224_v10, %s5834_s18  ;;  %v6548_v49 = vpop.permute.xlu2 %4549 }
  0xcd   : > { %4704 = vrot.lane.b32.xlu0 %v6544_v13, %s5833_s17 }
  0xce   : > { %v6552_v12 = vpop.permute.xlu1 %4499 }
  0xcf   : > { %9285 = vst [vmem:[#allocation26_spill] sm:$0xff] %v6552_v12  ;;  %v6554_v28 = vpop.permute.xlu0 %4494 }
  0xd0   : > { %9286 = vst [vmem:[#allocation27_spill] sm:$0xff] %v6554_v28 }
  0xd2   : > { %4729 = vrot.lane.b32.xlu2 %v6288_v4, %s5834_s18 }
  0xd4   : > { %4724 = vrot.lane.b32.xlu1 %v6247_v11, %s5834_s18  ;;  %v6560_v37 = vpop.permute.xlu2 %4564 }
  0xd5   : > { %9287 = vst [vmem:[#allocation28_spill] sm:$0xff] %v6560_v37  ;;  %4719 = vrot.lane.b32.xlu0 %v6254_v31, %s5834_s18  ;;  %v534_v37 = vrot.slane %v6438_v42, 2 }
  0xd6   : > { %v6564_v10 = vpop.permute.xlu1 %4514 }
  0xd7   : > { %9288 = vst [vmem:[#allocation29_spill] sm:$0xff] %v6564_v10  ;;  %v6566_v45 = vpop.permute.xlu0 %4509 }
  0xd8   : > { %9289 = vst [vmem:[#allocation30_spill] sm:$0xff] %v6566_v45 }
  0xda   : > { %4744 = vrot.lane.b32.xlu2 %v6315_v9, %s5834_s18 }
  0xdc   : > { %4739 = vrot.lane.b32.xlu1 %v6274_v29, %s5834_s18  ;;  %v6572_v54 = vpop.permute.xlu2 %4579 }
  0xdd   : > { %9290 = vst [vmem:[#allocation31_spill] sm:$0xff] %v6572_v54  ;;  %4734 = vrot.lane.b32.xlu0 %v6281_v34, %s5834_s18 }
  0xde   : > { %v6576_v52 = vpop.permute.xlu1 %4529 }
  0xdf   : > { %9291 = vst [vmem:[#allocation32_spill] sm:$0xff] %v6576_v52  ;;  %v6578_v12 = vpop.permute.xlu0 %4524  ;;  %v535_v52 = vrot.slane %v6441_v62, 2 }
  0xe0   : > { %9292 = vst [vmem:[#allocation33_spill] sm:$0xff] %v6578_v12  ;;  %v537_v12 = vrot.slane %v312_v61, 2 }
  0xe2   : > { %4759 = vrot.lane.b32.xlu2 %v6339_v55, %s5834_s18  ;;  %v538_v47 = vsel %vm445_vm1, %v535_v52, %v537_v12 }
  0xe4   : > { %4754 = vrot.lane.b32.xlu1 %v6301_v3, %s5834_s18  ;;  %v6584_v45 = vpop.permute.xlu2 %4594 }
  0xe5   : > { %9293 = vst [vmem:[#allocation34_spill] sm:$0xff] %v6584_v45  ;;  %4749 = vrot.lane.b32.xlu0 %v6308_v23, %s5834_s18  ;;  %v536_v45 = vsel %vm445_vm1, %v534_v37, %v535_v52 }
  0xe6   : > { %v6588_v28 = vpop.permute.xlu1 %4544  ;;  %v6608_v62 = vpack.i.bf16 %v538_v47, %v536_v45 }
  0xe7   : > { %9294 = vst [vmem:[#allocation35_spill] sm:$0xff] %v6588_v28  ;;  %v6590_v54 = vpop.permute.xlu0 %4539 }
  0xe8   : > { %9295 = vst [vmem:[#allocation36_spill] sm:$0xff] %v6590_v54 }
  0xea   : > { %4774 = vrot.lane.b32.xlu2 %v6357_v15, %s5834_s18 }
  0xec   : > { %4769 = vrot.lane.b32.xlu1 %v6328_v50, %s5834_s18  ;;  %v6598_v10 = vpop.permute.xlu2 %4609 }
  0xed   : > { %4764 = vrot.lane.b32.xlu0 %v6332_v8, %s5834_s18 }
  0xee   : > { %v6604_v28 = vpop.permute.xlu1 %4559 }
  0xef   : > { %v6606_v42 = vpop.permute.xlu0 %4554 }
  0xf2   : > { %4789 = vrot.lane.b32.xlu2 %v6375_v46, %s5835_s19 }
  0xf4   : > { %4784 = vrot.lane.b32.xlu1 %v6608_v62, %s5834_s18  ;;  %v6614_v61 = vpop.permute.xlu2 %4624 }
  0xf5   : > { %9296 = vst [vmem:[#allocation37_spill] sm:$0xff] %v6614_v61  ;;  %4779 = vrot.lane.b32.xlu0 %v6354_v40, %s5834_s18  ;;  %s5841_s18 = smov 56  }
  0xf6   : > { %v6618_v12 = vpop.permute.xlu1 %4574 }
  0xf7   : > { %9297 = vst [vmem:[#allocation38_spill] sm:$0xff] %v6618_v12  ;;  %v6620_v37 = vpop.permute.xlu0 %4569 }
  0xfa   : > { %4804 = vrot.lane.b32.xlu2 %v6395_v6, %s5835_s19 }
  0xfc   : > { %4799 = vrot.lane.b32.xlu1 %v6365_v30, %s5835_s19  ;;  %v6626_v47 = vpop.permute.xlu2 %4639 }
  0xfd   : > { %4794 = vrot.lane.b32.xlu0 %v6369_v35, %s5835_s19 }
  0xfe   : > { %v6630_v46 = vpop.permute.xlu1 %4589 }
  0xff   : > { %9298 = vst [vmem:[#allocation39_spill] sm:$0xff] %v6630_v46  ;;  %v6632_v45 = vpop.permute.xlu0 %4584  ;;  %v6664_v46 = vld [vmem:[%s5932_s13 + $0x1a0] sm:$0xff] }
 0x100   : > { %9299 = vst [vmem:[#allocation40_spill] sm:$0xff] %v6632_v45 }
 0x102   : > { %4819 = vrot.lane.b32.xlu2 %v6415_v17, %s5835_s19 }
 0x104   : > { %4814 = vrot.lane.b32.xlu1 %v6385_v0, %s5835_s19  ;;  %v6638_v6 = vpop.permute.xlu2 %4654 }
 0x105   : > { %9300 = vst [vmem:[#allocation41_spill] sm:$0xff] %v6638_v6  ;;  %4809 = vrot.lane.b32.xlu0 %v6389_v1, %s5835_s19  ;;  %v6661_v1 = vld [vmem:[%s5932_s13 + $0x198] sm:$0xff] }
 0x106   : > { %v6642_v30 = vpop.permute.xlu1 %4604 }
 0x107   : > { %v6644_v35 = vpop.permute.xlu0 %4599 }
 0x10a   : > { %4834 = vrot.lane.b32.xlu2 %v6435_v41, %s5835_s19  ;;  %v4863_v41 = vpack.i.bf16 %v6664_v46, %v6661_v1 }
 0x10c   : > { %4829 = vrot.lane.b32.xlu1 %v6405_v24, %s5835_s19  ;;  %v6650_v52 = vpop.permute.xlu2 %4669 }
 0x10d   : > { %9301 = vst [vmem:[#allocation42_spill] sm:$0xff] %v6650_v52  ;;  %4824 = vrot.lane.b32.xlu0 %v6409_v25, %s5835_s19 }
 0x10e   : > { %v6654_v0 = vpop.permute.xlu1 %4619 }
 0x10f   : > { %9302 = vst [vmem:[#allocation43_spill] sm:$0xff] %v6654_v0  ;;  %v6656_v17 = vpop.permute.xlu0 %4614 }
 0x110   : > { %9303 = vst [vmem:[#allocation44_spill] sm:$0xff] %v6656_v17 }
 0x112   : > { %4849 = vrot.lane.b32.xlu2 %v6465_v48, %s5835_s19 }
 0x114   : > { %4844 = vrot.lane.b32.xlu1 %v6425_v51, %s5835_s19  ;;  %v6668_v24 = vpop.permute.xlu2 %4684 }
 0x115   : > { %4839 = vrot.lane.b32.xlu0 %v6429_v56, %s5835_s19 }
 0x116   : > { %v6672_v25 = vpop.permute.xlu1 %4634 }
 0x117   : > { %v6676_v52 = vpop.permute.xlu0 %4629 }
 0x118   : > { %v4632_v6 = vunpack.i.h.bf16 %v6676_v52 }
 0x11a   : > { %4864 = vrot.lane.b32.xlu2 %v4863_v41, %s5835_s19 }
 0x11c   : > { %4859 = vrot.lane.b32.xlu1 %v6453_v39, %s5835_s19  ;;  %v6681_v48 = vpop.permute.xlu2 %4699 }
 0x11d   : > { %9304 = vst [vmem:[#allocation45_spill] sm:$0xff] %v6681_v48  ;;  %4854 = vrot.lane.b32.xlu0 %v6459_v26, %s5835_s19 }
 0x11e   : > { %v6685_v51 = vpop.permute.xlu1 %4649 }
 0x11f   : > { %v6687_v56 = vpop.permute.xlu0 %4644 }
 0x122   : > { %4879 = vrot.lane.b32.xlu2 %v9268_v27, %s5836_s20 }
 0x124   : > { %4874 = vrot.lane.b32.xlu1 %v6049_v60, %s5836_s20  ;;  %v6693_v41 = vpop.permute.xlu2 %4714 }
 0x125   : > { %4869 = vrot.lane.b32.xlu0 %v9260_v59, %s5836_s20  ;;  %v4716_v18 = vunpack.i.l.bf16 %v6693_v41 }
 0x126   : > { %v6697_v39 = vpop.permute.xlu1 %4664 }
 0x127   : > { %9305 = vst [vmem:[#allocation46_spill] sm:$0xff] %v6697_v39  ;;  %v6699_v61 = vpop.permute.xlu0 %4659 }
 0x128   : > { %9306 = vst [vmem:[#allocation47_spill] sm:$0xff] %v6699_v61 }
 0x12a   : > { %4894 = vrot.lane.b32.xlu2 %v9274_v5, %s5836_s20 }
 0x12c   : > { %4889 = vrot.lane.b32.xlu1 %v9265_v19, %s5836_s20  ;;  %v6705_v26 = vpop.permute.xlu2 %4729 }
 0x12d   : > { %4884 = vrot.lane.b32.xlu0 %v9266_v21, %s5836_s20 }
 0x12e   : > { %v6709_v60 = vpop.permute.xlu1 %4679 }
 0x12f   : > { %v6711_v27 = vpop.permute.xlu0 %4674 }
 0x132   : > { %4909 = vrot.lane.b32.xlu2 %v9279_v14, %s5836_s20  ;;  %v315_v14 = vld [vmem:[%s5932_s13 + $0x1a8] sm:$0x3] }
 0x133   : > { %v545_v39 = vrot.slane %v315_v14, 1 }
 0x134   : > { %4904 = vrot.lane.b32.xlu1 %v9271_v16, %s5836_s20  ;;  %v6719_v59 = vpop.permute.xlu2 %4744 }
 0x135   : > { %4899 = vrot.lane.b32.xlu0 %v9272_v53, %s5836_s20  ;;  %9307 = vst [vmem:[#allocation48_spill] sm:$0xff] %v6719_v59  ;;  %v543_v59 = vrot.slane %v6664_v46, 1 }
 0x136   : > { %v6721_v19 = vpop.permute.xlu1 %4694 }
 0x137   : > { %9308 = vst [vmem:[#allocation49_spill] sm:$0xff] %v6721_v19  ;;  %v6723_v5 = vpop.permute.xlu0 %4689  ;;  %v5670_v19 = vld [vmem:[%s5932_s13] sm:$0xff] }
 0x13a   : > { %4924 = vrot.lane.b32.xlu2 %v9282_v44, %s5836_s20  ;;  %v542_v44 = vrot.slane %v6661_v1, 1 }
 0x13c   : > { %4919 = vrot.lane.b32.xlu1 %v6210_v58, %s5836_s20  ;;  %v6733_v16 = vpop.permute.xlu2 %4759 }
 0x13d   : > { %4914 = vrot.lane.b32.xlu0 %v9277_v20, %s5836_s20  ;;  %v544_v20 = vsel %vm364_vm0, %v542_v44, %v543_v59  ;;  %v550_v44 = vrot.slane %v315_v14, 2 }
 0x13e   : > { %v6731_v21 = vpop.permute.xlu1 %4709 }
 0x13f   : > { %v6735_v53 = vpop.permute.xlu0 %4704 }
 0x140   : > { %9309 = vst [vmem:[#allocation50_spill] sm:$0xff] %v6735_v53  ;;  %v546_v53 = vsel %vm364_vm0, %v543_v59, %v545_v39  ;;  %v547_v39 = vrot.slane %v6661_v1, 2 }
 0x141   : > { %v4943_v48 = vpack.i.bf16 %v546_v53, %v544_v20 }
 0x142   : > { %4939 = vrot.lane.b32.xlu2 %v6544_v13, %s5836_s20 }
 0x144   : > { %4934 = vrot.lane.b32.xlu1 %v6236_v36, %s5836_s20  ;;  %v6752_v13 = vpop.permute.xlu2 %4774  ;;  %v548_v36 = vrot.slane %v6664_v46, 2 }
 0x145   : > { %4929 = vrot.lane.b32.xlu0 %v6187_v32, %s5836_s20  ;;  %9310 = vst [vmem:[#allocation51_spill] sm:$0xff] %v6752_v13  ;;  %v4472_v13 = vunpack.i.h.bf16 %v6521_v33 }
 0x146   : > { %v6746_v58 = vpop.permute.xlu1 %4724 }
 0x147   : > { %v6750_v45 = vpop.permute.xlu0 %4719 }
 0x14a   : > { %4954 = vrot.lane.b32.xlu2 %v6254_v31, %s5837_s26  ;;  %v549_v31 = vsel %vm445_vm1, %v547_v39, %v548_v36 }
 0x14c   : > { %4949 = vrot.lane.b32.xlu1 %v6261_v2, %s5837_s26  ;;  %v6768_v53 = vpop.permute.xlu2 %4789  ;;  %v551_v2 = vsel %vm445_vm1, %v548_v36, %v550_v44 }
 0x14d   : > { %4944 = vrot.lane.b32.xlu0 %v4943_v48, %s5836_s20  ;;  %v5023_v48 = vpack.i.bf16 %v551_v2, %v549_v31 }
 0x14e   : > { %v6759_v32 = vpop.permute.xlu1 %4739 }
 0x14f   : > { %9311 = vst [vmem:[#allocation52_spill] sm:$0xff] %v6759_v32  ;;  %v6763_v59 = vpop.permute.xlu0 %4734 }
 0x150   : > { %9312 = vst [vmem:[#allocation53_spill] sm:$0xff] %v6763_v59 }
 0x152   : > { %4969 = vrot.lane.b32.xlu2 %v6281_v34, %s5837_s26 }
 0x154   : > { %4964 = vrot.lane.b32.xlu1 %v6288_v4, %s5837_s26  ;;  %v6783_v34 = vpop.permute.xlu2 %4804 }
 0x155   : > { %4959 = vrot.lane.b32.xlu0 %v6247_v11, %s5837_s26 }
 0x156   : > { %v6775_v46 = vpop.permute.xlu1 %4754 }
 0x157   : > { %v6777_v1 = vpop.permute.xlu0 %4749 }
 0x158   : > { %9313 = vst [vmem:[#allocation54_spill] sm:$0xff] %v6777_v1 }
 0x15a   : > { %4984 = vrot.lane.b32.xlu2 %v6308_v23, %s5837_s26 }
 0x15c   : > { %4979 = vrot.lane.b32.xlu1 %v6315_v9, %s5837_s26  ;;  %v6799_v23 = vpop.permute.xlu2 %4819 }
 0x15d   : > { %4974 = vrot.lane.b32.xlu0 %v6274_v29, %s5837_s26  ;;  %9315 = vst [vmem:[#allocation56_spill] sm:$0xff] %v6799_v23 }
 0x15e   : > { %v6787_v4 = vpop.permute.xlu1 %4769 }
 0x15f   : > { %v6789_v14 = vpop.permute.xlu0 %4764 }
 0x162   : > { %4999 = vrot.lane.b32.xlu2 %v6332_v8, %s5837_s26 }
 0x164   : > { %4994 = vrot.lane.b32.xlu1 %v6339_v55, %s5837_s26 }
 0x165   : > { %4989 = vrot.lane.b32.xlu0 %v6301_v3, %s5837_s26  ;;  %v6813_v3 = vpop.permute.xlu2 %4834 }
 0x166   : > { %v6797_v11 = vpop.permute.xlu1 %4784 }
 0x167   : > { %9314 = vst [vmem:[#allocation55_spill] sm:$0xff] %v6797_v11  ;;  %v6801_v9 = vpop.permute.xlu0 %4779 }
 0x168   : > { %9316 = vst [vmem:[#allocation57_spill] sm:$0xff] %v6801_v9 }
 0x16a   : > { %5014 = vrot.lane.b32.xlu2 %v6354_v40, %s5837_s26 }
 0x16c   : > { %5009 = vrot.lane.b32.xlu1 %v6357_v15, %s5837_s26 }
 0x16d   : > { %5004 = vrot.lane.b32.xlu0 %v6328_v50, %s5837_s26  ;;  %v6822_v20 = vpop.permute.xlu2 %4849 }
 0x16e   : > { %v6809_v29 = vpop.permute.xlu1 %4799  ;;  %9318 = vst [vmem:[#allocation59_spill] sm:$0xff] %v6822_v20 }
 0x16f   : > { %v6811_v8 = vpop.permute.xlu0 %4794 }
 0x174   : > { %5024 = vrot.lane.b32.xlu1 %v5023_v48, %s5837_s26  ;;  %v1604_v48 = vld [vmem:[%s9107_s1 + $0x10] sm:$0x3] }
 0x175   : > { %5019 = vrot.lane.b32.xlu0 %v6608_v62, %s5837_s26  ;;  %v6828_v36 = vpop.permute.xlu2 %4864 }
 0x176   : > { %v6818_v55 = vpop.permute.xlu1 %4814  ;;  %9321 = vst [vmem:[#allocation62_spill] sm:$0xff] %v6828_v36 }
 0x177   : > { %9317 = vst [vmem:[#allocation58_spill] sm:$0xff] %v6818_v55  ;;  %v6820_v40 = vpop.permute.xlu0 %4809 }
 0x17d   : > { %v6836_v2 = vpop.permute.xlu2 %4879 }
 0x17e   : > { %v6824_v15 = vpop.permute.xlu1 %4829 }
 0x17f   : > { %9319 = vst [vmem:[#allocation60_spill] sm:$0xff] %v6824_v15  ;;  %v6826_v50 = vpop.permute.xlu0 %4824  ;;  %v1618_v15 = vunpack.c.l.b16 %v1604_v48 }
 0x180   : > { %9320 = vst [vmem:[#allocation61_spill] sm:$0xff] %v6826_v50 }
 0x181   : > { %v1621_v36 = vpack.c.b16 %v1618_v15, %v1618_v15  ;;  %v4313_v15 = vld [vmem:[%s9107_s1] sm:$0xff] }
 0x183   : > { %v1675_v9 = vsel %vm1673_vm2, %v1621_v36, 0  ;;  %vm3093_vm2 = vcmask 392192  }
 0x184   : > { %1682 = vmatpush.bf16.msra.mxu0 %v1675_v9  ;;  %4321 = vmatpush.bf16.msra.mxu3 %v1675_v9 }
 0x185   : > { %v6847_v50 = vpop.permute.xlu2 %4894 }
 0x186   : > { %v6830_v39 = vpop.permute.xlu1 %4844  ;;  %9324 = vst [vmem:[#allocation65_spill] sm:$0xff] %v6847_v50  ;;  %v4631_v50 = vunpack.i.l.bf16 %v6676_v52 }
 0x187   : > { %v6832_v44 = vpop.permute.xlu0 %4839 }
 0x18d   : > { %v6859_v36 = vpop.permute.xlu2 %4909 }
 0x18e   : > { %v6834_v31 = vpop.permute.xlu1 %4859  ;;  %9325 = vst [vmem:[#allocation66_spill] sm:$0xff] %v6859_v36  ;;  %v4551_v36 = vunpack.i.l.bf16 %v6548_v49 }
 0x18f   : > { %9322 = vst [vmem:[#allocation63_spill] sm:$0xff] %v6834_v31  ;;  %v6838_v62 = vpop.permute.xlu0 %4854  ;;  %v4314_v31 = vld [vmem:[%s9107_s1 + $0x8] sm:$0xff] }
 0x190   : > { %9323 = vst [vmem:[#allocation64_spill] sm:$0xff] %v6838_v62  ;;  %1683 = vmatpush.bf16.msra.mxu0 %v4314_v31  ;;  %4322 = vmatpush.bf16.msra.mxu3 %v4314_v31  ;;  %v4391_v31 = vunpack.i.l.bf16 %v6455_v22  ;;  %v4392_v62 = vunpack.i.h.bf16 %v6455_v22  ;;  %v5671_v22 = vld [vmem:[%s5932_s13 + $0x8] sm:$0xff] }
 0x192   : > { %v1321_v17 = vsel %vm1320_vm3, %v5670_v19, %v4391_v31  ;;  %v1322_v59 = vsel %vm1320_vm3, %v5671_v22, %v4392_v62  ;;  %v4712_v19 = vunpack.i.h.bf16 %v6731_v21  ;;  %v4791_v31 = vunpack.i.l.bf16 %v6768_v53 }
 0x193   : > { %v1355_v12 = vsel %vm1353_vm5, %v1322_v59, %v4472_v13  ;;  %v4792_v62 = vunpack.i.h.bf16 %v6768_v53 }
 0x194   : > { %1684 = vmatpush.bf16.msra.mxu0 %v4313_v15  ;;  %4323 = vmatpush.bf16.msra.mxu3 %v4313_v15  ;;  %v4471_v15 = vunpack.i.l.bf16 %v6521_v33 }
 0x195   : > { %v6865_v9 = vpop.permute.xlu2 %4924 }
 0x196   : > { %v6843_v1 = vpop.permute.xlu1 %4874  ;;  %v1354_v33 = vsel %vm1353_vm5, %v1321_v17, %v4471_v15 }
 0x197   : > { %v6845_v11 = vpop.permute.xlu0 %4869 }
 0x198   : > { %v4872_v52 = vunpack.i.h.bf16 %v6845_v11  ;;  %v4871_v15 = vunpack.i.l.bf16 %v6845_v11 }
 0x19d   : > { %v6882_v55 = vpop.permute.xlu2 %4939 }
 0x19e   : > { %v6852_v0 = vpop.permute.xlu1 %4889  ;;  %9329 = vst [vmem:[#allocation70_spill] sm:$0xff] %v6882_v55 }
 0x19f   : > { %v6854_v54 = vpop.permute.xlu0 %4884 }
 0x1a6   : > { %v6861_v48 = vpop.permute.xlu1 %4904 }
 0x1a7   : > { %9326 = vst [vmem:[#allocation67_spill] sm:$0xff] %v6861_v48  ;;  %v6863_v23 = vpop.permute.xlu0 %4899 }
 0x1a8   : > { %9327 = vst [vmem:[#allocation68_spill] sm:$0xff] %v6863_v23  ;;  %v4552_v23 = vunpack.i.h.bf16 %v6548_v49  ;;  %v1387_v49 = vsel %vm1386_vm4, %v1354_v33, %v4551_v36  ;;  %v4411_v36 = vunpack.i.l.bf16 %v6379_v57 }
 0x1a9   : > { %v1420_v17 = vsel %vm1419_vm6, %v1387_v49, %v4631_v50 }
 0x1aa   : > { %v1388_v20 = vsel %vm1386_vm4, %v1355_v12, %v4552_v23 }
 0x1ab   : > { %v1421_v13 = vsel %vm1419_vm6, %v1388_v20, %v4632_v6  ;;  %v4417_v6 = vunpack.i.h.bf16 %v6399_v7 }
 0x1ac   : > { %v1454_v12 = vsel %vm1452_vm8, %v1421_v13, %v4712_v19 }
 0x1ad   : > { %v1487_v22 = vsel %vm1485_vm7, %v1454_v12, %v4792_v62  ;;  %v4396_v62 = vunpack.i.l.bf16 %v6475_v43 }
 0x1ae   : > { %v6867_v32 = vpop.permute.xlu1 %4919 }
 0x1af   : > { %v6870_v61 = vpop.permute.xlu0 %4914 }
 0x1b6   : > { %v6876_v48 = vpop.permute.xlu1 %4934 }
 0x1b7   : > { %9328 = vst [vmem:[#allocation69_spill] sm:$0xff] %v6876_v48  ;;  %v4711_v48 = vunpack.i.l.bf16 %v6731_v21  ;;  %v4412_v21 = vunpack.i.h.bf16 %v6379_v57  ;;  %v6904_v53 = vpop.permute.xlu0 %4929  ;;  %v1520_v57 = vsel %vm1518_vm9, %v1487_v22, %v4872_v52  ;;  %v4401_v22 = vunpack.i.l.bf16 %v6449_v38 }
 0x1b8   : > { %9330 = vst [vmem:[#allocation71_spill] sm:$0xff] %v6904_v53 }
 0x1b9   : > { %v1453_v59 = vsel %vm1452_vm8, %v1420_v17, %v4711_v48  ;;  %v4416_v48 = vunpack.i.l.bf16 %v6399_v7  ;;  %v6915_v17 = vpop.permute.xlu2 %4954  ;;  %v4447_v7 = vunpack.i.h.bf16 %v6445_v63 }
 0x1ba   : > { %v1486_v23 = vsel %vm1485_vm7, %v1453_v59, %v4791_v31  ;;  %v4397_v31 = vunpack.i.h.bf16 %v6475_v43  ;;  %v5673_v59 = vld [vmem:[%s5932_s13 + $0x60] sm:$0xff]  ;;  %v4402_v43 = vunpack.i.h.bf16 %v6449_v38 }
 0x1bb   : > { %v1519_v20 = vsel %vm1518_vm9, %v1486_v23, %v4871_v15  ;;  %v5672_v15 = vld [vmem:[%s5932_s13 + $0x68] sm:$0xff]  ;;  %v6924_v12 = vsel %vm1320_vm3, %v5673_v59, %v4411_v36  ;;  %v5674_v23 = vld [vmem:[%s5932_s13 + $0x80] sm:$0xff]  ;;  %v9333_v36 = vld [vmem:[#allocation10_spill] sm:$0xff] }
 0x1bc   : > { %v6919_v52 = vsel %vm1320_vm3, %v5672_v15, %v4412_v21  ;;  %v5675_v21 = vld [vmem:[%s5932_s13 + $0x78] sm:$0xff]  ;;  %v4556_v15 = vunpack.i.l.bf16 %v6606_v42  ;;  %v5678_v59 = vld [vmem:[%s5932_s13 + $0x110] sm:$0xff] }
 0x1be   : > { %v4950_v50 = vpop.permute.xlu1 %4949 }
 0x1bf   : > { %v4952_v11 = vunpack.i.h.bf16 %v4950_v50  ;;  %v4951_v33 = vunpack.i.l.bf16 %v4950_v50  ;;  %v6928_v50 = vsel %vm1320_vm3, %v5674_v23, %v4417_v6  ;;  %v4476_v6 = vunpack.i.l.bf16 %v9333_v36  ;;  %v6961_v55 = vpop.permute.xlu0 %4944 }
 0x1c0   : > { %9331 = vst [vmem:[#allocation72_spill] sm:$0xff] %v6928_v50  ;;  %v6950_v23 = vsel %vm1320_vm3, %v5678_v59, %v4447_v7 }
 0x1c1   : > { %v1552_v49 = vsel %vm1551_vm10, %v1519_v20, %v4951_v33  ;;  %v1553_v19 = vsel %vm1551_vm10, %v1520_v57, %v4952_v11  ;;  %v6935_v11 = vsel %vm1320_vm3, %v5675_v21, %v4416_v48  ;;  %v4477_v20 = vunpack.i.h.bf16 %v9333_v36  ;;  %v5676_v57 = vld [vmem:[%s5932_s13 + $0x20] sm:$0xff]  ;;  %9334 = vst [vmem:[#allocation10_spill] sm:$0xff] %v6961_v55  ;;  %v9341_v55 = vld [vmem:[#allocation34_spill] sm:$0xff] }
 0x1c2   : > { %v1584_v13 = vpack.c.bf16 %v1553_v19, %v1552_v49  ;;  %9332 = vst [vmem:[#allocation73_spill] sm:$0xff] %v6935_v11  ;;  %v1324_v49 = vsel %vm1320_vm3, %v5676_v57, %v4397_v31  ;;  %v5677_v19 = vld [vmem:[%s5932_s13 + $0x18] sm:$0xff]  ;;  %v4637_v36 = vunpack.i.h.bf16 %v6672_v25  ;;  %v4636_v33 = vunpack.i.l.bf16 %v6672_v25 }
 0x1c3   : > { %v1323_v38 = vsel %vm1320_vm3, %v5677_v19, %v4396_v62  ;;  %v5679_v31 = vld [vmem:[%s5932_s13 + $0x38] sm:$0xff]  ;;  %v5680_v62 = vld [vmem:[%s5932_s13 + $0x30] sm:$0xff]  ;;  %v1357_v59 = vsel %vm1353_vm5, %v1324_v49, %v4477_v20  ;;  %v4797_v21 = vunpack.i.h.bf16 %v6811_v8  ;;  %v4796_v25 = vunpack.i.l.bf16 %v6811_v8 }
 0x1c4   : > { %4193 = vmatmul.msk.bf16.vlgmr.msra.gmra.mxu0 %vm1624_vm11, %v1584_v13  ;;  %v4557_v13 = vunpack.i.h.bf16 %v6606_v42  ;;  %v1326_v57 = vsel %vm1320_vm3, %v5679_v31, %v4402_v43  ;;  %v1325_v19 = vsel %vm1320_vm3, %v5680_v62, %v4401_v22  ;;  %v4717_v42 = vunpack.i.h.bf16 %v6693_v41  ;;  %v9335_v49 = vld [vmem:[#allocation9_spill] sm:$0xff] }
 0x1c5   : > { %v1356_v7 = vsel %vm1353_vm5, %v1323_v38, %v4476_v6  ;;  %v4877_v22 = vunpack.i.h.bf16 %v6843_v1  ;;  %v4876_v31 = vunpack.i.l.bf16 %v6843_v1  ;;  %v4957_v6 = vunpack.i.h.bf16 %v6915_v17  ;;  %v9336_v1 = vld [vmem:[#allocation22_spill] sm:$0xff] }
 0x1c6   : > { %v6946_v48 = vpop.permute.xlu1 %4964  ;;  %v1389_v50 = vsel %vm1386_vm4, %v1356_v7, %v4556_v15  ;;  %v1390_v43 = vsel %vm1386_vm4, %v1357_v59, %v4557_v13  ;;  %v4956_v20 = vunpack.i.l.bf16 %v6915_v17  ;;  %v4437_v38 = vunpack.i.h.bf16 %v9335_v49  ;;  %v6979_v7 = vpop.permute.xlu2 %4969 }
 0x1c7   : > { %v1422_v41 = vsel %vm1419_vm6, %v1389_v50, %v4636_v33  ;;  %v1423_v62 = vsel %vm1419_vm6, %v1390_v43, %v4637_v36  ;;  %v4436_v8 = vunpack.i.l.bf16 %v9335_v49  ;;  %v9337_v33 = vld [vmem:[#allocation25_spill] sm:$0xff]  ;;  %v9338_v43 = vld [vmem:[#allocation11_spill] sm:$0xff] }
 0x1c8   : > { %v1455_v15 = vsel %vm1452_vm8, %v1422_v41, %v4716_v18  ;;  %v1456_v13 = vsel %vm1452_vm8, %v1423_v62, %v4717_v42  ;;  %v4482_v36 = vunpack.i.h.bf16 %v9337_v33  ;;  %v4481_v49 = vunpack.i.l.bf16 %v9337_v33  ;;  %v9340_v41 = vld [vmem:[#allocation29_spill] sm:$0xff] }
 0x1c9   : > { %v1488_v59 = vsel %vm1485_vm7, %v1455_v15, %v4796_v25  ;;  %v1489_v17 = vsel %vm1485_vm7, %v1456_v13, %v4797_v21  ;;  %v4517_v62 = vunpack.i.h.bf16 %v9340_v41  ;;  %v4516_v50 = vunpack.i.l.bf16 %v9340_v41  ;;  %v5681_v15 = vld [vmem:[%s5932_s13 + $0xe0] sm:$0xff]  ;;  %v5682_v13 = vld [vmem:[%s5932_s13 + $0xd8] sm:$0xff] }
 0x1ca   : > { %v1521_v18 = vsel %vm1518_vm9, %v1488_v59, %v4876_v31  ;;  %v1522_v42 = vsel %vm1518_vm9, %v1489_v17, %v4877_v22  ;;  %v1340_v21 = vsel %vm1320_vm3, %v5681_v15, %v4437_v38  ;;  %v1339_v33 = vsel %vm1320_vm3, %v5682_v13, %v4436_v8 }
 0x1cb   : > { %v1554_v53 = vsel %vm1551_vm10, %v1521_v18, %v4956_v20  ;;  %v1555_v25 = vsel %vm1551_vm10, %v1522_v42, %v4957_v6  ;;  %v4596_v31 = vunpack.i.l.bf16 %v9341_v55  ;;  %v1359_v22 = vsel %vm1353_vm5, %v1326_v57, %v4482_v36  ;;  %v4960_v42 = vpop.permute.xlu0 %4959 }
 0x1cc   : > { %v4561_v59 = vunpack.i.l.bf16 %v6604_v28  ;;  %v4677_v17 = vunpack.i.h.bf16 %v6711_v27  ;;  %v4676_v20 = vunpack.i.l.bf16 %v6711_v27  ;;  %v1358_v6 = vsel %vm1353_vm5, %v1325_v19, %v4481_v49 }
 0x1cd   : > { %v4757_v18 = vunpack.i.h.bf16 %v6775_v46  ;;  %v4756_v38 = vunpack.i.l.bf16 %v6775_v46  ;;  %v1585_v8 = vpack.c.bf16 %v1555_v25, %v1554_v53  ;;  %v1372_v41 = vsel %vm1353_vm5, %v1339_v33, %v4516_v50 }
 0x1ce   : > { %v6987_v11 = vpop.permute.xlu1 %4979  ;;  %v4837_v57 = vunpack.i.h.bf16 %v6813_v3  ;;  %v4836_v36 = vunpack.i.l.bf16 %v6813_v3  ;;  %v1405_v15 = vsel %vm1386_vm4, %v1372_v41, %v4596_v31  ;;  %v4917_v19 = vunpack.i.h.bf16 %v6870_v61  ;;  %v7025_v13 = vpop.permute.xlu2 %4984 }
 0x1cf   : > { %9339 = vst [vmem:[#allocation9_spill] sm:$0xff] %v6987_v11  ;;  %v4597_v11 = vunpack.i.h.bf16 %v9341_v55  ;;  %v1373_v55 = vsel %vm1353_vm5, %v1340_v21, %v4517_v62  ;;  %v4916_v49 = vunpack.i.l.bf16 %v6870_v61  ;;  %v4562_v46 = vunpack.i.h.bf16 %v6604_v28 }
 0x1d0   : > { %v1391_v53 = vsel %vm1386_vm4, %v1358_v6, %v4561_v59  ;;  %v1438_v50 = vsel %vm1419_vm6, %v1405_v15, %v4676_v20  ;;  %v4642_v3 = vunpack.i.h.bf16 %v6626_v47  ;;  %v4641_v25 = vunpack.i.l.bf16 %v6626_v47 }
 0x1d1   : > { %v1406_v27 = vsel %vm1386_vm4, %v1373_v55, %v4597_v11  ;;  %v1471_v11 = vsel %vm1452_vm8, %v1438_v50, %v4756_v38  ;;  %v4722_v20 = vunpack.i.h.bf16 %v6750_v45  ;;  %v4802_v38 = vunpack.i.h.bf16 %v6809_v29  ;;  %v9342_v50 = vld [vmem:[#allocation16_spill] sm:$0xff] }
 0x1d2   : > { %v1439_v62 = vsel %vm1419_vm6, %v1406_v27, %v4677_v17  ;;  %v1504_v33 = vsel %vm1485_vm7, %v1471_v11, %v4836_v36  ;;  %v4721_v17 = vunpack.i.l.bf16 %v6750_v45  ;;  %v1392_v55 = vsel %vm1386_vm4, %v1359_v22, %v4562_v46 }
 0x1d3   : > { %v1472_v21 = vsel %vm1452_vm8, %v1439_v62, %v4757_v18  ;;  %v1537_v6 = vsel %vm1518_vm9, %v1504_v33, %v4916_v49  ;;  %v4801_v18 = vunpack.i.l.bf16 %v6809_v29  ;;  %v4881_v36 = vunpack.i.l.bf16 %v6836_v2  ;;  %v7046_v46 = vpop.permute.xlu0 %4974 }
 0x1d4   : > { %4194 = vmatmul.msk.bf16.gmra.mxu0 %vm1624_vm11, %v1585_v8  ;;  %v1505_v28 = vsel %vm1485_vm7, %v1472_v21, %v4837_v57  ;;  %v4882_v57 = vunpack.i.h.bf16 %v6836_v2  ;;  %v1424_v15 = vsel %vm1419_vm6, %v1391_v53, %v4641_v25  ;;  %v1425_v27 = vsel %vm1419_vm6, %v1392_v55, %v4642_v3  ;;  %v5683_v25 = vld [vmem:[%s5932_s13 + $0xf8] sm:$0xff] }
 0x1d5   : > { %v1538_v47 = vsel %vm1518_vm9, %v1505_v28, %v4917_v19  ;;  %v4962_v19 = vunpack.i.h.bf16 %v4960_v42  ;;  %v4961_v49 = vunpack.i.l.bf16 %v4960_v42  ;;  %v4441_v29 = vunpack.i.l.bf16 %v9338_v43 }
 0x1d6   : > { %v4995_v61 = vpop.permute.xlu1 %4994  ;;  %v4522_v62 = vunpack.i.h.bf16 %v9342_v50  ;;  %v1457_v11 = vsel %vm1452_vm8, %v1424_v15, %v4721_v17  ;;  %v1458_v22 = vsel %vm1452_vm8, %v1425_v27, %v4722_v20  ;;  %v4521_v2 = vunpack.i.l.bf16 %v9342_v50 }
 0x1d7   : > { %v4997_v31 = vunpack.i.h.bf16 %v4995_v61  ;;  %v4996_v59 = vunpack.i.l.bf16 %v4995_v61  ;;  %v4602_v53 = vunpack.i.h.bf16 %v6644_v35  ;;  %v1490_v3 = vsel %vm1485_vm7, %v1457_v11, %v4801_v18 }
 0x1d8   : > { %v1491_v42 = vsel %vm1485_vm7, %v1458_v22, %v4802_v38  ;;  %v9343_v21 = vunpack.i.h.bf16 %v9338_v43  ;;  %v4601_v33 = vunpack.i.l.bf16 %v6644_v35  ;;  %v1523_v28 = vsel %vm1518_vm9, %v1490_v3, %v4881_v36 }
 0x1d9   : > { %v1570_v8 = vsel %vm1551_vm10, %v1537_v6, %v4996_v59  ;;  %v1571_v41 = vsel %vm1551_vm10, %v1538_v47, %v4997_v31  ;;  %v1524_v31 = vsel %vm1518_vm9, %v1491_v42, %v4882_v57  ;;  %v4682_v59 = vunpack.i.h.bf16 %v6709_v60  ;;  %v5684_v47 = vld [vmem:[%s5932_s13 + $0xf0] sm:$0xff] }
 0x1da   : > { %v1593_v45 = vpack.c.bf16 %v1571_v41, %v1570_v8  ;;  %v1342_v61 = vsel %vm1320_vm3, %v5683_v25, %v9343_v21  ;;  %v4681_v20 = vunpack.i.l.bf16 %v6709_v60  ;;  %v1556_v17 = vsel %vm1551_vm10, %v1523_v28, %v4961_v49  ;;  %v5000_v8 = vpop.permute.xlu2 %4999  ;;  %v5685_v25 = vld [vmem:[%s5932_s13 + $0x48] sm:$0xff] }
 0x1db   : > { %v1557_v6 = vsel %vm1551_vm10, %v1524_v31, %v4962_v19  ;;  %v1341_v38 = vsel %vm1320_vm3, %v5684_v47, %v4441_v29  ;;  %v1375_v43 = vsel %vm1353_vm5, %v1342_v61, %v4522_v62  ;;  %v4762_v18 = vunpack.i.h.bf16 %v6733_v16  ;;  %v9344_v62 = vld [vmem:[#allocation19_spill] sm:$0xff]  ;;  %v7092_v28 = vpop.permute.xlu0 %4989 }
 0x1dc   : > { %4202 = vmatmul.msk.bf16.vlgmr.msra.gmra.mxu3 %vm1624_vm11, %v1593_v45  ;;  %v4761_v35 = vunpack.i.l.bf16 %v6733_v16  ;;  %v1374_v41 = vsel %vm1353_vm5, %v1341_v38, %v4521_v2  ;;  %v1408_v55 = vsel %vm1386_vm4, %v1375_v43, %v4602_v53  ;;  %v4842_v60 = vunpack.i.h.bf16 %v6832_v44  ;;  %v9345_v2 = vld [vmem:[#allocation28_spill] sm:$0xff]  ;;  %v5686_v38 = vld [vmem:[%s5932_s13 + $0x50] sm:$0xff] }
 0x1dd   : > { %v4841_v57 = vunpack.i.l.bf16 %v6832_v44  ;;  %v1407_v36 = vsel %vm1386_vm4, %v1374_v41, %v4601_v33  ;;  %v4922_v45 = vunpack.i.h.bf16 %v6867_v32  ;;  %v4921_v15 = vunpack.i.l.bf16 %v6867_v32 }
 0x1de   : > { %v1586_v27 = vpack.c.bf16 %v1557_v6, %v1556_v17  ;;  %v1440_v19 = vsel %vm1419_vm6, %v1407_v36, %v4681_v20  ;;  %v1441_v16 = vsel %vm1419_vm6, %v1408_v55, %v4682_v59  ;;  %v5002_v49 = vunpack.i.h.bf16 %v5000_v8 }
 0x1df   : > { %v5001_v29 = vunpack.i.l.bf16 %v5000_v8  ;;  %v4407_v50 = vunpack.i.h.bf16 %v9336_v1  ;;  %v4486_v11 = vunpack.i.l.bf16 %v9344_v62  ;;  %v1473_v44 = vsel %vm1452_vm8, %v1440_v19, %v4761_v35 }
 0x1e0   : > { %v1474_v22 = vsel %vm1452_vm8, %v1441_v16, %v4762_v18  ;;  %v4487_v32 = vunpack.i.h.bf16 %v9344_v62  ;;  %v4566_v53 = vunpack.i.l.bf16 %v9345_v2  ;;  %v1506_v3 = vsel %vm1485_vm7, %v1473_v44, %v4841_v57  ;;  %v5687_v16 = vld [vmem:[%s5932_s13 + $0x108] sm:$0xff] }
 0x1e1   : > { %v1507_v42 = vsel %vm1485_vm7, %v1474_v22, %v4842_v60  ;;  %v9346_v21 = vunpack.i.l.bf16 %v9336_v1  ;;  %v4567_v33 = vunpack.i.h.bf16 %v9345_v2  ;;  %v1539_v31 = vsel %vm1518_vm9, %v1506_v3, %v4921_v15 }
 0x1e2   : > { %v1540_v59 = vsel %vm1518_vm9, %v1507_v42, %v4922_v45  ;;  %v4647_v20 = vunpack.i.h.bf16 %v6687_v56  ;;  %v4646_v17 = vunpack.i.l.bf16 %v6687_v56  ;;  %v1572_v6 = vsel %vm1551_vm10, %v1539_v31, %v5001_v29  ;;  %v9348_v29 = vld [vmem:[#allocation33_spill] sm:$0xff] }
 0x1e3   : > { %v1327_v61 = vsel %vm1320_vm3, %v5685_v25, %v9346_v21  ;;  %v1573_v47 = vsel %vm1551_vm10, %v1540_v59, %v5002_v49  ;;  %v1328_v1 = vsel %vm1320_vm3, %v5686_v38, %v4407_v50  ;;  %v4727_v18 = vunpack.i.h.bf16 %v6746_v58 }
 0x1e4   : > { %4195 = vmatmul.msk.bf16.gmra.mxu0 %vm1624_vm11, %v1586_v27  ;;  %v1360_v43 = vsel %vm1353_vm5, %v1327_v61, %v4486_v11  ;;  %v4726_v35 = vunpack.i.l.bf16 %v6746_v58  ;;  %v1361_v8 = vsel %vm1353_vm5, %v1328_v1, %v4487_v32  ;;  %v4807_v56 = vunpack.i.h.bf16 %v6783_v34  ;;  %v9349_v32 = vld [vmem:[#allocation21_spill] sm:$0xff] }
 0x1e5   : > { %v1393_v41 = vsel %vm1386_vm4, %v1360_v43, %v4566_v53  ;;  %v4806_v55 = vunpack.i.l.bf16 %v6783_v34  ;;  %v1394_v60 = vsel %vm1386_vm4, %v1361_v8, %v4567_v33  ;;  %v4887_v57 = vunpack.i.h.bf16 %v6854_v54 }
 0x1e6   : > { %v4886_v36 = vunpack.i.l.bf16 %v6854_v54  ;;  %v1594_v45 = vpack.c.bf16 %v1573_v47, %v1572_v6  ;;  %v1427_v15 = vsel %vm1419_vm6, %v1394_v60, %v4647_v20  ;;  %v1426_v27 = vsel %vm1419_vm6, %v1393_v41, %v4646_v17  ;;  %v5005_v20 = vpop.permute.xlu0 %5004  ;;  %v9350_v41 = vld [vmem:[#allocation15_spill] sm:$0xff] }
 0x1e7   : > { %v4967_v58 = vunpack.i.h.bf16 %v6946_v48  ;;  %v4966_v19 = vunpack.i.l.bf16 %v6946_v48  ;;  %v9347_v49 = vunpack.i.l.bf16 %v6445_v63  ;;  %v4526_v50 = vunpack.i.l.bf16 %v9348_v29 }
 0x1e8   : > { %v1459_v62 = vsel %vm1452_vm8, %v1426_v27, %v4726_v35  ;;  %v1460_v54 = vsel %vm1452_vm8, %v1427_v15, %v4727_v18  ;;  %v4527_v11 = vunpack.i.h.bf16 %v9348_v29  ;;  %v4606_v44 = vunpack.i.l.bf16 %v6642_v30  ;;  %v5689_v27 = vld [vmem:[%s5932_s13 + $0x150] sm:$0xff] }
 0x1e9   : > { %v1343_v34 = vsel %vm1320_vm3, %v5687_v16, %v9347_v49  ;;  %v1492_v22 = vsel %vm1485_vm7, %v1459_v62, %v4806_v55  ;;  %v1493_v48 = vsel %vm1485_vm7, %v1460_v54, %v4807_v56  ;;  %v4462_v63 = vunpack.i.h.bf16 %v9349_v32 }
 0x1ea   : > { %v4607_v2 = vunpack.i.h.bf16 %v6642_v30  ;;  %v1525_v53 = vsel %vm1518_vm9, %v1492_v22, %v4886_v36  ;;  %v1526_v3 = vsel %vm1518_vm9, %v1493_v48, %v4887_v57  ;;  %v4687_v42 = vunpack.i.h.bf16 %v6668_v24  ;;  %v5688_v57 = vld [vmem:[%s5932_s13 + $0x158] sm:$0xff] }
 0x1eb   : > { %v4686_v25 = vunpack.i.l.bf16 %v6668_v24  ;;  %v1558_v21 = vsel %vm1551_vm10, %v1525_v53, %v4966_v19  ;;  %v1559_v61 = vsel %vm1551_vm10, %v1526_v3, %v4967_v58  ;;  %v4461_v33 = vunpack.i.l.bf16 %v9349_v32  ;;  %v9351_v22 = vld [vmem:[#allocation14_spill] sm:$0xff] }
 0x1ec   : > { %4203 = vmatmul.msk.bf16.gmra.mxu3 %vm1624_vm11, %v1594_v45  ;;  %v1376_v31 = vsel %vm1353_vm5, %v1343_v34, %v4526_v50  ;;  %v4767_v59 = vunpack.i.h.bf16 %v6789_v14  ;;  %v4766_v30 = vunpack.i.l.bf16 %v6789_v14  ;;  %v1377_v17 = vsel %vm1353_vm5, %v6950_v23, %v4527_v11 }
 0x1ed   : > { %v1409_v6 = vsel %vm1386_vm4, %v1376_v31, %v4606_v44  ;;  %v4847_v24 = vunpack.i.h.bf16 %v6830_v39  ;;  %v4846_v47 = vunpack.i.l.bf16 %v6830_v39  ;;  %v1410_v38 = vsel %vm1386_vm4, %v1377_v17, %v4607_v2 }
 0x1ee   : > { %v4927_v1 = vunpack.i.h.bf16 %v6865_v9  ;;  %v4926_v43 = vunpack.i.l.bf16 %v6865_v9  ;;  %v1587_v18 = vpack.c.bf16 %v1559_v61, %v1558_v21  ;;  %v1442_v14 = vsel %vm1419_vm6, %v1409_v6, %v4686_v25  ;;  %v9352_v61 = vld [vmem:[#allocation32_spill] sm:$0xff] }
 0x1ef   : > { %v1443_v35 = vsel %vm1419_vm6, %v1410_v38, %v4687_v42  ;;  %v5007_v23 = vunpack.i.h.bf16 %v5005_v20  ;;  %v5006_v8 = vunpack.i.l.bf16 %v5005_v20  ;;  %v4492_v56 = vunpack.i.h.bf16 %v9350_v41 }
 0x1f0   : > { %v4491_v55 = vunpack.i.l.bf16 %v9350_v41  ;;  %v1475_v39 = vsel %vm1452_vm8, %v1442_v14, %v4766_v30  ;;  %v1476_v60 = vsel %vm1452_vm8, %v1443_v35, %v4767_v59  ;;  %v7157_v9 = vsel %vm1320_vm3, %v5688_v57, %v4462_v63  ;;  %v5691_v14 = vld [vmem:[%s5932_s13 + $0x128] sm:$0xff]  ;;  %v5010_v41 = vpop.permute.xlu1 %5009 }
 0x1f1   : > { %v4572_v36 = vunpack.i.h.bf16 %v6620_v37  ;;  %v1508_v45 = vsel %vm1485_vm7, %v1475_v39, %v4846_v47  ;;  %v1509_v15 = vsel %vm1485_vm7, %v1476_v60, %v4847_v24  ;;  %v7164_v58 = vsel %vm1320_vm3, %v5689_v27, %v4461_v33  ;;  %v9353_v39 = vld [vmem:[#allocation59_spill] sm:$0xff] }
 0x1f2   : > { %v4571_v19 = vunpack.i.l.bf16 %v6620_v37  ;;  %v1541_v16 = vsel %vm1518_vm9, %v1508_v45, %v4926_v43  ;;  %v1542_v49 = vsel %vm1518_vm9, %v1509_v15, %v4927_v1  ;;  %v4652_v34 = vunpack.i.h.bf16 %v6685_v51 }
 0x1f3   : > { %v4651_v29 = vunpack.i.l.bf16 %v6685_v51  ;;  %v1574_v50 = vsel %vm1551_vm10, %v1541_v16, %v5006_v8  ;;  %v1575_v62 = vsel %vm1551_vm10, %v1542_v49, %v5007_v23  ;;  %v1363_v54 = vsel %vm1353_vm5, %v6919_v52, %v4492_v56 }
 0x1f4   : > { %4196 = vmatmul.msk.bf16.gmra.mxu0 %vm1624_vm11, %v1587_v18  ;;  %v1362_v11 = vsel %vm1353_vm5, %v6924_v12, %v4491_v55  ;;  %v4732_v37 = vunpack.i.h.bf16 %v6705_v26  ;;  %v4731_v44 = vunpack.i.l.bf16 %v6705_v26  ;;  %v4451_v48 = vunpack.i.l.bf16 %v9351_v22 }
 0x1f5   : > { %v1396_v32 = vsel %vm1386_vm4, %v1363_v54, %v4572_v36  ;;  %v4812_v51 = vunpack.i.h.bf16 %v6820_v40  ;;  %v4811_v63 = vunpack.i.l.bf16 %v6820_v40  ;;  %v1395_v2 = vsel %vm1386_vm4, %v1362_v11, %v4571_v19  ;;  %v9354_v36 = vld [vmem:[#allocation71_spill] sm:$0xff] }
 0x1f6   : > { %v4892_v53 = vunpack.i.h.bf16 %v6852_v0  ;;  %v4891_v52 = vunpack.i.l.bf16 %v6852_v0  ;;  %v1595_v12 = vpack.c.bf16 %v1575_v62, %v1574_v50  ;;  %v1428_v3 = vsel %vm1419_vm6, %v1395_v2, %v4651_v29  ;;  %v9356_v50 = vld [vmem:[#allocation27_spill] sm:$0xff] }
 0x1f7   : > { %v1429_v26 = vsel %vm1419_vm6, %v1396_v32, %v4652_v34  ;;  %v4972_v42 = vunpack.i.h.bf16 %v6979_v7  ;;  %v4971_v25 = vunpack.i.l.bf16 %v6979_v7  ;;  %v4452_v21 = vunpack.i.h.bf16 %v9351_v22  ;;  %v5690_v7 = vld [vmem:[%s5932_s13 + $0x120] sm:$0xff]  ;;  %v9355_v34 = vld [vmem:[#allocation12_spill] sm:$0xff] }
 0x1f8   : > { %v4531_v40 = vunpack.i.l.bf16 %v9352_v61  ;;  %v1461_v33 = vsel %vm1452_vm8, %v1428_v3, %v4731_v44  ;;  %v1462_v31 = vsel %vm1452_vm8, %v1429_v26, %v4732_v37  ;;  %v4532_v0 = vunpack.i.h.bf16 %v9352_v61  ;;  %v9357_v44 = vld [vmem:[#allocation38_spill] sm:$0xff] }
 0x1f9   : > { %v4611_v59 = vunpack.i.l.bf16 %v6598_v10  ;;  %v1494_v30 = vsel %vm1485_vm7, %v1461_v33, %v4811_v63  ;;  %v1495_v20 = vsel %vm1485_vm7, %v1462_v31, %v4812_v51  ;;  %v1345_v17 = vsel %vm1320_vm3, %v5690_v7, %v4451_v48  ;;  %v9358_v51 = vld [vmem:[#allocation23_spill] sm:$0xff]  ;;  %v9362_v31 = vld [vmem:[#allocation53_spill] sm:$0xff] }
 0x1fa   : > { %v4612_v6 = vunpack.i.h.bf16 %v6598_v10  ;;  %v1527_v24 = vsel %vm1518_vm9, %v1494_v30, %v4891_v52  ;;  %v1528_v47 = vsel %vm1518_vm9, %v1495_v20, %v4892_v53  ;;  %v4692_v38 = vunpack.i.h.bf16 %v6723_v5  ;;  %v9363_v30 = vld [vmem:[#allocation72_spill] sm:$0xff] }
 0x1fb   : > { %v4691_v1 = vunpack.i.l.bf16 %v6723_v5  ;;  %v1560_v43 = vsel %vm1551_vm10, %v1527_v24, %v4971_v25  ;;  %v1561_v18 = vsel %vm1551_vm10, %v1528_v47, %v4972_v42  ;;  %v1346_v35 = vsel %vm1320_vm3, %v5691_v14, %v4452_v21  ;;  %v9360_v21 = vld [vmem:[#allocation13_spill] sm:$0xff] }
 0x1fc   : > { %4204 = vmatmul.msk.bf16.gmra.mxu3 %vm1624_vm11, %v1595_v12  ;;  %v1378_v23 = vsel %vm1353_vm5, %v1345_v17, %v4531_v40  ;;  %v4772_v8 = vunpack.i.h.bf16 %v6787_v4  ;;  %v4771_v10 = vunpack.i.l.bf16 %v6787_v4  ;;  %v1379_v56 = vsel %vm1353_vm5, %v1346_v35, %v4532_v0  ;;  %v9359_v12 = vld [vmem:[#allocation41_spill] sm:$0xff]  ;;  %v9364_v17 = vld [vmem:[#allocation58_spill] sm:$0xff] }
 0x1fd   : > { %v1411_v55 = vsel %vm1386_vm4, %v1378_v23, %v4611_v59  ;;  %v4852_v5 = vunpack.i.h.bf16 %v9353_v39  ;;  %v4851_v60 = vunpack.i.l.bf16 %v9353_v39  ;;  %v1412_v57 = vsel %vm1386_vm4, %v1379_v56, %v4612_v6  ;;  %v9361_v40 = vld [vmem:[#allocation73_spill] sm:$0xff] }
 0x1fe   : > { %v4932_v45 = vunpack.i.h.bf16 %v9354_v36  ;;  %v4931_v15 = vunpack.i.l.bf16 %v9354_v36  ;;  %v1588_v27 = vpack.c.bf16 %v1561_v18, %v1560_v43  ;;  %v1444_v19 = vsel %vm1419_vm6, %v1411_v55, %v4691_v1 }
 0x1ff   : > { %v1445_v4 = vsel %vm1419_vm6, %v1412_v57, %v4692_v38  ;;  %v5012_v16 = vunpack.i.h.bf16 %v5010_v41  ;;  %v5011_v49 = vunpack.i.l.bf16 %v5010_v41  ;;  %v4427_v29 = vunpack.i.h.bf16 %v9355_v34  ;;  %v9365_v38 = vld [vmem:[#allocation65_spill] sm:$0xff]  ;;  %v9366_v41 = vld [vmem:[#allocation24_spill] sm:$0xff] }
 0x200   : > { %v4496_v62 = vunpack.i.l.bf16 %v9356_v50  ;;  %v1477_v54 = vsel %vm1452_vm8, %v1444_v19, %v4771_v10  ;;  %v1478_v11 = vsel %vm1452_vm8, %v1445_v4, %v4772_v8  ;;  %v4497_v37 = vunpack.i.h.bf16 %v9356_v50 }
 0x201   : > { %v4576_v22 = vunpack.i.l.bf16 %v9357_v44  ;;  %v1510_v48 = vsel %vm1485_vm7, %v1477_v54, %v4851_v60  ;;  %v1511_v32 = vsel %vm1485_vm7, %v1478_v11, %v4852_v5  ;;  %v4421_v63 = vunpack.i.l.bf16 %v9358_v51  ;;  %v9367_v60 = vld [vmem:[#allocation44_spill] sm:$0xff]  ;;  %v5693_v11 = vld [vmem:[%s5932_s13 + $0x138] sm:$0xff] }
 0x202   : > { %v4577_v2 = vunpack.i.h.bf16 %v9357_v44  ;;  %v1543_v53 = vsel %vm1518_vm9, %v1510_v48, %v4931_v15  ;;  %v1544_v52 = vsel %vm1518_vm9, %v1511_v32, %v4932_v45  ;;  %v4657_v3 = vunpack.i.h.bf16 %v9359_v12 }
 0x203   : > { %v4656_v26 = vunpack.i.l.bf16 %v9359_v12  ;;  %v1576_v42 = vsel %vm1551_vm10, %v1543_v53, %v5011_v49  ;;  %v1577_v25 = vsel %vm1551_vm10, %v1544_v52, %v5012_v16  ;;  %v4457_v61 = vunpack.i.h.bf16 %v9360_v21  ;;  %v9368_v16 = vld [vmem:[#allocation49_spill] sm:$0xff]  ;;  %v9370_v12 = vld [vmem:[#allocation64_spill] sm:$0xff] }
 0x204   : > { %4197 = vmatmul.msk.bf16.gmra.mxu0 %vm1624_vm11, %v1588_v27  ;;  %v1364_v33 = vsel %vm1353_vm5, %v9361_v40, %v4496_v62  ;;  %v4737_v0 = vunpack.i.h.bf16 %v9362_v31  ;;  %v4736_v59 = vunpack.i.l.bf16 %v9362_v31  ;;  %v1365_v20 = vsel %vm1353_vm5, %v9363_v30, %v4497_v37 }
 0x205   : > { %v1397_v7 = vsel %vm1386_vm4, %v1364_v33, %v4576_v22  ;;  %v4817_v6 = vunpack.i.h.bf16 %v9364_v17  ;;  %v4816_v24 = vunpack.i.l.bf16 %v9364_v17  ;;  %v1398_v47 = vsel %vm1386_vm4, %v1365_v20, %v4577_v2  ;;  %v9369_v22 = vld [vmem:[#allocation51_spill] sm:$0xff]  ;;  %v5015_v2 = vpop.permute.xlu2 %5014  ;;  %v9372_v20 = vld [vmem:[#allocation26_spill] sm:$0xff] }
 0x206   : > { %v4897_v1 = vunpack.i.h.bf16 %v9365_v38  ;;  %v4896_v43 = vunpack.i.l.bf16 %v9365_v38  ;;  %v1596_v18 = vpack.c.bf16 %v1577_v25, %v1576_v42  ;;  %v1430_v14 = vsel %vm1419_vm6, %v1397_v7, %v4656_v26  ;;  %v9371_v25 = vld [vmem:[#allocation69_spill] sm:$0xff] }
 0x207   : > { %v1431_v35 = vsel %vm1419_vm6, %v1398_v47, %v4657_v3  ;;  %v4977_v23 = vunpack.i.h.bf16 %v7046_v46  ;;  %v4976_v8 = vunpack.i.l.bf16 %v7046_v46  ;;  %v4456_v10 = vunpack.i.l.bf16 %v9360_v21  ;;  %v5692_v46 = vld [vmem:[%s5932_s13 + $0x140] sm:$0xff] }
 0x208   : > { %v4537_v56 = vunpack.i.h.bf16 %v9366_v41  ;;  %v1463_v55 = vsel %vm1452_vm8, %v1430_v14, %v4736_v59  ;;  %v1464_v39 = vsel %vm1452_vm8, %v1431_v35, %v4737_v0  ;;  %v4536_v5 = vunpack.i.l.bf16 %v9366_v41  ;;  %v9373_v47 = vld [vmem:[#allocation31_spill] sm:$0xff] }
 0x209   : > { %v4617_v57 = vunpack.i.h.bf16 %v9367_v60  ;;  %v1496_v36 = vsel %vm1485_vm7, %v1463_v55, %v4816_v24  ;;  %v1497_v45 = vsel %vm1485_vm7, %v1464_v39, %v4817_v6  ;;  %v1348_v15 = vsel %vm1320_vm3, %v5692_v46, %v4457_v61 }
 0x20a   : > { %v4616_v27 = vunpack.i.l.bf16 %v9367_v60  ;;  %v1529_v19 = vsel %vm1518_vm9, %v1496_v36, %v4896_v43  ;;  %v1530_v4 = vsel %vm1518_vm9, %v1497_v45, %v4897_v1  ;;  %v4697_v49 = vunpack.i.h.bf16 %v9368_v16 }
 0x20b   : > { %v4696_v50 = vunpack.i.l.bf16 %v9368_v16  ;;  %v1562_v62 = vsel %vm1551_vm10, %v1529_v19, %v4976_v8  ;;  %v1563_v54 = vsel %vm1551_vm10, %v1530_v4, %v4977_v23  ;;  %v1347_v37 = vsel %vm1320_vm3, %v5693_v11, %v4456_v10  ;;  %v9374_v10 = vld [vmem:[#allocation47_spill] sm:$0xff]  ;;  %v9377_v16 = vld [vmem:[#allocation68_spill] sm:$0xff] }
 0x20c   : > { %4205 = vmatmul.msk.bf16.gmra.mxu3 %vm1624_vm11, %v1596_v18  ;;  %v1381_v44 = vsel %vm1353_vm5, %v1348_v15, %v4537_v56  ;;  %v4777_v48 = vunpack.i.h.bf16 %v9369_v22  ;;  %v4776_v32 = vunpack.i.l.bf16 %v9369_v22  ;;  %v1380_v53 = vsel %vm1353_vm5, %v1347_v37, %v4536_v5  ;;  %v5694_v18 = vld [vmem:[%s5932_s13 + $0x90] sm:$0xff]  ;;  %v5695_v5 = vld [vmem:[%s5932_s13 + $0x98] sm:$0xff]  ;;  %v9376_v15 = vld [vmem:[#allocation56_spill] sm:$0xff] }
 0x20d   : > { %v1414_v52 = vsel %vm1386_vm4, %v1381_v44, %v4617_v57  ;;  %v4857_v3 = vunpack.i.h.bf16 %v9370_v12  ;;  %v4856_v26 = vunpack.i.l.bf16 %v9370_v12  ;;  %v1413_v42 = vsel %vm1386_vm4, %v1380_v53, %v4616_v27  ;;  %v9378_v37 = vld [vmem:[#allocation9_spill] sm:$0xff] }
 0x20e   : > { %v4937_v21 = vunpack.i.h.bf16 %v9371_v25  ;;  %v4936_v61 = vunpack.i.l.bf16 %v9371_v25  ;;  %v1589_v40 = vpack.c.bf16 %v1563_v54, %v1562_v62  ;;  %v1446_v33 = vsel %vm1419_vm6, %v1413_v42, %v4696_v50 }
 0x20f   : > { %v1447_v31 = vsel %vm1419_vm6, %v1414_v52, %v4697_v49  ;;  %v5017_v0 = vunpack.i.h.bf16 %v5015_v2  ;;  %v5016_v59 = vunpack.i.l.bf16 %v5015_v2  ;;  %v4422_v30 = vunpack.i.h.bf16 %v9358_v51 }
 0x210   : > { %v4501_v7 = vunpack.i.l.bf16 %v9372_v20  ;;  %v1479_v17 = vsel %vm1452_vm8, %v1446_v33, %v4776_v32  ;;  %v1480_v6 = vsel %vm1452_vm8, %v1447_v31, %v4777_v48  ;;  %v4502_v24 = vunpack.i.h.bf16 %v9372_v20  ;;  %v9379_v32 = vld [vmem:[#allocation36_spill] sm:$0xff] }
 0x211   : > { %v4581_v38 = vunpack.i.l.bf16 %v9373_v47  ;;  %v1512_v1 = vsel %vm1485_vm7, %v1479_v17, %v4856_v26  ;;  %v1513_v43 = vsel %vm1485_vm7, %v1480_v6, %v4857_v3  ;;  %v1333_v14 = vsel %vm1320_vm3, %v5694_v18, %v4421_v63  ;;  %v9375_v63 = vld [vmem:[#allocation52_spill] sm:$0xff]  ;;  %v9380_v3 = vld [vmem:[#allocation43_spill] sm:$0xff] }
 0x212   : > { %v4582_v35 = vunpack.i.h.bf16 %v9373_v47  ;;  %v1545_v23 = vsel %vm1518_vm9, %v1512_v1, %v4936_v61  ;;  %v1546_v8 = vsel %vm1518_vm9, %v1513_v43, %v4937_v21  ;;  %v4662_v41 = vunpack.i.h.bf16 %v9374_v10  ;;  %v5696_v21 = vld [vmem:[%s5932_s13 + $0xb0] sm:$0xff]  ;;  %v5697_v17 = vld [vmem:[%s5932_s13 + $0xa8] sm:$0xff]  ;;  %v9383_v18 = vld [vmem:[#allocation63_spill] sm:$0xff] }
 0x213   : > { %v4661_v56 = vunpack.i.l.bf16 %v9374_v10  ;;  %v1578_v55 = vsel %vm1551_vm10, %v1545_v23, %v5016_v59  ;;  %v1579_v39 = vsel %vm1551_vm10, %v1546_v8, %v5017_v0  ;;  %v1334_v60 = vsel %vm1320_vm3, %v5695_v5, %v4422_v30  ;;  %v9381_v0 = vld [vmem:[#allocation45_spill] sm:$0xff]  ;;  %v9384_v8 = vld [vmem:[#allocation70_spill] sm:$0xff] }
 0x214   : > { %4198 = vmatmul.msk.bf16.gmra.mxu0 %vm1624_vm11, %v1589_v40  ;;  %v1366_v51 = vsel %vm1353_vm5, %v1333_v14, %v4501_v7  ;;  %v4742_v57 = vunpack.i.h.bf16 %v9375_v63  ;;  %v4741_v36 = vunpack.i.l.bf16 %v9375_v63  ;;  %v1367_v45 = vsel %vm1353_vm5, %v1334_v60, %v4502_v24 }
 0x215   : > { %v1399_v46 = vsel %vm1386_vm4, %v1366_v51, %v4581_v38  ;;  %v4822_v27 = vunpack.i.h.bf16 %v9376_v15  ;;  %v4821_v19 = vunpack.i.l.bf16 %v9376_v15  ;;  %v1400_v4 = vsel %vm1386_vm4, %v1367_v45, %v4582_v35  ;;  %v5020_v38 = vpop.permute.xlu0 %5019 }
 0x216   : > { %v4902_v49 = vunpack.i.h.bf16 %v9377_v16  ;;  %v4901_v50 = vunpack.i.l.bf16 %v9377_v16  ;;  %v1597_v62 = vpack.c.bf16 %v1579_v39, %v1578_v55  ;;  %v1432_v54 = vsel %vm1419_vm6, %v1399_v46, %v4661_v56 }
 0x217   : > { %v1433_v11 = vsel %vm1419_vm6, %v1400_v4, %v4662_v41  ;;  %v4982_v44 = vunpack.i.h.bf16 %v9378_v37  ;;  %v4981_v22 = vunpack.i.l.bf16 %v9378_v37  ;;  %v4426_v48 = vunpack.i.l.bf16 %v9355_v34 }
 0x218   : > { %v4541_v2 = vunpack.i.l.bf16 %v9379_v32  ;;  %v1465_v53 = vsel %vm1452_vm8, %v1432_v54, %v4741_v36  ;;  %v1466_v52 = vsel %vm1452_vm8, %v1433_v11, %v4742_v57  ;;  %v4542_v12 = vunpack.i.h.bf16 %v9379_v32  ;;  %v9386_v36 = vld [vmem:[#allocation40_spill] sm:$0xff] }
 0x219   : > { %v4621_v26 = vunpack.i.l.bf16 %v9380_v3  ;;  %v1498_v42 = vsel %vm1485_vm7, %v1465_v53, %v4821_v19  ;;  %v1499_v25 = vsel %vm1485_vm7, %v1466_v52, %v4822_v27  ;;  %v1336_v61 = vsel %vm1320_vm3, %v5696_v21, %v4427_v29  ;;  %v9382_v29 = vld [vmem:[#allocation57_spill] sm:$0xff]  ;;  %v9387_v19 = vld [vmem:[#allocation46_spill] sm:$0xff] }
 0x21a   : > { %v4622_v40 = vunpack.i.h.bf16 %v9380_v3  ;;  %v1531_v33 = vsel %vm1518_vm9, %v1498_v42, %v4901_v50  ;;  %v1532_v31 = vsel %vm1518_vm9, %v1499_v25, %v4902_v49  ;;  %v4702_v59 = vunpack.i.h.bf16 %v9381_v0  ;;  %v9391_v25 = vld [vmem:[#allocation67_spill] sm:$0xff] }
 0x21b   : > { %v4701_v30 = vunpack.i.l.bf16 %v9381_v0  ;;  %v1564_v20 = vsel %vm1551_vm10, %v1531_v33, %v4981_v22  ;;  %v1565_v7 = vsel %vm1551_vm10, %v1532_v31, %v4982_v44  ;;  %v1335_v6 = vsel %vm1320_vm3, %v5697_v17, %v4426_v48  ;;  %v9388_v44 = vld [vmem:[#allocation48_spill] sm:$0xff] }
 0x21c   : > { %4206 = vmatmul.msk.bf16.gmra.mxu3 %vm1624_vm11, %v1597_v62  ;;  %v1382_v34 = vsel %vm1353_vm5, %v7164_v58, %v4541_v2  ;;  %v4782_v24 = vunpack.i.h.bf16 %v9382_v29  ;;  %v4781_v47 = vunpack.i.l.bf16 %v9382_v29  ;;  %v1383_v1 = vsel %vm1353_vm5, %v7157_v9, %v4542_v12  ;;  %v9385_v9 = vld [vmem:[#allocation18_spill] sm:$0xff]  ;;  %v9389_v2 = vld [vmem:[#allocation17_spill] sm:$0xff] }
 0x21d   : > { %v1415_v43 = vsel %vm1386_vm4, %v1382_v34, %v4621_v26  ;;  %v4862_v14 = vunpack.i.h.bf16 %v9383_v18  ;;  %v4861_v35 = vunpack.i.l.bf16 %v9383_v18  ;;  %v1416_v23 = vsel %vm1386_vm4, %v1383_v1, %v4622_v40  ;;  %v9390_v12 = vld [vmem:[#allocation61_spill] sm:$0xff] }
 0x21e   : > { %v4942_v10 = vunpack.i.h.bf16 %v9384_v8  ;;  %v4941_v58 = vunpack.i.l.bf16 %v9384_v8  ;;  %v1590_v41 = vpack.c.bf16 %v1565_v7, %v1564_v20  ;;  %v1448_v56 = vsel %vm1419_vm6, %v1415_v43, %v4701_v30  ;;  %v9392_v20 = vld [vmem:[#allocation35_spill] sm:$0xff]  ;;  %v9393_v29 = vld [vmem:[#allocation37_spill] sm:$0xff] }
 0x21f   : > { %v1449_v55 = vsel %vm1419_vm6, %v1416_v23, %v4702_v59  ;;  %v5022_v39 = vunpack.i.h.bf16 %v5020_v38  ;;  %v5021_v5 = vunpack.i.l.bf16 %v5020_v38  ;;  %v4507_v60 = vunpack.i.h.bf16 %v9385_v9  ;;  %v5698_v38 = vld [vmem:[%s5932_s13 + $0x168] sm:$0xff] }
 0x220   : > { %v4506_v51 = vunpack.i.l.bf16 %v9385_v9  ;;  %v1481_v63 = vsel %vm1452_vm8, %v1448_v56, %v4781_v47  ;;  %v1482_v57 = vsel %vm1452_vm8, %v1449_v55, %v4782_v24  ;;  %v4587_v45 = vunpack.i.h.bf16 %v9386_v36 }
 0x221   : > { %v4586_v46 = vunpack.i.l.bf16 %v9386_v36  ;;  %v1514_v15 = vsel %vm1485_vm7, %v1481_v63, %v4861_v35  ;;  %v1515_v27 = vsel %vm1485_vm7, %v1482_v57, %v4862_v14  ;;  %v4667_v4 = vunpack.i.h.bf16 %v9387_v19  ;;  %v9394_v35 = vld [vmem:[#allocation50_spill] sm:$0xff] }
 0x222   : > { %v4666_v16 = vunpack.i.l.bf16 %v9387_v19  ;;  %v1547_v49 = vsel %vm1518_vm9, %v1514_v15, %v4941_v58  ;;  %v1548_v50 = vsel %vm1518_vm9, %v1515_v27, %v4942_v10  ;;  %v1369_v11 = vsel %vm1353_vm5, %v1336_v61, %v4507_v60  ;;  %v5025_v60 = vpop.permute.xlu1 %5024  ;;  %v9396_v57 = vld [vmem:[#allocation62_spill] sm:$0xff] }
 0x223   : > { %v1580_v62 = vsel %vm1551_vm10, %v1547_v49, %v5021_v5  ;;  %v1581_v54 = vsel %vm1551_vm10, %v1548_v50, %v5022_v39  ;;  %v1368_v37 = vsel %vm1353_vm5, %v1335_v6, %v4506_v51  ;;  %v4747_v22 = vunpack.i.h.bf16 %v9388_v44  ;;  %v9395_v39 = vld [vmem:[#allocation55_spill] sm:$0xff]  ;;  %v9397_v15 = vld [vmem:[#allocation10_spill] sm:$0xff] }
 0x224   : > { %4199 = vmatmul.msk.bf16.gmra.mxu0 %vm1624_vm11, %v1590_v41  ;;  %v4746_v48 = vunpack.i.l.bf16 %v9388_v44  ;;  %v5838_v32 = vmov 0.0   ;;  %v4466_v53 = vunpack.i.l.bf16 %v9389_v2  ;;  %v1402_v52 = vsel %vm1386_vm4, %v1369_v11, %v4587_v45  ;;  %v5699_v41 = vld [vmem:[%s5932_s13 + $0x170] sm:$0xff] }
 0x225   : > { %1808 = vst.msk [vmem:[#allocation2 + $0x18] sm:$0x1] %vm1806_vm12, %v5838_v32  ;;  %v4827_v3 = vunpack.i.h.bf16 %v9390_v12  ;;  %v4826_v26 = vunpack.i.l.bf16 %v9390_v12  ;;  %v1401_v42 = vsel %vm1386_vm4, %v1368_v37, %v4586_v46  ;;  %v4907_v21 = vunpack.i.h.bf16 %v9391_v25  ;;  %v9399_v37 = vld [vmem:[#allocation30_spill] sm:$0xff] }
 0x226   : > { %1826 = vst.msk [vmem:[#allocation2 + $0x29] sm:$0x1] %vm1806_vm12, %v5838_v32  ;;  %v4906_v61 = vunpack.i.l.bf16 %v9391_v25  ;;  %v1598_v40 = vpack.c.bf16 %v1581_v54, %v1580_v62  ;;  %v1434_v33 = vsel %vm1419_vm6, %v1401_v42, %v4666_v16  ;;  %v1435_v31 = vsel %vm1419_vm6, %v1402_v52, %v4667_v4  ;;  %v9398_v54 = vld [vmem:[#allocation20_spill] sm:$0xff] }
 0x227   : > { %1798 = vst.msk [vmem:[#allocation2] sm:$0xff] %vm1353_vm5, %v5838_v32  ;;  %v4987_v0 = vunpack.i.h.bf16 %v7025_v13  ;;  %v4986_v59 = vunpack.i.l.bf16 %v7025_v13  ;;  %v4467_v30 = vunpack.i.h.bf16 %v9389_v2  ;;  %v4546_v7 = vunpack.i.l.bf16 %v9392_v20 }
 0x228   : > { %1799 = vst.msk [vmem:[#allocation2 + $0x8] sm:$0xff] %vm1353_vm5, %v5838_v32  ;;  %v1467_v17 = vsel %vm1452_vm8, %v1434_v33, %v4746_v48  ;;  %v1468_v6 = vsel %vm1452_vm8, %v1435_v31, %v4747_v22  ;;  %v4547_v34 = vunpack.i.h.bf16 %v9392_v20  ;;  %v4626_v13 = vunpack.i.l.bf16 %v9393_v29  ;;  %v9402_v33 = vld [vmem:[#allocation42_spill] sm:$0xff]  ;;  %v5701_v20 = vld [vmem:[%s5932_s13 + $0xc8] sm:$0xff] }
 0x229   : > { %1803 = vst.msk [vmem:[#allocation2 + $0x198] sm:$0xff] %vm1353_vm5, %v5838_v32  ;;  %v1500_v24 = vsel %vm1485_vm7, %v1467_v17, %v4826_v26  ;;  %v1501_v47 = vsel %vm1485_vm7, %v1468_v6, %v4827_v3  ;;  %v1351_v1 = vsel %vm1320_vm3, %v5698_v38, %v4466_v53  ;;  %v4627_v43 = vunpack.i.h.bf16 %v9393_v29  ;;  %v9400_v53 = vld [vmem:[#allocation39_spill] sm:$0xff]  ;;  %v9403_v6 = vld [vmem:[#allocation54_spill] sm:$0xff] }
 0x22a   : > { %1804 = vst.msk [vmem:[#allocation2 + $0x1a0] sm:$0xff] %vm1353_vm5, %v5838_v32  ;;  %v1533_v18 = vsel %vm1518_vm9, %v1500_v24, %v4906_v61  ;;  %v1534_v14 = vsel %vm1518_vm9, %v1501_v47, %v4907_v21  ;;  %v4707_v23 = vunpack.i.h.bf16 %v9394_v35  ;;  %v4706_v8 = vunpack.i.l.bf16 %v9394_v35  ;;  %v5700_v26 = vld [vmem:[%s5932_s13 + $0xc0] sm:$0xff]  ;;  %v9404_v47 = vld [vmem:[#allocation60_spill] sm:$0xff]  ;;  %s4065_s13 = sshll.u32 %s4062_s11, 4  ;;  %s9033_s13 = int_to_ptr.hbm [resolvable:$true] %s4065_s13 }
 0x22b   : > { %1809 = vst.msk [vmem:[#allocation2 + $0x30] sm:$0x1] %vm1806_vm12, %v5838_v32  ;;  %v1566_v10 = vsel %vm1551_vm10, %v1533_v18, %v4986_v59  ;;  %v1567_v58 = vsel %vm1551_vm10, %v1534_v14, %v4987_v0  ;;  %v1352_v56 = vsel %vm1320_vm3, %v5699_v41, %v4467_v30  ;;  %v1384_v55 = vsel %vm1353_vm5, %v1351_v1, %v4546_v7  ;;  %v9405_v18 = vld [vmem:[#allocation66_spill] sm:$0xff] }
 0x22c   : > { %4207 = vmatmul.msk.bf16.gmra.mxu3 %vm1624_vm11, %v1598_v40  ;;  %1810 = vst.msk [vmem:[#allocation2 + $0x48] sm:$0x1] %vm1806_vm12, %v5838_v32  ;;  %v4787_v5 = vunpack.i.h.bf16 %v9395_v39  ;;  %v4786_v9 = vunpack.i.l.bf16 %v9395_v39  ;;  %v1385_v51 = vsel %vm1353_vm5, %v1352_v56, %v4547_v34  ;;  %v1417_v63 = vsel %vm1386_vm4, %v1384_v55, %v4626_v13 }
 0x22d   : > { %1811 = vst.msk [vmem:[#allocation2 + $0x60] sm:$0x1] %vm1806_vm12, %v5838_v32  ;;  %v4867_v36 = vunpack.i.h.bf16 %v9396_v57  ;;  %v4866_v45 = vunpack.i.l.bf16 %v9396_v57  ;;  %v1418_v46 = vsel %vm1386_vm4, %v1385_v51, %v4627_v43  ;;  %v4947_v27 = vunpack.i.h.bf16 %v9397_v15 }
 0x22e   : > { %1812 = vst.msk [vmem:[#allocation2 + $0x78] sm:$0x1] %vm1806_vm12, %v5838_v32  ;;  %v4946_v19 = vunpack.i.l.bf16 %v9397_v15  ;;  %v1591_v4 = vpack.c.bf16 %v1567_v58, %v1566_v10  ;;  %v1450_v16 = vsel %vm1419_vm6, %v1417_v63, %v4706_v8  ;;  %v1451_v49 = vsel %vm1419_vm6, %v1418_v46, %v4707_v23 }
 0x22f   : > { %1813 = vst.msk [vmem:[#allocation2 + $0x90] sm:$0x1] %vm1806_vm12, %v5838_v32  ;;  %v5027_v50 = vunpack.i.h.bf16 %v5025_v60  ;;  %v5026_v62 = vunpack.i.l.bf16 %v5025_v60  ;;  %v4432_v11 = vunpack.i.h.bf16 %v9398_v54  ;;  %v4511_v44 = vunpack.i.l.bf16 %v9399_v37 }
 0x230   : > { %1814 = vst.msk [vmem:[#allocation2 + $0xa8] sm:$0x1] %vm1806_vm12, %v5838_v32  ;;  %v1483_v22 = vsel %vm1452_vm8, %v1450_v16, %v4786_v9  ;;  %v1484_v48 = vsel %vm1452_vm8, %v1451_v49, %v4787_v5  ;;  %v4512_v2 = vunpack.i.h.bf16 %v9399_v37  ;;  %v4591_v52 = vunpack.i.l.bf16 %v9400_v53 }
 0x231   : > { %1815 = vst.msk [vmem:[#allocation2 + $0xc0] sm:$0x1] %vm1806_vm12, %v5838_v32  ;;  %v1516_v12 = vsel %vm1485_vm7, %v1483_v22, %v4866_v45  ;;  %v1517_v3 = vsel %vm1485_vm7, %v1484_v48, %v4867_v36  ;;  %v9401_v42 = vunpack.i.l.bf16 %v9398_v54  ;;  %v4592_v21 = vunpack.i.h.bf16 %v9400_v53 }
 0x232   : > { %1816 = vst.msk [vmem:[#allocation2 + $0xd8] sm:$0x1] %vm1806_vm12, %v5838_v32  ;;  %v1549_v61 = vsel %vm1518_vm9, %v1516_v12, %v4946_v19  ;;  %v1550_v40 = vsel %vm1518_vm9, %v1517_v3, %v4947_v27  ;;  %v4672_v31 = vunpack.i.h.bf16 %v9402_v33  ;;  %v4671_v0 = vunpack.i.l.bf16 %v9402_v33 }
 0x233   : > { %v1337_v25 = vsel %vm1320_vm3, %v5700_v26, %v9401_v42  ;;  %1817 = vst.msk [vmem:[#allocation2 + $0xf0] sm:$0x1] %vm1806_vm12, %v5838_v32  ;;  %v1582_v59 = vsel %vm1551_vm10, %v1549_v61, %v5026_v62  ;;  %v1583_v30 = vsel %vm1551_vm10, %v1550_v40, %v5027_v50  ;;  %v1338_v7 = vsel %vm1320_vm3, %v5701_v20, %v4432_v11  ;;  %v7560_v50 = vld [vmem:[#allocation2 + $0x8] sm:$0xff] }
 0x234   : > { %4200 = vmatmul.msk.bf16.gmra.mxu0 %vm1624_vm11, %v1591_v4  ;;  %1818 = vst.msk [vmem:[#allocation2 + $0x108] sm:$0x1] %vm1806_vm12, %v5838_v32  ;;  %v1370_v17 = vsel %vm1353_vm5, %v1337_v25, %v4511_v44  ;;  %v4752_v34 = vunpack.i.h.bf16 %v9403_v6  ;;  %v4751_v29 = vunpack.i.l.bf16 %v9403_v6  ;;  %v1371_v13 = vsel %vm1353_vm5, %v1338_v7, %v4512_v2 }
 0x235   : > { %1819 = vst.msk [vmem:[#allocation2 + $0x120] sm:$0x1] %vm1806_vm12, %v5838_v32  ;;  %v1403_v24 = vsel %vm1386_vm4, %v1370_v17, %v4591_v52  ;;  %v4832_v38 = vunpack.i.h.bf16 %v9404_v47  ;;  %v4831_v1 = vunpack.i.l.bf16 %v9404_v47  ;;  %v1404_v43 = vsel %vm1386_vm4, %v1371_v13, %v4592_v21 }
 0x236   : > { %1820 = vst.msk [vmem:[#allocation2 + $0x138] sm:$0x1] %vm1806_vm12, %v5838_v32  ;;  %v4912_v14 = vunpack.i.h.bf16 %v9405_v18  ;;  %v4911_v35 = vunpack.i.l.bf16 %v9405_v18  ;;  %v1599_v23 = vpack.c.bf16 %v1583_v30, %v1582_v59  ;;  %v1436_v8 = vsel %vm1419_vm6, %v1403_v24, %v4671_v0 }
 0x237   : > { %1821 = vst.msk [vmem:[#allocation2 + $0x150] sm:$0x1] %vm1806_vm12, %v5838_v32  ;;  %v1437_v10 = vsel %vm1419_vm6, %v1404_v43, %v4672_v31  ;;  %v4992_v58 = vunpack.i.h.bf16 %v7092_v28  ;;  %v4991_v41 = vunpack.i.l.bf16 %v7092_v28  ;;  %v1469_v56 = vsel %vm1452_vm8, %v1436_v8, %v4751_v29  ;;  %v7510_v28 = vld [vmem:[%s9108_s2] ss:$0 sm:$0xff] }
 0x238   : > { %1822 = vst.msk [vmem:[#allocation2 + $0x168] sm:$0x1] %vm1806_vm12, %v5838_v32  ;;  %v1470_v55 = vsel %vm1452_vm8, %v1437_v10, %v4752_v34  ;;  %v1502_v39 = vsel %vm1485_vm7, %v1469_v56, %v4831_v1  ;;  %v1979_v48 = vrot.slane %v7560_v50, 1  ;;  %vm3126_vm3 = vcmask 457728  }
 0x239   : > { %1823 = vst.msk [vmem:[#allocation2 + $0x180] sm:$0x1] %vm1806_vm12, %v5838_v32  ;;  %v1503_v5 = vsel %vm1485_vm7, %v1470_v55, %v4832_v38  ;;  %v1535_v9 = vsel %vm1518_vm9, %v1502_v39, %v4911_v35  ;;  %vm3159_vm4 = vcmask 523264   ;;  %vm3974_vm8 = vcmask 1045509  }
 0x23a   : > { %1827 = vst.msk [vmem:[#allocation2 + $0x41] sm:$0x1] %vm1806_vm12, %v5838_v32  ;;  %v1536_v60 = vsel %vm1518_vm9, %v1503_v5, %v4912_v14  ;;  %v1568_v51 = vsel %vm1551_vm10, %v1535_v9, %v4991_v41  ;;  %vm3976_vm9 = vcmask 1046534  }
 0x23b   : > { %1828 = vst.msk [vmem:[#allocation2 + $0x59] sm:$0x1] %vm1806_vm12, %v5838_v32  ;;  %v1569_v63 = vsel %vm1551_vm10, %v1536_v60, %v4992_v58 }
 0x23c   : > { %4208 = vmatmul.msk.bf16.gmra.mxu3 %vm1624_vm11, %v1599_v23  ;;  %1829 = vst.msk [vmem:[#allocation2 + $0x71] sm:$0x1] %vm1806_vm12, %v5838_v32  ;;  %v1592_v45 = vpack.c.bf16 %v1569_v63, %v1568_v51 }
 0x23d   : > { %1830 = vst.msk [vmem:[#allocation2 + $0x89] sm:$0x1] %vm1806_vm12, %v5838_v32 }
 0x23e   : > { %1831 = vst.msk [vmem:[#allocation2 + $0xa1] sm:$0x1] %vm1806_vm12, %v5838_v32 }
 0x23f   : > { %1832 = vst.msk [vmem:[#allocation2 + $0xb9] sm:$0x1] %vm1806_vm12, %v5838_v32 }
 0x240   : > { %1833 = vst.msk [vmem:[#allocation2 + $0xd1] sm:$0x1] %vm1806_vm12, %v5838_v32 }
 0x241   : > { %v1686_v57 = vpop.f32.mrf.mxu0  ;;  %1834 = vst.msk [vmem:[#allocation2 + $0xe9] sm:$0x1] %vm1806_vm12, %v5838_v32 }
 0x242   : > { %v1687_v36 = vadd.f32 %v7510_v28, %v1686_v57  ;;  %1835 = vst.msk [vmem:[#allocation2 + $0x101] sm:$0x1] %vm1806_vm12, %v5838_v32 }
 0x243   : > { %1836 = vst.msk [vmem:[#allocation2 + $0x119] sm:$0x1] %vm1806_vm12, %v5838_v32 }
 0x244   : > { %v1766_v46 = vmax.f32 %v1687_v36, 0.0  ;;  %4201 = vmatmul.msk.bf16.gmra.mxu0 %vm1624_vm11, %v1592_v45  ;;  %1837 = vst.msk [vmem:[#allocation2 + $0x131] sm:$0x1] %vm1806_vm12, %v5838_v32 }
 0x245   : > { %1838 = vst.msk [vmem:[#allocation2 + $0x149] sm:$0x1] %vm1806_vm12, %v5838_v32 }
 0x246   : > { %1844 = vst.msk [vmem:[#allocation2 + $0x19] sm:$0xff] %vm1353_vm5, %v1766_v46 }
 0x247   : > { %1839 = vst.msk [vmem:[#allocation2 + $0x161] sm:$0x1] %vm1806_vm12, %v5838_v32 }
 0x248   : > { %1840 = vst.msk [vmem:[#allocation2 + $0x179] sm:$0x1] %vm1806_vm12, %v5838_v32 }
 0x249   : > { %v1688_v15 = vpop.f32.mrf.mxu0  ;;  %1841 = vst.msk [vmem:[#allocation2 + $0x191] sm:$0x1] %vm1806_vm12, %v5838_v32 }
 0x24a   : > { %v1689_v27 = vadd.f32 %v7510_v28, %v1688_v15  ;;  %1807 = vst.msk [vmem:[#allocation2] sm:$0x1] %vm1806_vm12, %v5838_v32 }
 0x24b   : > { %1824 = vst.msk [vmem:[#allocation2 + $0x198] sm:$0x1] %vm1806_vm12, %v5838_v32 }
 0x24c   : > { %v1767_v19 = vmax.f32 %v1689_v27, 0.0  ;;  %1801 = vst.msk [vmem:[#allocation2 + $0x10] sm:$0x3] %vm1800_vm13, %v5838_v32 }
 0x24d   : > { %v7554_v16 = vld [vmem:[#allocation2 + $0x18] sm:$0xff]  ;;  %1805 = vst.msk [vmem:[#allocation2 + $0x1a8] sm:$0x3] %vm1800_vm13, %v5838_v32 }
 0x24e   : > { %1845 = vst.msk [vmem:[#allocation2 + $0x21] sm:$0xff] %vm1353_vm5, %v1767_v19  ;;  %v1983_v54 = vrot.slane %v7554_v16, 1  ;;  %v2063_v2 = vrot.slane %v7554_v16, 2 }
 0x24f   : > { %1825 = vst.msk [vmem:[#allocation2 + $0x11] sm:$0x1] %vm1806_vm12, %v5838_v32 }
 0x250   : > { %1842 = vst.msk [vmem:[#allocation2 + $0x1a9] sm:$0x1] %vm1806_vm12, %v5838_v32 }
 0x251   : > { %v1691_v4 = vpop.f32.mrf.mxu0  ;;  %v7565_v11 = vld [vmem:[#allocation2] sm:$0xff] }
 0x252   : > { %v1692_v49 = vadd.f32 %v7510_v28, %v1691_v4  ;;  %v1978_v22 = vrot.slane %v7565_v11, 1 }
 0x254   : > { %v1768_v62 = vmax.f32 %v1692_v49, 0.0  ;;  %v1980_v0 = vsel %vm364_vm0, %v1978_v22, %v1979_v48 }
 0x255   : > { %v7567_v37 = vld [vmem:[#allocation2 + $0x20] sm:$0xff]  ;;  %v1881_v44 = vld [vmem:[#allocation2 + $0x28] sm:$0x3] }
 0x256   : > { %1846 = vst.msk [vmem:[#allocation2 + $0x31] sm:$0xff] %vm1353_vm5, %v1768_v62  ;;  %v1984_v53 = vrot.slane %v7567_v37, 1  ;;  %v1986_v52 = vrot.slane %v1881_v44, 1  ;;  %v2064_v32 = vrot.slane %v7567_v37, 2  ;;  %v2066_v12 = vrot.slane %v1881_v44, 2 }
 0x257   : > { %v7581_v40 = vld [vmem:[#allocation2 + $0x10] sm:$0x3] }
 0x258   : > { %v1985_v3 = vsel %vm364_vm0, %v1983_v54, %v1984_v53  ;;  %v1987_v26 = vsel %vm364_vm0, %v1984_v53, %v1986_v52  ;;  %v2065_v42 = vsel %vm445_vm1, %v2063_v2, %v2064_v32  ;;  %v2067_v25 = vsel %vm445_vm1, %v2064_v32, %v2066_v12 }
 0x259   : > { %v1693_v21 = vpop.f32.mrf.mxu0  ;;  %v7579_v61 = vpack.i.bf16 %v1987_v26, %v1985_v3  ;;  %v7583_v33 = vpack.i.bf16 %v2067_v25, %v2065_v42  ;;  %v1981_v59 = vrot.slane %v7581_v40, 1 }
 0x25a   : > { %v1694_v31 = vadd.f32 %v7510_v28, %v1693_v21 }
 0x25b   : > { %9406 = vst [vmem:[#allocation22_spill] sm:$0xff] %v7579_v61  ;;  %5034 = vrot.lane.b32.xlu0 %v7579_v61, %s5831_s15  ;;  %v1982_v20 = vsel %vm364_vm0, %v1979_v48, %v1981_v59 }
 0x25c   : > { %9407 = vst [vmem:[#allocation25_spill] sm:$0xff] %v7583_v33  ;;  %v1769_v30 = vmax.f32 %v1694_v31, 0.0  ;;  %v5028_v7 = vpack.i.bf16 %v1982_v20, %v1980_v0 }
 0x25d   : > { %v7595_v24 = vld [vmem:[#allocation2 + $0x30] sm:$0xff] }
 0x25e   : > { %1847 = vst.msk [vmem:[#allocation2 + $0x39] sm:$0xff] %vm1353_vm5, %v1769_v30  ;;  %5029 = vrot.lane.b32.xlu2 %v5028_v7, %s5831_s15  ;;  %v1988_v43 = vrot.slane %v7595_v24, 1  ;;  %v2068_v18 = vrot.slane %v7595_v24, 2 }
 0x25f   : > { %v1731_v17 = vpop.f32.mrf.mxu3 }
 0x260   : > { %v1732_v6 = vadd.f32 %v7510_v28, %v1731_v17 }
 0x261   : > { %v1696_v34 = vpop.f32.mrf.mxu0 }
 0x262   : > { %v1784_v29 = vmax.f32 %v1732_v6, 0.0  ;;  %v1697_v13 = vadd.f32 %v7510_v28, %v1696_v34 }
 0x264   : > { %1862 = vst.msk [vmem:[#allocation2 + $0xf1] sm:$0xff] %vm1353_vm5, %v1784_v29  ;;  %v1770_v47 = vmax.f32 %v1697_v13, 0.0 }
 0x265   : > { %v7598_v38 = vld [vmem:[#allocation2 + $0x38] sm:$0xff]  ;;  %v1884_v1 = vld [vmem:[#allocation2 + $0x40] sm:$0x3] }
 0x266   : > { %1848 = vst.msk [vmem:[#allocation2 + $0x49] sm:$0xff] %vm1353_vm5, %v1770_v47  ;;  %v1989_v14 = vrot.slane %v7598_v38, 1  ;;  %v1991_v35 = vrot.slane %v1884_v1, 1  ;;  %v2069_v23 = vrot.slane %v7598_v38, 2  ;;  %v2071_v8 = vrot.slane %v1884_v1, 2 }
 0x267   : > { %v1733_v10 = vpop.f32.mrf.mxu3 }
 0x268   : > { %v1734_v58 = vadd.f32 %v7510_v28, %v1733_v10  ;;  %v1990_v41 = vsel %vm364_vm0, %v1988_v43, %v1989_v14  ;;  %v1992_v56 = vsel %vm364_vm0, %v1989_v14, %v1991_v35  ;;  %v2070_v55 = vsel %vm445_vm1, %v2068_v18, %v2069_v23 }
 0x269   : > { %v1698_v39 = vpop.f32.mrf.mxu0  ;;  %v7609_v5 = vpack.i.bf16 %v1992_v56, %v1990_v41  ;;  %v2072_v9 = vsel %vm445_vm1, %v2069_v23, %v2071_v8 }
 0x26a   : > { %v1785_v60 = vmax.f32 %v1734_v58, 0.0  ;;  %v1699_v51 = vadd.f32 %v7510_v28, %v1698_v39  ;;  %v7613_v63 = vpack.i.bf16 %v2072_v9, %v2070_v55 }
 0x26b   : > { %9408 = vst [vmem:[#allocation11_spill] sm:$0xff] %v7609_v5  ;;  %5039 = vrot.lane.b32.xlu1 %v7609_v5, %s5831_s15  ;;  %v7620_v46 = vld [vmem:[#allocation2 + $0xf0] sm:$0xff] }
 0x26c   : > { %9409 = vst [vmem:[#allocation29_spill] sm:$0xff] %v7613_v63  ;;  %v1771_v57 = vmax.f32 %v1699_v51, 0.0  ;;  %v2028_v54 = vrot.slane %v7620_v46, 1  ;;  %v2108_v12 = vrot.slane %v7620_v46, 2 }
 0x26d   : > { %1863 = vst.msk [vmem:[#allocation2 + $0xf9] sm:$0xff] %vm1353_vm5, %v1785_v60  ;;  %v7623_v4 = vld [vmem:[#allocation2 + $0x48] sm:$0xff] }
 0x26e   : > { %1849 = vst.msk [vmem:[#allocation2 + $0x51] sm:$0xff] %vm1353_vm5, %v1771_v57  ;;  %v1993_v32 = vrot.slane %v7623_v4, 1  ;;  %v2073_v21 = vrot.slane %v7623_v4, 2 }
 0x26f   : > { %v1736_v36 = vpop.f32.mrf.mxu3 }
 0x270   : > { %v1737_v45 = vadd.f32 %v7510_v28, %v1736_v36 }
 0x271   : > { %v1701_v15 = vpop.f32.mrf.mxu0 }
 0x272   : > { %v1786_v27 = vmax.f32 %v1737_v45, 0.0  ;;  %v1702_v19 = vadd.f32 %v7510_v28, %v1701_v15 }
 0x274   : > { %v7625_v49 = vld [vmem:[#allocation2 + $0xf8] sm:$0xff]  ;;  %v1908_v62 = vld [vmem:[#allocation2 + $0x100] sm:$0x3]  ;;  %1864 = vst.msk [vmem:[#allocation2 + $0x109] sm:$0xff] %vm1353_vm5, %v1786_v27  ;;  %v1772_v44 = vmax.f32 %v1702_v19, 0.0 }
 0x275   : > { %v2029_v22 = vrot.slane %v7625_v49, 1  ;;  %v2031_v48 = vrot.slane %v1908_v62, 1  ;;  %v2111_v2 = vrot.slane %v1908_v62, 2  ;;  %v7630_v53 = vld [vmem:[#allocation2 + $0x50] sm:$0xff]  ;;  %v1887_v52 = vld [vmem:[#allocation2 + $0x58] sm:$0x3] }
 0x276   : > { %v2109_v3 = vrot.slane %v7625_v49, 2  ;;  %1850 = vst.msk [vmem:[#allocation2 + $0x61] sm:$0xff] %vm1353_vm5, %v1772_v44  ;;  %v1994_v26 = vrot.slane %v7630_v53, 1  ;;  %v1996_v42 = vrot.slane %v1887_v52, 1  ;;  %v2076_v25 = vrot.slane %v1887_v52, 2 }
 0x277   : > { %v1738_v31 = vpop.f32.mrf.mxu3  ;;  %v2030_v0 = vsel %vm364_vm0, %v2028_v54, %v2029_v22  ;;  %v2032_v59 = vsel %vm364_vm0, %v2029_v22, %v2031_v48  ;;  %v2074_v30 = vrot.slane %v7630_v53, 2 }
 0x278   : > { %v2110_v20 = vsel %vm445_vm1, %v2108_v12, %v2109_v3  ;;  %v1739_v7 = vadd.f32 %v7510_v28, %v1738_v31  ;;  %v1995_v17 = vsel %vm364_vm0, %v1993_v32, %v1994_v26  ;;  %v1997_v6 = vsel %vm364_vm0, %v1994_v26, %v1996_v42 }
 0x279   : > { %v2112_v34 = vsel %vm445_vm1, %v2109_v3, %v2111_v2  ;;  %v1703_v29 = vpop.f32.mrf.mxu0  ;;  %v7646_v13 = vpack.i.bf16 %v1997_v6, %v1995_v17  ;;  %v2075_v47 = vsel %vm445_vm1, %v2073_v21, %v2074_v30  ;;  %v2077_v1 = vsel %vm445_vm1, %v2074_v30, %v2076_v25 }
 0x27a   : > { %v1787_v43 = vmax.f32 %v1739_v7, 0.0  ;;  %v1704_v18 = vadd.f32 %v7510_v28, %v1703_v29  ;;  %v7653_v14 = vpack.i.bf16 %v2032_v59, %v2030_v0  ;;  %v7655_v35 = vpack.i.bf16 %v2077_v1, %v2075_v47 }
 0x27b   : > { %9410 = vst [vmem:[#allocation34_spill] sm:$0xff] %v7646_v13  ;;  %5044 = vrot.lane.b32.xlu2 %v7646_v13, %s5831_s15  ;;  %v7657_v23 = vpack.i.bf16 %v2112_v34, %v2110_v20  ;;  %v7662_v41 = vld [vmem:[#allocation2 + $0x108] sm:$0xff] }
 0x27c   : > { %9411 = vst [vmem:[#allocation16_spill] sm:$0xff] %v7653_v14  ;;  %v1773_v8 = vmax.f32 %v1704_v18, 0.0  ;;  %v2033_v57 = vrot.slane %v7662_v41, 1  ;;  %v2113_v44 = vrot.slane %v7662_v41, 2 }
 0x27d   : > { %9412 = vst [vmem:[#allocation19_spill] sm:$0xff] %v7655_v35  ;;  %v7665_v9 = vld [vmem:[#allocation2 + $0x60] sm:$0xff] }
 0x27e   : > { %1865 = vst.msk [vmem:[#allocation2 + $0x111] sm:$0xff] %vm1353_vm5, %v1787_v43  ;;  %v1998_v54 = vrot.slane %v7665_v9, 1  ;;  %v2078_v32 = vrot.slane %v7665_v9, 2 }
 0x27f   : > { %1851 = vst.msk [vmem:[#allocation2 + $0x69] sm:$0xff] %vm1353_vm5, %v1773_v8  ;;  %v1741_v10 = vpop.f32.mrf.mxu3 }
 0x280   : > { %v1742_v58 = vadd.f32 %v7510_v28, %v1741_v10 }
 0x281   : > { %v1706_v56 = vpop.f32.mrf.mxu0 }
 0x282   : > { %v1788_v55 = vmax.f32 %v1742_v58, 0.0  ;;  %v1707_v39 = vadd.f32 %v7510_v28, %v1706_v56 }
 0x284   : > { %1866 = vst.msk [vmem:[#allocation2 + $0x121] sm:$0xff] %vm1353_vm5, %v1788_v55  ;;  %v1774_v36 = vmax.f32 %v1707_v39, 0.0 }
 0x285   : > { %v7667_v60 = vld [vmem:[#allocation2 + $0x110] sm:$0xff]  ;;  %v1911_v51 = vld [vmem:[#allocation2 + $0x118] sm:$0x3] }
 0x286   : > { %v2034_v45 = vrot.slane %v7667_v60, 1  ;;  %v2036_v15 = vrot.slane %v1911_v51, 1  ;;  %v2116_v27 = vrot.slane %v1911_v51, 2  ;;  %v7672_v19 = vld [vmem:[#allocation2 + $0x68] sm:$0xff]  ;;  %v1890_v62 = vld [vmem:[#allocation2 + $0x70] sm:$0x3] }
 0x287   : > { %v2114_v22 = vrot.slane %v7667_v60, 2  ;;  %1852 = vst.msk [vmem:[#allocation2 + $0x79] sm:$0xff] %vm1353_vm5, %v1774_v36  ;;  %v1999_v48 = vrot.slane %v7672_v19, 1  ;;  %v2001_v2 = vrot.slane %v1890_v62, 1  ;;  %v1743_v12 = vpop.f32.mrf.mxu3  ;;  %v2079_v26 = vrot.slane %v7672_v19, 2 }
 0x288   : > { %v2035_v52 = vsel %vm364_vm0, %v2033_v57, %v2034_v45  ;;  %v2037_v3 = vsel %vm364_vm0, %v2034_v45, %v2036_v15  ;;  %v2081_v42 = vrot.slane %v1890_v62, 2  ;;  %v1744_v21 = vadd.f32 %v7510_v28, %v1743_v12 }
 0x289   : > { %v2115_v25 = vsel %vm445_vm1, %v2113_v44, %v2114_v22  ;;  %v2000_v31 = vsel %vm364_vm0, %v1998_v54, %v1999_v48  ;;  %v2002_v0 = vsel %vm364_vm0, %v1999_v48, %v2001_v2  ;;  %v2117_v59 = vsel %vm445_vm1, %v2114_v22, %v2116_v27  ;;  %v1708_v30 = vpop.f32.mrf.mxu0 }
 0x28a   : > { %v7688_v20 = vpack.i.bf16 %v2002_v0, %v2000_v31  ;;  %v2080_v7 = vsel %vm445_vm1, %v2078_v32, %v2079_v26  ;;  %v2082_v17 = vsel %vm445_vm1, %v2079_v26, %v2081_v42  ;;  %v1789_v6 = vmax.f32 %v1744_v21, 0.0 }
 0x28b   : > { %v1709_v34 = vadd.f32 %v7510_v28, %v1708_v30  ;;  %v7695_v29 = vpack.i.bf16 %v2037_v3, %v2035_v52  ;;  %v7697_v47 = vpack.i.bf16 %v2082_v17, %v2080_v7  ;;  %v7699_v1 = vpack.i.bf16 %v2117_v59, %v2115_v25  ;;  %v7704_v10 = vld [vmem:[#allocation2 + $0x120] sm:$0xff] }
 0x28c   : > { %9413 = vst [vmem:[#allocation28_spill] sm:$0xff] %v7688_v20  ;;  %5049 = vrot.lane.b32.xlu0 %v7688_v20, %s5831_s15  ;;  %v2038_v36 = vrot.slane %v7704_v10, 1  ;;  %v2118_v45 = vrot.slane %v7704_v10, 2 }
 0x28d   : > { %9414 = vst [vmem:[#allocation33_spill] sm:$0xff] %v7695_v29  ;;  %v1775_v43 = vmax.f32 %v1709_v34, 0.0 }
 0x28e   : > { %9415 = vst [vmem:[#allocation21_spill] sm:$0xff] %v7697_v47  ;;  %v7707_v39 = vld [vmem:[#allocation2 + $0x78] sm:$0xff] }
 0x28f   : > { %1867 = vst.msk [vmem:[#allocation2 + $0x129] sm:$0xff] %vm1353_vm5, %v1789_v6  ;;  %v1746_v18 = vpop.f32.mrf.mxu3  ;;  %v2003_v48 = vrot.slane %v7707_v39, 1  ;;  %v2083_v2 = vrot.slane %v7707_v39, 2 }
 0x290   : > { %1853 = vst.msk [vmem:[#allocation2 + $0x81] sm:$0xff] %vm1353_vm5, %v1775_v43  ;;  %v1747_v8 = vadd.f32 %v7510_v28, %v1746_v18 }
 0x291   : > { %v1711_v58 = vpop.f32.mrf.mxu0 }
 0x292   : > { %v1790_v56 = vmax.f32 %v1747_v8, 0.0  ;;  %v1712_v55 = vadd.f32 %v7510_v28, %v1711_v58 }
 0x294   : > { %5059 = vrot.lane.b32.xlu0 %v7653_v14, %s5831_s15  ;;  %1868 = vst.msk [vmem:[#allocation2 + $0x139] sm:$0xff] %vm1353_vm5, %v1790_v56  ;;  %v1776_v15 = vmax.f32 %v1712_v55, 0.0 }
 0x296   : > { %v7711_v51 = vld [vmem:[#allocation2 + $0x128] sm:$0xff]  ;;  %v1914_v57 = vld [vmem:[#allocation2 + $0x130] sm:$0x3]  ;;  %1854 = vst.msk [vmem:[#allocation2 + $0x91] sm:$0xff] %vm1353_vm5, %v1776_v15 }
 0x297   : > { %v2039_v27 = vrot.slane %v7711_v51, 1  ;;  %v2041_v62 = vrot.slane %v1914_v57, 1  ;;  %v2121_v54 = vrot.slane %v1914_v57, 2  ;;  %v7717_v44 = vld [vmem:[#allocation2 + $0x80] sm:$0xff]  ;;  %v1893_v22 = vld [vmem:[#allocation2 + $0x88] sm:$0x3]  ;;  %v1748_v42 = vpop.f32.mrf.mxu3 }
 0x298   : > { %v2119_v52 = vrot.slane %v7711_v51, 2  ;;  %v2004_v3 = vrot.slane %v7717_v44, 1  ;;  %v2006_v26 = vrot.slane %v1893_v22, 1  ;;  %v2084_v21 = vrot.slane %v7717_v44, 2 }
 0x299   : > { %v2040_v32 = vsel %vm364_vm0, %v2038_v36, %v2039_v27  ;;  %v2042_v12 = vsel %vm364_vm0, %v2039_v27, %v2041_v62  ;;  %v2086_v31 = vrot.slane %v1893_v22, 2  ;;  %v1749_v59 = vadd.f32 %v7510_v28, %v1748_v42  ;;  %v1713_v6 = vpop.f32.mrf.mxu0 }
 0x29a   : > { %v7726_v25 = vpack.i.bf16 %v2042_v12, %v2040_v32  ;;  %v2120_v0 = vsel %vm445_vm1, %v2118_v45, %v2119_v52  ;;  %v2005_v30 = vsel %vm364_vm0, %v2003_v48, %v2004_v3  ;;  %v2007_v7 = vsel %vm364_vm0, %v2004_v3, %v2006_v26 }
 0x29b   : > { %v2122_v17 = vsel %vm445_vm1, %v2119_v52, %v2121_v54  ;;  %v7736_v34 = vpack.i.bf16 %v2007_v7, %v2005_v30  ;;  %v2085_v43 = vsel %vm445_vm1, %v2083_v2, %v2084_v21  ;;  %v2087_v18 = vsel %vm445_vm1, %v2084_v21, %v2086_v31  ;;  %v7750_v15 = vld [vmem:[#allocation2 + $0x138] sm:$0xff] }
 0x29c   : > { %9416 = vst [vmem:[#allocation15_spill] sm:$0xff] %v7726_v25  ;;  %5069 = vrot.lane.b32.xlu2 %v7726_v25, %s5831_s15  ;;  %v1791_v8 = vmax.f32 %v1749_v59, 0.0  ;;  %v1714_v58 = vadd.f32 %v7510_v28, %v1713_v6  ;;  %v7743_v56 = vpack.i.bf16 %v2087_v18, %v2085_v43  ;;  %v7745_v55 = vpack.i.bf16 %v2122_v17, %v2120_v0 }
 0x29d   : > { %9417 = vst [vmem:[#allocation14_spill] sm:$0xff] %v7736_v34  ;;  %5054 = vrot.lane.b32.xlu1 %v7736_v34, %s5831_s15  ;;  %v7753_v22 = vld [vmem:[#allocation2 + $0x90] sm:$0xff]  ;;  %v2043_v52 = vrot.slane %v7750_v15, 1  ;;  %v2123_v26 = vrot.slane %v7750_v15, 2 }
 0x29e   : > { %9418 = vst [vmem:[#allocation32_spill] sm:$0xff] %v7745_v55  ;;  %v1777_v57 = vmax.f32 %v1714_v58, 0.0  ;;  %v2008_v0 = vrot.slane %v7753_v22, 1  ;;  %v2088_v58 = vrot.slane %v7753_v22, 2 }
 0x29f   : > { %1869 = vst.msk [vmem:[#allocation2 + $0x141] sm:$0xff] %vm1353_vm5, %v1791_v8  ;;  %v1751_v36 = vpop.f32.mrf.mxu3 }
 0x2a0   : > { %1855 = vst.msk [vmem:[#allocation2 + $0x99] sm:$0xff] %vm1353_vm5, %v1777_v57  ;;  %v1752_v45 = vadd.f32 %v7510_v28, %v1751_v36 }
 0x2a1   : > { %v1716_v27 = vpop.f32.mrf.mxu0 }
 0x2a2   : > { %v1792_v62 = vmax.f32 %v1752_v45, 0.0  ;;  %v1717_v54 = vadd.f32 %v7510_v28, %v1716_v27 }
 0x2a4   : > { %1870 = vst.msk [vmem:[#allocation2 + $0x151] sm:$0xff] %vm1353_vm5, %v1792_v62  ;;  %v1778_v32 = vmax.f32 %v1717_v54, 0.0 }
 0x2a5   : > { %5064 = vrot.lane.b32.xlu1 %v7695_v29, %s5831_s15 }
 0x2a6   : > { %v7757_v48 = vld [vmem:[#allocation2 + $0x140] sm:$0xff]  ;;  %v1917_v2 = vld [vmem:[#allocation2 + $0x148] sm:$0x3]  ;;  %1856 = vst.msk [vmem:[#allocation2 + $0xa9] sm:$0xff] %vm1353_vm5, %v1778_v32 }
 0x2a7   : > { %v2044_v12 = vrot.slane %v7757_v48, 1  ;;  %v2046_v3 = vrot.slane %v1917_v2, 1  ;;  %v2126_v42 = vrot.slane %v1917_v2, 2  ;;  %v7763_v21 = vld [vmem:[#allocation2 + $0x98] sm:$0xff]  ;;  %v1896_v31 = vld [vmem:[#allocation2 + $0xa0] sm:$0x3]  ;;  %v1753_v43 = vpop.f32.mrf.mxu3 }
 0x2a8   : > { %v2124_v59 = vrot.slane %v7757_v48, 2  ;;  %v2009_v17 = vrot.slane %v7763_v21, 1  ;;  %v2011_v6 = vrot.slane %v1896_v31, 1  ;;  %v2091_v8 = vrot.slane %v1896_v31, 2 }
 0x2a9   : > { %v2045_v30 = vsel %vm364_vm0, %v2043_v52, %v2044_v12  ;;  %v2047_v7 = vsel %vm364_vm0, %v2044_v12, %v2046_v3  ;;  %v2089_v57 = vrot.slane %v7763_v21, 2  ;;  %v1754_v36 = vadd.f32 %v7510_v28, %v1753_v43  ;;  %v1718_v54 = vpop.f32.mrf.mxu0 }
 0x2aa   : > { %v7771_v18 = vpack.i.bf16 %v2047_v7, %v2045_v30  ;;  %v2010_v45 = vsel %vm364_vm0, %v2008_v0, %v2009_v17  ;;  %v2012_v27 = vsel %vm364_vm0, %v2009_v17, %v2011_v6  ;;  %v2125_v62 = vsel %vm445_vm1, %v2123_v26, %v2124_v59 }
 0x2ab   : > { %v7781_v2 = vpack.i.bf16 %v2012_v27, %v2010_v45  ;;  %v2090_v52 = vsel %vm445_vm1, %v2088_v58, %v2089_v57  ;;  %v2092_v32 = vsel %vm445_vm1, %v2089_v57, %v2091_v8  ;;  %v2127_v12 = vsel %vm445_vm1, %v2124_v59, %v2126_v42  ;;  %v7796_v42 = vld [vmem:[#allocation2 + $0x150] sm:$0xff] }
 0x2ac   : > { %9419 = vst [vmem:[#allocation59_spill] sm:$0xff] %v7771_v18  ;;  %5074 = vrot.lane.b32.xlu0 %v7771_v18, %s5831_s15  ;;  %v1793_v3 = vmax.f32 %v1754_v36, 0.0  ;;  %v1719_v31 = vadd.f32 %v7510_v28, %v1718_v54  ;;  %v7789_v0 = vpack.i.bf16 %v2092_v32, %v2090_v52  ;;  %v7792_v30 = vpack.i.bf16 %v2127_v12, %v2125_v62 }
 0x2ad   : > { %9420 = vst [vmem:[#allocation71_spill] sm:$0xff] %v7781_v2  ;;  %5084 = vrot.lane.b32.xlu2 %v7781_v2, %s5831_s15  ;;  %v7799_v8 = vld [vmem:[#allocation2 + $0xa8] sm:$0xff]  ;;  %v2058_v36 = vrot.slane %v7565_v11, 2  ;;  %v2059_v45 = vrot.slane %v7560_v50, 2  ;;  %v2061_v27 = vrot.slane %v7581_v40, 2  ;;  %v2048_v54 = vrot.slane %v7796_v42, 1 }
 0x2ae   : > { %9421 = vst [vmem:[#allocation12_spill] sm:$0xff] %v7789_v0  ;;  %v1779_v26 = vmax.f32 %v1719_v31, 0.0  ;;  %v2128_v18 = vrot.slane %v7796_v42, 2 }
 0x2af   : > { %1871 = vst.msk [vmem:[#allocation2 + $0x159] sm:$0xff] %vm1353_vm5, %v1793_v3  ;;  %v1756_v7 = vpop.f32.mrf.mxu3 }
 0x2b0   : > { %9422 = vst [vmem:[#allocation27_spill] sm:$0xff] %v7792_v30  ;;  %v1757_v17 = vadd.f32 %v7510_v28, %v1756_v7 }
 0x2b1   : > { %1857 = vst.msk [vmem:[#allocation2 + $0xb1] sm:$0xff] %vm1353_vm5, %v1779_v26  ;;  %v1721_v6 = vpop.f32.mrf.mxu0  ;;  %v2013_v26 = vrot.slane %v7799_v8, 1 }
 0x2b2   : > { %v1794_v59 = vmax.f32 %v1757_v17, 0.0  ;;  %v1722_v43 = vadd.f32 %v7510_v28, %v1721_v6 }
 0x2b4   : > { %1872 = vst.msk [vmem:[#allocation2 + $0x169] sm:$0xff] %vm1353_vm5, %v1794_v59  ;;  %v1780_v62 = vmax.f32 %v1722_v43, 0.0 }
 0x2b6   : > { %v7801_v58 = vld [vmem:[#allocation2 + $0x158] sm:$0xff]  ;;  %v1920_v57 = vld [vmem:[#allocation2 + $0x160] sm:$0x3]  ;;  %1858 = vst.msk [vmem:[#allocation2 + $0xc1] sm:$0xff] %vm1353_vm5, %v1780_v62 }
 0x2b7   : > { %v2049_v52 = vrot.slane %v7801_v58, 1  ;;  %v2051_v32 = vrot.slane %v1920_v57, 1  ;;  %v2131_v12 = vrot.slane %v1920_v57, 2  ;;  %v2129_v11 = vrot.slane %v7801_v58, 2  ;;  %v1758_v6 = vpop.f32.mrf.mxu3 }
 0x2b8   : > { %v7809_v3 = vld [vmem:[#allocation2 + $0xb0] sm:$0xff]  ;;  %v1899_v31 = vld [vmem:[#allocation2 + $0xb8] sm:$0x3]  ;;  %v1759_v14 = vadd.f32 %v7510_v28, %v1758_v6 }
 0x2b9   : > { %v2050_v50 = vsel %vm364_vm0, %v2048_v54, %v2049_v52  ;;  %v2052_v40 = vsel %vm364_vm0, %v2049_v52, %v2051_v32  ;;  %v2014_v7 = vrot.slane %v7809_v3, 1  ;;  %v2016_v17 = vrot.slane %v1899_v31, 1  ;;  %v1723_v52 = vpop.f32.mrf.mxu0 }
 0x2ba   : > { %v7817_v59 = vpack.i.bf16 %v2052_v40, %v2050_v50  ;;  %v2096_v43 = vrot.slane %v1899_v31, 2  ;;  %v2094_v57 = vrot.slane %v7809_v3, 2  ;;  %v2093_v54 = vrot.slane %v7799_v8, 2 }
 0x2bb   : > { %v2015_v25 = vsel %vm364_vm0, %v2013_v26, %v2014_v7  ;;  %v2017_v62 = vsel %vm364_vm0, %v2014_v7, %v2016_v17  ;;  %v2130_v31 = vsel %vm445_vm1, %v2128_v18, %v2129_v11  ;;  %v2132_v50 = vsel %vm445_vm1, %v2129_v11, %v2131_v12 }
 0x2bc   : > { %9423 = vst [vmem:[#allocation38_spill] sm:$0xff] %v7817_v59  ;;  %5079 = vrot.lane.b32.xlu1 %v7817_v59, %s5831_s15  ;;  %v7827_v32 = vpack.i.bf16 %v2017_v62, %v2015_v25  ;;  %v1795_v40 = vmax.f32 %v1759_v14, 0.0  ;;  %v1724_v29 = vadd.f32 %v7510_v28, %v1723_v52  ;;  %v2095_v6 = vsel %vm445_vm1, %v2093_v54, %v2094_v57 }
 0x2bd   : > { %v2097_v26 = vsel %vm445_vm1, %v2094_v57, %v2096_v43  ;;  %v2060_v25 = vsel %vm445_vm1, %v2058_v36, %v2059_v45  ;;  %v2062_v17 = vsel %vm445_vm1, %v2059_v45, %v2061_v27  ;;  %v7841_v12 = vpack.i.bf16 %v2132_v50, %v2130_v31  ;;  %v7845_v57 = vld [vmem:[#allocation2 + $0x168] sm:$0xff]  ;;  %v7850_v45 = vld [vmem:[#allocation2 + $0xc0] sm:$0xff] }
 0x2be   : > { %9424 = vst [vmem:[#allocation23_spill] sm:$0xff] %v7827_v32  ;;  %5094 = vrot.lane.b32.xlu0 %v7827_v32, %s5831_s15  ;;  %v1781_v7 = vmax.f32 %v1724_v29, 0.0  ;;  %v7839_v18 = vpack.i.bf16 %v2097_v26, %v2095_v6  ;;  %v5098_v11 = vpack.i.bf16 %v2062_v17, %v2060_v25  ;;  %v2053_v52 = vrot.slane %v7845_v57, 1 }
 0x2bf   : > { %1873 = vst.msk [vmem:[#allocation2 + $0x171] sm:$0xff] %vm1353_vm5, %v1795_v40  ;;  %v1761_v14 = vpop.f32.mrf.mxu3  ;;  %v2133_v6 = vrot.slane %v7845_v57, 2  ;;  %v2018_v17 = vrot.slane %v7850_v45, 1 }
 0x2c0   : > { %9425 = vst [vmem:[#allocation41_spill] sm:$0xff] %v7841_v12  ;;  %v1762_v43 = vadd.f32 %v7510_v28, %v1761_v14 }
 0x2c1   : > { %1859 = vst.msk [vmem:[#allocation2 + $0xc9] sm:$0xff] %vm1353_vm5, %v1781_v7  ;;  %v1726_v62 = vpop.f32.mrf.mxu0 }
 0x2c2   : > { %v1796_v29 = vmax.f32 %v1762_v43, 0.0  ;;  %v1727_v36 = vadd.f32 %v7510_v28, %v1726_v62 }
 0x2c4   : > { %5104 = vrot.lane.b32.xlu1 %v7583_v33, %s5833_s17  ;;  %1874 = vst.msk [vmem:[#allocation2 + $0x181] sm:$0xff] %vm1353_vm5, %v1796_v29  ;;  %v1782_v31 = vmax.f32 %v1727_v36, 0.0 }
 0x2c6   : > { %5099 = vrot.lane.b32.xlu0 %v5098_v11, %s5833_s17  ;;  %v7853_v27 = vld [vmem:[#allocation2 + $0x170] sm:$0xff]  ;;  %v1923_v54 = vld [vmem:[#allocation2 + $0x178] sm:$0x3]  ;;  %1860 = vst.msk [vmem:[#allocation2 + $0xd9] sm:$0xff] %vm1353_vm5, %v1782_v31 }
 0x2c7   : > { %v2054_v50 = vrot.slane %v7853_v27, 1  ;;  %v2056_v40 = vrot.slane %v1923_v54, 1  ;;  %v2136_v26 = vrot.slane %v1923_v54, 2  ;;  %v2134_v14 = vrot.slane %v7853_v27, 2  ;;  %v1763_v36 = vpop.f32.mrf.mxu3 }
 0x2c8   : > { %v7859_v7 = vld [vmem:[#allocation2 + $0xc8] sm:$0xff]  ;;  %v1902_v25 = vld [vmem:[#allocation2 + $0xd0] sm:$0x3]  ;;  %v2098_v54 = vrot.slane %v7850_v45, 2  ;;  %v1764_v20 = vadd.f32 %v7510_v28, %v1763_v36 }
 0x2c9   : > { %v2055_v11 = vsel %vm364_vm0, %v2053_v52, %v2054_v50  ;;  %v2057_v43 = vsel %vm364_vm0, %v2054_v50, %v2056_v40  ;;  %v2019_v62 = vrot.slane %v7859_v7, 1  ;;  %v2021_v29 = vrot.slane %v1902_v25, 1  ;;  %v1728_v50 = vpop.f32.mrf.mxu0 }
 0x2ca   : > { %v7867_v33 = vpack.i.bf16 %v2057_v43, %v2055_v11  ;;  %v2099_v59 = vrot.slane %v7859_v7, 2  ;;  %v2101_v32 = vrot.slane %v1902_v25, 2  ;;  %v2135_v52 = vsel %vm445_vm1, %v2133_v6, %v2134_v14 }
 0x2cb   : > { %v2020_v61 = vsel %vm364_vm0, %v2018_v17, %v2019_v62  ;;  %v2022_v31 = vsel %vm364_vm0, %v2019_v62, %v2021_v29  ;;  %v2137_v25 = vsel %vm445_vm1, %v2134_v14, %v2136_v26  ;;  %v1797_v43 = vmax.f32 %v1764_v20, 0.0  ;;  %v1924_v20 = vld [vmem:[#allocation2 + $0x180] sm:$0xff] }
 0x2cc   : > { %9426 = vst [vmem:[#allocation13_spill] sm:$0xff] %v7867_v33  ;;  %5089 = vrot.lane.b32.xlu2 %v7867_v33, %s5831_s15  ;;  %5119 = vrot.lane.b32.xlu1 %v7697_v47, %s5833_s17  ;;  %v2100_v40 = vsel %vm445_vm1, %v2098_v54, %v2099_v59  ;;  %v2102_v11 = vsel %vm445_vm1, %v2099_v59, %v2101_v32 }
 0x2cd   : > { %v1729_v17 = vadd.f32 %v7510_v28, %v1728_v50  ;;  %v7885_v6 = vpack.i.bf16 %v2022_v31, %v2020_v61  ;;  %v7887_v62 = vpack.i.bf16 %v2102_v11, %v2100_v40  ;;  %1875 = vst.msk [vmem:[#allocation2 + $0x189] sm:$0xff] %vm1353_vm5, %v1797_v43  ;;  %v7890_v36 = vpack.i.bf16 %v2137_v25, %v2135_v52  ;;  %v7897_v28 = vld [vmem:[#allocation2 + $0xd8] sm:$0xff] }
 0x2ce   : > { %5114 = vrot.lane.b32.xlu0 %v7655_v35, %s5833_s17  ;;  %v2103_v31 = vrot.slane %v7897_v28, 2  ;;  %v2141_v52 = vrot.slane %v1924_v20, 1  ;;  %v2023_v11 = vrot.slane %v7897_v28, 1 }
 0x2cf   : > { %9427 = vst [vmem:[#allocation73_spill] sm:$0xff] %v7885_v6  ;;  %v1783_v29 = vmax.f32 %v1729_v17, 0.0 }
 0x2d0   : > { %9428 = vst [vmem:[#allocation53_spill] sm:$0xff] %v7890_v36 }
 0x2d1   : > { %1861 = vst.msk [vmem:[#allocation2 + $0xe1] sm:$0xff] %vm1353_vm5, %v1783_v29 }
 0x2d4   : > { %5109 = vrot.lane.b32.xlu2 %v7613_v63, %s5833_s17  ;;  %5134 = vrot.lane.b32.xlu1 %v7885_v6, %s5831_s15  ;;  %v1925_v61 = vld [vmem:[#allocation2 + $0x188] sm:$0xff]  ;;  %v1926_v59 = vld [vmem:[#allocation2 + $0x190] sm:$0x3] }
 0x2d5   : > { %v2142_v32 = vrot.slane %v1925_v61, 1  ;;  %v7901_v26 = vpack.i.bf16 %v1925_v61, %v1924_v20  ;;  %v2144_v25 = vrot.slane %v1926_v59, 1  ;;  %v2147_v29 = vrot.slane %v1925_v61, 2 }
 0x2d6   : > { %5129 = vrot.lane.b32.xlu0 %v7789_v0, %s5833_s17  ;;  %v2149_v0 = vrot.slane %v1926_v59, 2  ;;  %v2146_v61 = vrot.slane %v1924_v20, 2  ;;  %v7963_v20 = vpop.permute.xlu2 %5029 }
 0x2d7   : > { %9429 = vst [vmem:[#allocation72_spill] sm:$0xff] %v7901_v26  ;;  %v2143_v63 = vsel %vm364_vm0, %v2141_v52, %v2142_v32 }
 0x2d8   : > { %v7903_v14 = vld [vmem:[#allocation2 + $0xe0] sm:$0xff]  ;;  %v1905_v54 = vld [vmem:[#allocation2 + $0xe8] sm:$0x3] }
 0x2d9   : > { %v2104_v50 = vrot.slane %v7903_v14, 2  ;;  %v2106_v40 = vrot.slane %v1905_v54, 2  ;;  %v2024_v43 = vrot.slane %v7903_v14, 1  ;;  %v2026_v17 = vrot.slane %v1905_v54, 1 }
 0x2db   : > { %v2105_v35 = vsel %vm445_vm1, %v2103_v31, %v2104_v50  ;;  %v2107_v47 = vsel %vm445_vm1, %v2104_v50, %v2106_v40  ;;  %v2025_v6 = vsel %vm364_vm0, %v2023_v11, %v2024_v43  ;;  %v2027_v54 = vsel %vm364_vm0, %v2024_v43, %v2026_v17  ;;  %v5035_v17 = vpop.permute.xlu0 %5034 }
 0x2dc   : > { %5124 = vrot.lane.b32.xlu2 %v7743_v56, %s5833_s17  ;;  %5139 = vrot.lane.b32.xlu1 %v7839_v18, %s5833_s17  ;;  %v7916_v33 = vpack.i.bf16 %v2107_v47, %v2105_v35  ;;  %v7920_v59 = vpack.i.bf16 %v2027_v54, %v2025_v6  ;;  %v2145_v31 = vsel %vm364_vm0, %v2142_v32, %v2144_v25 }
 0x2dd   : > { %v7925_v52 = vpack.i.bf16 %v2145_v31, %v2143_v63  ;;  %v2148_v50 = vsel %vm445_vm1, %v2146_v61, %v2147_v29  ;;  %v2150_v40 = vsel %vm445_vm1, %v2147_v29, %v2149_v0  ;;  %v5188_v63 = vpack.i.bf16 %v7567_v37, %v7554_v16  ;;  %v5040_v31 = vpop.permute.xlu1 %5039 }
 0x2de   : > { %9430 = vst [vmem:[#allocation58_spill] sm:$0xff] %v7920_v59  ;;  %5164 = vrot.lane.b32.xlu0 %v7916_v33, %s5833_s17  ;;  %v7929_v35 = vpack.i.bf16 %v2150_v40, %v2148_v50  ;;  %v5198_v47 = vpack.i.bf16 %v7630_v53, %v7623_v4  ;;  %v5203_v0 = vpack.i.bf16 %v7672_v19, %v7665_v9  ;;  %v7978_v29 = vpop.permute.xlu2 %5044 }
 0x2df   : > { %9431 = vst [vmem:[#allocation65_spill] sm:$0xff] %v7925_v52  ;;  %v5213_v16 = vpack.i.bf16 %v7763_v21, %v7753_v22  ;;  %v5193_v37 = vpack.i.bf16 %v7598_v38, %v7595_v24  ;;  %v5218_v6 = vpack.i.bf16 %v7809_v3, %v7799_v8  ;;  %v5228_v32 = vpack.i.bf16 %v7903_v14, %v7897_v28 }
 0x2e0   : > { %9432 = vst [vmem:[#allocation24_spill] sm:$0xff] %v7929_v35  ;;  %v5208_v11 = vpack.i.bf16 %v7717_v44, %v7707_v39  ;;  %v5233_v25 = vpack.i.bf16 %v7625_v49, %v7620_v46  ;;  %v5243_v43 = vpack.i.bf16 %v7711_v51, %v7704_v10  ;;  %v5223_v54 = vpack.i.bf16 %v7859_v7, %v7850_v45 }
 0x2e1   : > { %v5248_v61 = vpack.i.bf16 %v7757_v48, %v7750_v15  ;;  %v5258_v46 = vpack.i.bf16 %v7853_v27, %v7845_v57  ;;  %v5238_v40 = vpack.i.bf16 %v7667_v60, %v7662_v41 }
 0x2e4   : > { %5149 = vrot.lane.b32.xlu2 %v7887_v62, %s5833_s17  ;;  %5144 = vrot.lane.b32.xlu1 %v7657_v23, %s5833_s17 }
 0x2e6   : > { %5169 = vrot.lane.b32.xlu0 %v7745_v55, %s5833_s17 }
 0x2ec   : > { %5154 = vrot.lane.b32.xlu2 %v7699_v1, %s5833_s17  ;;  %5174 = vrot.lane.b32.xlu1 %v7792_v30, %s5833_s17 }
 0x2ee   : > { %5184 = vrot.lane.b32.xlu0 %v7890_v36, %s5833_s17  ;;  %v5037_v36 = vunpack.i.h.bf16 %v5035_v17 }
 0x2f4   : > { %5159 = vrot.lane.b32.xlu2 %v7920_v59, %s5831_s15  ;;  %5189 = vrot.lane.b32.xlu1 %v5188_v63, %s5835_s19 }
 0x2f6   : > { %5199 = vrot.lane.b32.xlu0 %v5198_v47, %s5835_s19  ;;  %v7989_v49 = vpop.permute.xlu2 %5069 }
 0x2fc   : > { %5179 = vrot.lane.b32.xlu2 %v7841_v12, %s5833_s17  ;;  %5204 = vrot.lane.b32.xlu1 %v5203_v0, %s5835_s19  ;;  %v5036_v12 = vunpack.i.l.bf16 %v5035_v17  ;;  %s5840_s17 = smov 48  }
 0x2fe   : > { %5214 = vrot.lane.b32.xlu0 %v5213_v16, %s5835_s19  ;;  %v7991_v50 = vpop.permute.xlu0 %5049  ;;  %v5253_v16 = vpack.i.bf16 %v7801_v58, %v7796_v42 }
 0x304   : > { %5194 = vrot.lane.b32.xlu2 %v5193_v37, %s5835_s19  ;;  %5219 = vrot.lane.b32.xlu1 %v5218_v6, %s5835_s19 }
 0x306   : > { %5229 = vrot.lane.b32.xlu0 %v5228_v32, %s5835_s19  ;;  %v8003_v0 = vpop.permute.xlu0 %5059 }
 0x307   : > { %v7999_v47 = vpop.permute.xlu2 %5084 }
 0x30c   : > { %5209 = vrot.lane.b32.xlu2 %v5208_v11, %s5835_s19  ;;  %5234 = vrot.lane.b32.xlu1 %v5233_v25, %s5835_s19  ;;  %v5042_v11 = vunpack.i.h.bf16 %v5040_v31  ;;  %v5041_v25 = vunpack.i.l.bf16 %v5040_v31 }
 0x30e   : > { %5244 = vrot.lane.b32.xlu0 %v5243_v43, %s5835_s19  ;;  %v9433_v43 = vld [vmem:[#allocation22_spill] sm:$0xff]  ;;  %v2937_v35 = vsel %vm1353_vm5, %v7598_v38, %v5042_v11  ;;  %v2936_v31 = vsel %vm1353_vm5, %v7595_v24, %v5041_v25  ;;  %v9435_v38 = vld [vmem:[#allocation28_spill] sm:$0xff]  ;;  %v5032_v24 = vunpack.i.h.bf16 %v7963_v20  ;;  %v5031_v11 = vunpack.i.l.bf16 %v7963_v20 }
 0x30f   : > { %v5055_v63 = vpop.permute.xlu1 %5054 }
 0x310   : > { %v5057_v30 = vunpack.i.h.bf16 %v5055_v63 }
 0x314   : > { %5224 = vrot.lane.b32.xlu2 %v5223_v54, %s5835_s19  ;;  %5249 = vrot.lane.b32.xlu1 %v5248_v61, %s5835_s19 }
 0x316   : > { %5259 = vrot.lane.b32.xlu0 %v5258_v46, %s5835_s19  ;;  %v9434_v46 = vld [vmem:[#allocation73_spill] sm:$0xff] }
 0x317   : > { %v8010_v37 = vpop.permute.xlu1 %5064 }
 0x31c   : > { %5239 = vrot.lane.b32.xlu2 %v5238_v40, %s5835_s19  ;;  %5264 = vrot.lane.b32.xlu1 %v7901_v26, %s5835_s19 }
 0x31e   : > { %5274 = vrot.lane.b32.xlu0 %v7609_v5, %s5837_s26  ;;  %v8016_v32 = vpop.permute.xlu0 %5074 }
 0x324   : > { %5254 = vrot.lane.b32.xlu2 %v5253_v16, %s5835_s19  ;;  %5279 = vrot.lane.b32.xlu1 %v7646_v13, %s5837_s26  ;;  %s5842_s19 = smov 64  }
 0x326   : > { %v8012_v6 = vpop.permute.xlu2 %5089  ;;  %5289 = vrot.lane.b32.xlu0 %v7736_v34, %s5837_s26 }
 0x32c   : > { %5294 = vrot.lane.b32.xlu1 %v7781_v2, %s5837_s26  ;;  %5269 = vrot.lane.b32.xlu2 %v9433_v43, %s5837_s26 }
 0x32e   : > { %v5110_v54 = vpop.permute.xlu2 %5109  ;;  %v8022_v61 = vpop.permute.xlu1 %5079  ;;  %5304 = vrot.lane.b32.xlu0 %v9434_v46, %s5837_s26  ;;  %v5056_v46 = vunpack.i.l.bf16 %v5055_v63  ;;  %v5702_v63 = vld [vmem:[#allocation2 + $0x20] sm:$0xff] }
 0x32f   : > { %v5112_v40 = vunpack.i.h.bf16 %v5110_v54  ;;  %v5111_v16 = vunpack.i.l.bf16 %v5110_v54  ;;  %v2935_v34 = vsel %vm1353_vm5, %v5702_v63, %v5037_v36  ;;  %v5704_v63 = vld [vmem:[#allocation2 + $0x8] sm:$0xff] }
 0x330   : > { %v8030_v26 = vpop.permute.xlu0 %5094  ;;  %v2942_v20 = vsel %vm1353_vm5, %v7707_v39, %v5056_v46  ;;  %v5052_v46 = vunpack.i.h.bf16 %v7991_v50 }
 0x331   : > { %v8033_v2 = vsel %vm1419_vm6, %v2936_v31, %v5111_v16  ;;  %v8036_v43 = vsel %vm1419_vm6, %v2937_v35, %v5112_v40  ;;  %v9436_v16 = vld [vmem:[#allocation33_spill] sm:$0xff] }
 0x334   : > { %5309 = vrot.lane.b32.xlu1 %v7920_v59, %s5837_s26  ;;  %5284 = vrot.lane.b32.xlu2 %v9435_v38, %s5837_s26  ;;  %v5703_v59 = vld [vmem:[#allocation2 + $0x18] sm:$0xff]  ;;  %v2943_v38 = vsel %vm1353_vm5, %v7717_v44, %v5057_v30  ;;  %v2933_v44 = vsel %vm1353_vm5, %v5704_v63, %v5032_v24  ;;  %v5705_v30 = vld [vmem:[#allocation2] sm:$0xff]  ;;  %v5047_v24 = vunpack.i.h.bf16 %v7978_v29 }
 0x335   : > { %v2934_v13 = vsel %vm1353_vm5, %v5703_v59, %v5036_v12  ;;  %v2932_v39 = vsel %vm1353_vm5, %v5705_v30, %v5031_v11  ;;  %v5046_v11 = vunpack.i.l.bf16 %v7978_v29 }
 0x336   : > { %v5125_v25 = vpop.permute.xlu2 %5124  ;;  %v5105_v54 = vpop.permute.xlu1 %5104  ;;  %5319 = vrot.lane.b32.xlu0 %v9436_v16, %s5837_s26 }
 0x337   : > { %v5127_v35 = vunpack.i.h.bf16 %v5125_v25  ;;  %v5126_v40 = vunpack.i.l.bf16 %v5125_v25  ;;  %v5107_v17 = vunpack.i.h.bf16 %v5105_v54  ;;  %v5106_v31 = vunpack.i.l.bf16 %v5105_v54 }
 0x338   : > { %v5100_v55 = vpop.permute.xlu0 %5099 }
 0x339   : > { %v8053_v5 = vsel %vm1419_vm6, %v2942_v20, %v5126_v40  ;;  %v8056_v25 = vsel %vm1419_vm6, %v2943_v38, %v5127_v35  ;;  %v8059_v54 = vsel %vm1419_vm6, %v2934_v13, %v5106_v31  ;;  %v8062_v36 = vsel %vm1419_vm6, %v2935_v34, %v5107_v17  ;;  %v9437_v34 = vld [vmem:[#allocation15_spill] sm:$0xff] }
 0x33a   : > { %v5102_v12 = vunpack.i.h.bf16 %v5100_v55  ;;  %v5101_v59 = vunpack.i.l.bf16 %v5100_v55  ;;  %v5051_v40 = vunpack.i.l.bf16 %v7991_v50  ;;  %v9438_v55 = vld [vmem:[#allocation23_spill] sm:$0xff]  ;;  %v9439_v50 = vld [vmem:[#allocation38_spill] sm:$0xff] }
 0x33c   : > { %v8069_v38 = vsel %vm1419_vm6, %v2933_v44, %v5102_v12  ;;  %v8072_v13 = vsel %vm1419_vm6, %v2932_v39, %v5101_v59  ;;  %5324 = vrot.lane.b32.xlu1 %v9437_v34, %s5837_s26  ;;  %5299 = vrot.lane.b32.xlu2 %v9438_v55, %s5837_s26  ;;  %v2941_v12 = vsel %vm1353_vm5, %v7672_v19, %v5052_v46  ;;  %v5067_v46 = vunpack.i.h.bf16 %v8010_v37 }
 0x33d   : > { %v2940_v59 = vsel %vm1353_vm5, %v7665_v9, %v5051_v40  ;;  %v2939_v55 = vsel %vm1353_vm5, %v7630_v53, %v5047_v24  ;;  %v5066_v40 = vunpack.i.l.bf16 %v8010_v37  ;;  %v5087_v53 = vunpack.i.h.bf16 %v7999_v47 }
 0x33e   : > { %v5150_v35 = vpop.permute.xlu2 %5149  ;;  %v5120_v17 = vpop.permute.xlu1 %5119  ;;  %5334 = vrot.lane.b32.xlu0 %v9439_v50, %s5837_s26 }
 0x33f   : > { %v5122_v31 = vunpack.i.h.bf16 %v5120_v17  ;;  %v5121_v20 = vunpack.i.l.bf16 %v5120_v17  ;;  %v2938_v17 = vsel %vm1353_vm5, %v7623_v4, %v5046_v11  ;;  %v5086_v4 = vunpack.i.l.bf16 %v7999_v47  ;;  %v9442_v11 = vld [vmem:[#allocation25_spill] sm:$0xff] }
 0x340   : > { %v5115_v63 = vpop.permute.xlu0 %5114 }
 0x341   : > { %v8087_v44 = vsel %vm1419_vm6, %v2940_v59, %v5121_v20  ;;  %v8090_v30 = vsel %vm1419_vm6, %v2941_v12, %v5122_v31  ;;  %v5117_v29 = vunpack.i.h.bf16 %v5115_v63  ;;  %v5116_v39 = vunpack.i.l.bf16 %v5115_v63  ;;  %v9440_v31 = vld [vmem:[#allocation13_spill] sm:$0xff]  ;;  %v9441_v20 = vld [vmem:[#allocation16_spill] sm:$0xff] }
 0x343   : > { %v8097_v19 = vsel %vm1419_vm6, %v2939_v55, %v5117_v29  ;;  %v8100_v9 = vsel %vm1419_vm6, %v2938_v17, %v5116_v39  ;;  %v2955_v29 = vsel %vm1353_vm5, %v7667_v60, %v5067_v46  ;;  %v2954_v39 = vsel %vm1353_vm5, %v7662_v41, %v5066_v40 }
 0x344   : > { %5339 = vrot.lane.b32.xlu1 %v9440_v31, %s5837_s26  ;;  %5314 = vrot.lane.b32.xlu2 %v9441_v20, %s5837_s26  ;;  %v5152_v17 = vunpack.i.h.bf16 %v5150_v35  ;;  %v5151_v31 = vunpack.i.l.bf16 %v5150_v35  ;;  %v2945_v35 = vsel %vm1353_vm5, %v7763_v21, %v5087_v53  ;;  %v2944_v40 = vsel %vm1353_vm5, %v7753_v22, %v5086_v4  ;;  %v9445_v22 = vld [vmem:[#allocation21_spill] sm:$0xff] }
 0x346   : > { %v5155_v24 = vpop.permute.xlu2 %5154  ;;  %v5135_v55 = vpop.permute.xlu1 %5134  ;;  %5349 = vrot.lane.b32.xlu0 %v9442_v11, %s5839_s16 }
 0x347   : > { %v5157_v12 = vunpack.i.h.bf16 %v5155_v24  ;;  %v5156_v59 = vunpack.i.l.bf16 %v5155_v24  ;;  %v5137_v63 = vunpack.i.h.bf16 %v5135_v55  ;;  %v5136_v37 = vunpack.i.l.bf16 %v5135_v55 }
 0x348   : > { %v5130_v50 = vpop.permute.xlu0 %5129 }
 0x349   : > { %v8117_v47 = vsel %vm1419_vm6, %v2954_v39, %v5156_v59  ;;  %v8120_v34 = vsel %vm1419_vm6, %v2955_v29, %v5157_v12  ;;  %v2949_v24 = vsel %vm1353_vm5, %v7859_v7, %v5137_v63  ;;  %v2948_v55 = vsel %vm1353_vm5, %v7850_v45, %v5136_v37  ;;  %v9444_v59 = vld [vmem:[#allocation59_spill] sm:$0xff] }
 0x34a   : > { %v5132_v11 = vunpack.i.h.bf16 %v5130_v50  ;;  %v5131_v60 = vunpack.i.l.bf16 %v5130_v50  ;;  %v8127_v46 = vsel %vm1419_vm6, %v2948_v55, %v5151_v31  ;;  %v8130_v41 = vsel %vm1419_vm6, %v2949_v24, %v5152_v17  ;;  %v9443_v31 = vld [vmem:[#allocation29_spill] sm:$0xff] }
 0x34b   : > { %v5097_v12 = vunpack.i.h.bf16 %v8030_v26  ;;  %v5096_v7 = vunpack.i.l.bf16 %v8030_v26 }
 0x34c   : > { %v8139_v45 = vsel %vm1419_vm6, %v2945_v35, %v5132_v11  ;;  %v8142_v50 = vsel %vm1419_vm6, %v2944_v40, %v5131_v60  ;;  %5354 = vrot.lane.b32.xlu1 %v9443_v31, %s5839_s16  ;;  %5329 = vrot.lane.b32.xlu2 %v9444_v59, %s5837_s26 }
 0x34d   : > { %v2947_v29 = vsel %vm1353_vm5, %v7809_v3, %v5097_v12  ;;  %v2946_v39 = vsel %vm1353_vm5, %v7799_v8, %v5096_v7  ;;  %v5062_v3 = vunpack.i.h.bf16 %v8003_v0  ;;  %v5061_v12 = vunpack.i.l.bf16 %v8003_v0 }
 0x34e   : > { %v5160_v21 = vpop.permute.xlu2 %5159  ;;  %v5140_v53 = vpop.permute.xlu1 %5139  ;;  %5364 = vrot.lane.b32.xlu0 %v9445_v22, %s5839_s16  ;;  %v5082_v8 = vunpack.i.h.bf16 %v8022_v61  ;;  %v5081_v7 = vunpack.i.l.bf16 %v8022_v61  ;;  %v5071_v0 = vunpack.i.l.bf16 %v7989_v49 }
 0x34f   : > { %v5162_v4 = vunpack.i.h.bf16 %v5160_v21  ;;  %v5161_v63 = vunpack.i.l.bf16 %v5160_v21  ;;  %v5142_v26 = vunpack.i.h.bf16 %v5140_v53  ;;  %v5141_v37 = vunpack.i.l.bf16 %v5140_v53 }
 0x350   : > { %v5165_v17 = vpop.permute.xlu0 %5164  ;;  %v5072_v21 = vunpack.i.h.bf16 %v7989_v49  ;;  %v2960_v49 = vsel %vm1353_vm5, %v7796_v42, %v5081_v7  ;;  %v2956_v42 = vsel %vm1353_vm5, %v7704_v10, %v5071_v0  ;;  %v5076_v7 = vunpack.i.l.bf16 %v8016_v32 }
 0x351   : > { %v2951_v24 = vsel %vm1353_vm5, %v7903_v14, %v5162_v4  ;;  %v2950_v55 = vsel %vm1353_vm5, %v7897_v28, %v5161_v63  ;;  %v8159_v11 = vsel %vm1419_vm6, %v2946_v39, %v5141_v37  ;;  %v8162_v60 = vsel %vm1419_vm6, %v2947_v29, %v5142_v26  ;;  %v5706_v29 = vld [vmem:[#allocation2 + $0xf8] sm:$0xff] }
 0x352   : > { %v5167_v35 = vunpack.i.h.bf16 %v5165_v17  ;;  %v5166_v40 = vunpack.i.l.bf16 %v5165_v17  ;;  %v2953_v39 = vsel %vm1353_vm5, %v5706_v29, %v5062_v3  ;;  %v5707_v17 = vld [vmem:[#allocation2 + $0xf0] sm:$0xff]  ;;  %v5091_v10 = vunpack.i.l.bf16 %v8012_v6 }
 0x354   : > { %v8169_v14 = vsel %vm1419_vm6, %v2951_v24, %v5167_v35  ;;  %v8172_v28 = vsel %vm1419_vm6, %v2950_v55, %v5166_v40  ;;  %5369 = vrot.lane.b32.xlu1 %v7743_v56, %s5839_s16  ;;  %5344 = vrot.lane.b32.xlu2 %v7925_v52, %s5837_s26  ;;  %v2952_v24 = vsel %vm1353_vm5, %v5707_v17, %v5061_v12 }
 0x355   : > { %v2961_v55 = vsel %vm1353_vm5, %v7801_v58, %v5082_v8  ;;  %v2957_v58 = vsel %vm1353_vm5, %v7711_v51, %v5072_v21  ;;  %v5077_v8 = vunpack.i.h.bf16 %v8016_v32  ;;  %v5092_v51 = vunpack.i.h.bf16 %v8012_v6 }
 0x356   : > { %v5180_v53 = vpop.permute.xlu2 %5179  ;;  %v5145_v4 = vpop.permute.xlu1 %5144  ;;  %5379 = vrot.lane.b32.xlu0 %v7839_v18, %s5839_s16 }
 0x357   : > { %v5182_v61 = vunpack.i.h.bf16 %v5180_v53  ;;  %v5181_v63 = vunpack.i.l.bf16 %v5180_v53  ;;  %v5147_v26 = vunpack.i.h.bf16 %v5145_v4  ;;  %v5146_v37 = vunpack.i.l.bf16 %v5145_v4 }
 0x358   : > { %v5170_v35 = vpop.permute.xlu0 %5169 }
 0x359   : > { %v8189_v40 = vsel %vm1419_vm6, %v2960_v49, %v5181_v63  ;;  %v8192_v53 = vsel %vm1419_vm6, %v2961_v55, %v5182_v61  ;;  %v8195_v4 = vsel %vm1419_vm6, %v2952_v24, %v5146_v37  ;;  %v8198_v3 = vsel %vm1419_vm6, %v2953_v39, %v5147_v26  ;;  %v9446_v26 = vld [vmem:[#allocation19_spill] sm:$0xff] }
 0x35a   : > { %v5172_v12 = vunpack.i.h.bf16 %v5170_v35  ;;  %v5171_v52 = vunpack.i.l.bf16 %v5170_v35  ;;  %v2959_v24 = vsel %vm1353_vm5, %v7757_v48, %v5077_v8  ;;  %v2958_v55 = vsel %vm1353_vm5, %v7750_v15, %v5076_v7  ;;  %v9447_v7 = vld [vmem:[#allocation12_spill] sm:$0xff] }
 0x35b   : > { %v2963_v15 = vsel %vm1353_vm5, %v7853_v27, %v5092_v51  ;;  %v2962_v8 = vsel %vm1353_vm5, %v7845_v57, %v5091_v10  ;;  %vm3968_vm5 = vcmask 1042434  }
 0x35c   : > { %v8207_v61 = vsel %vm1419_vm6, %v2957_v58, %v5172_v12  ;;  %v8210_v63 = vsel %vm1419_vm6, %v2956_v42, %v5171_v52  ;;  %5384 = vrot.lane.b32.xlu1 %v7887_v62, %s5839_s16  ;;  %5359 = vrot.lane.b32.xlu2 %v9446_v26, %s5839_s16 }
 0x35e   : > { %v5195_v21 = vpop.permute.xlu2 %5194  ;;  %v5175_v0 = vpop.permute.xlu1 %5174  ;;  %5394 = vrot.lane.b32.xlu0 %v7657_v23, %s5839_s16 }
 0x35f   : > { %v5197_v32 = vunpack.i.h.bf16 %v5195_v21  ;;  %v5196_v37 = vunpack.i.l.bf16 %v5195_v21  ;;  %v5177_v39 = vunpack.i.h.bf16 %v5175_v0  ;;  %v5176_v52 = vunpack.i.l.bf16 %v5175_v0 }
 0x360   : > { %v5185_v49 = vpop.permute.xlu0 %5184  ;;  %v5408_v21 = vpack.i.bf16 %v5706_v29, %v5707_v17 }
 0x361   : > { %v8226_v35 = vsel %vm1485_vm7, %v8059_v54, %v5196_v37  ;;  %v8230_v6 = vsel %vm1485_vm7, %v8062_v36, %v5197_v32  ;;  %v8233_v12 = vsel %vm1419_vm6, %v2958_v55, %v5176_v52  ;;  %v8236_v58 = vsel %vm1419_vm6, %v2959_v24, %v5177_v39 }
 0x362   : > { %v5187_v42 = vunpack.i.h.bf16 %v5185_v49  ;;  %v5186_v48 = vunpack.i.l.bf16 %v5185_v49 }
 0x364   : > { %v8243_v54 = vsel %vm1419_vm6, %v2963_v15, %v5187_v42  ;;  %v8246_v36 = vsel %vm1419_vm6, %v2962_v8, %v5186_v48  ;;  %5399 = vrot.lane.b32.xlu1 %v7699_v1, %s5839_s16  ;;  %5374 = vrot.lane.b32.xlu2 %v9447_v7, %s5839_s16  ;;  %vm3970_vm6 = vcmask 1043459  }
 0x366   : > { %v5210_v0 = vpop.permute.xlu2 %5209  ;;  %v5190_v32 = vpop.permute.xlu1 %5189  ;;  %5409 = vrot.lane.b32.xlu0 %v5408_v21, %s5840_s17 }
 0x367   : > { %v5212_v27 = vunpack.i.h.bf16 %v5210_v0  ;;  %v5211_v57 = vunpack.i.l.bf16 %v5210_v0  ;;  %v5192_v51 = vunpack.i.h.bf16 %v5190_v32  ;;  %v5191_v10 = vunpack.i.l.bf16 %v5190_v32 }
 0x368   : > { %v5200_v37 = vpop.permute.xlu0 %5199 }
 0x369   : > { %v8255_v39 = vsel %vm1485_vm7, %v8087_v44, %v5211_v57  ;;  %v8259_v52 = vsel %vm1485_vm7, %v8090_v30, %v5212_v27  ;;  %v8263_v29 = vsel %vm1485_vm7, %v8072_v13, %v5191_v10  ;;  %v8267_v17 = vsel %vm1485_vm7, %v8069_v38, %v5192_v51  ;;  %v5708_v13 = vld [vmem:[#allocation2 + $0x30] sm:$0xff]  ;;  %v5709_v38 = vld [vmem:[#allocation2 + $0x38] sm:$0xff] }
 0x36a   : > { %v5202_v24 = vunpack.i.h.bf16 %v5200_v37  ;;  %v5201_v55 = vunpack.i.l.bf16 %v5200_v37  ;;  %v5423_v30 = vpack.i.bf16 %v5709_v38, %v5708_v13  ;;  %v5710_v37 = vld [vmem:[#allocation2 + $0x108] sm:$0xff] }
 0x36c   : > { %v8271_v49 = vsel %vm1485_vm7, %v8036_v43, %v5202_v24  ;;  %v8275_v44 = vsel %vm1485_vm7, %v8033_v2, %v5201_v55  ;;  %5414 = vrot.lane.b32.xlu1 %v9441_v20, %s5841_s18  ;;  %5389 = vrot.lane.b32.xlu2 %v7916_v33, %s5839_s16  ;;  %v5711_v24 = vld [vmem:[#allocation2 + $0x110] sm:$0xff] }
 0x36e   : > { %v5225_v42 = vpop.permute.xlu2 %5224  ;;  %v5205_v48 = vpop.permute.xlu1 %5204  ;;  %5424 = vrot.lane.b32.xlu0 %v5423_v30, %s5840_s17 }
 0x36f   : > { %v5227_v43 = vunpack.i.h.bf16 %v5225_v42  ;;  %v5226_v15 = vunpack.i.l.bf16 %v5225_v42  ;;  %v5207_v8 = vunpack.i.h.bf16 %v5205_v48  ;;  %v5206_v21 = vunpack.i.l.bf16 %v5205_v48 }
 0x370   : > { %v5215_v2 = vpop.permute.xlu0 %5214 }
 0x371   : > { %v8284_v0 = vsel %vm1485_vm7, %v8159_v11, %v5226_v15  ;;  %v8288_v20 = vsel %vm1485_vm7, %v8162_v60, %v5227_v43  ;;  %v8292_v32 = vsel %vm1485_vm7, %v8100_v9, %v5206_v21  ;;  %v8296_v27 = vsel %vm1485_vm7, %v8097_v19, %v5207_v8  ;;  %v9448_v60 = vld [vmem:[#allocation11_spill] sm:$0xff]  ;;  %v9449_v9 = vld [vmem:[#allocation32_spill] sm:$0xff] }
 0x372   : > { %v5217_v57 = vunpack.i.h.bf16 %v5215_v2  ;;  %v5216_v51 = vunpack.i.l.bf16 %v5215_v2  ;;  %v5438_v19 = vpack.i.bf16 %v5711_v24, %v5710_v37 }
 0x374   : > { %v8300_v10 = vsel %vm1485_vm7, %v8056_v25, %v5217_v57  ;;  %v8304_v11 = vsel %vm1485_vm7, %v8053_v5, %v5216_v51  ;;  %5429 = vrot.lane.b32.xlu1 %v9448_v60, %s5841_s18  ;;  %5404 = vrot.lane.b32.xlu2 %v9449_v9, %s5839_s16 }
 0x376   : > { %v5240_v55 = vpop.permute.xlu2 %5239  ;;  %v5220_v13 = vpop.permute.xlu1 %5219  ;;  %5439 = vrot.lane.b32.xlu0 %v5438_v19, %s5840_s17 }
 0x377   : > { %v5242_v38 = vunpack.i.h.bf16 %v5240_v55  ;;  %v5241_v25 = vunpack.i.l.bf16 %v5240_v55  ;;  %v5222_v30 = vunpack.i.h.bf16 %v5220_v13  ;;  %v5221_v42 = vunpack.i.l.bf16 %v5220_v13 }
 0x378   : > { %v5230_v48 = vpop.permute.xlu0 %5229 }
 0x379   : > { %v8313_v5 = vsel %vm1485_vm7, %v8195_v4, %v5241_v25  ;;  %v8317_v43 = vsel %vm1485_vm7, %v8198_v3, %v5242_v38  ;;  %v8321_v15 = vsel %vm1485_vm7, %v8142_v50, %v5221_v42  ;;  %v8325_v8 = vsel %vm1485_vm7, %v8139_v45, %v5222_v30  ;;  %v5712_v50 = vld [vmem:[#allocation2 + $0x48] sm:$0xff]  ;;  %v5713_v45 = vld [vmem:[#allocation2 + $0x50] sm:$0xff] }
 0x37a   : > { %v5232_v21 = vunpack.i.h.bf16 %v5230_v48  ;;  %v5231_v2 = vunpack.i.l.bf16 %v5230_v48  ;;  %v5453_v3 = vpack.i.bf16 %v5713_v45, %v5712_v50  ;;  %v5715_v42 = vld [vmem:[#allocation2 + $0x128] sm:$0xff] }
 0x37c   : > { %v8329_v57 = vsel %vm1485_vm7, %v8130_v41, %v5232_v21  ;;  %v8333_v4 = vsel %vm1485_vm7, %v8127_v46, %v5231_v2  ;;  %5444 = vrot.lane.b32.xlu1 %v9436_v16, %s5841_s18  ;;  %5419 = vrot.lane.b32.xlu2 %v7657_v23, %s5842_s19 }
 0x37e   : > { %v5255_v51 = vpop.permute.xlu2 %5254  ;;  %v5235_v60 = vpop.permute.xlu1 %5234  ;;  %5454 = vrot.lane.b32.xlu0 %v5453_v3, %s5840_s17 }
 0x37f   : > { %v5257_v41 = vunpack.i.h.bf16 %v5255_v51  ;;  %v5256_v37 = vunpack.i.l.bf16 %v5255_v51  ;;  %v5237_v24 = vunpack.i.h.bf16 %v5235_v60  ;;  %v5236_v19 = vunpack.i.l.bf16 %v5235_v60 }
 0x380   : > { %v5245_v46 = vpop.permute.xlu0 %5244 }
 0x381   : > { %v8342_v55 = vsel %vm1485_vm7, %v8233_v12, %v5256_v37  ;;  %v8346_v16 = vsel %vm1485_vm7, %v8236_v58, %v5257_v41  ;;  %v8350_v23 = vsel %vm1485_vm7, %v8172_v28, %v5236_v19  ;;  %v8354_v13 = vsel %vm1485_vm7, %v8169_v14, %v5237_v24  ;;  %v9450_v58 = vld [vmem:[#allocation34_spill] sm:$0xff]  ;;  %v5714_v28 = vld [vmem:[#allocation2 + $0x120] sm:$0xff]  ;;  %v5717_v19 = vld [vmem:[#allocation2 + $0x68] sm:$0xff] }
 0x382   : > { %v5247_v38 = vunpack.i.h.bf16 %v5245_v46  ;;  %v5246_v25 = vunpack.i.l.bf16 %v5245_v46  ;;  %v5468_v14 = vpack.i.bf16 %v5715_v42, %v5714_v28 }
 0x384   : > { %v8358_v30 = vsel %vm1485_vm7, %v8120_v34, %v5247_v38  ;;  %v8362_v12 = vsel %vm1485_vm7, %v8117_v47, %v5246_v25  ;;  %5459 = vrot.lane.b32.xlu1 %v9450_v58, %s5841_s18  ;;  %5434 = vrot.lane.b32.xlu2 %v9443_v31, %s5842_s19 }
 0x386   : > { %v5250_v48 = vpop.permute.xlu1 %5249  ;;  %v5270_v21 = vpop.permute.xlu2 %5269  ;;  %5469 = vrot.lane.b32.xlu0 %v5468_v14, %s5840_s17 }
 0x387   : > { %v5252_v2 = vunpack.i.h.bf16 %v5250_v48  ;;  %v5251_v34 = vunpack.i.l.bf16 %v5250_v48  ;;  %v5272_v50 = vunpack.i.h.bf16 %v5270_v21  ;;  %v5271_v45 = vunpack.i.l.bf16 %v5270_v21 }
 0x388   : > { %v5260_v3 = vpop.permute.xlu0 %5259 }
 0x389   : > { %v8371_v47 = vsel %vm1485_vm7, %v8210_v63, %v5251_v34  ;;  %v8375_v51 = vsel %vm1485_vm7, %v8207_v61, %v5252_v2  ;;  %v8379_v31 = vsel %vm1551_vm10, %v8263_v29, %v5271_v45  ;;  %v8383_v60 = vsel %vm1551_vm10, %v8267_v17, %v5272_v50  ;;  %v9451_v61 = vld [vmem:[#allocation15_spill] sm:$0xff] }
 0x38a   : > { %v5262_v41 = vunpack.i.h.bf16 %v5260_v3  ;;  %v5261_v37 = vunpack.i.l.bf16 %v5260_v3  ;;  %v5716_v29 = vld [vmem:[#allocation2 + $0x60] sm:$0xff] }
 0x38b   : > { %v5483_v17 = vpack.i.bf16 %v5717_v19, %v5716_v29  ;;  %v5719_v50 = vld [vmem:[#allocation2 + $0x140] sm:$0xff] }
 0x38c   : > { %v8387_v24 = vsel %vm1485_vm7, %v8192_v53, %v5262_v41  ;;  %v8391_v63 = vsel %vm1485_vm7, %v8189_v40, %v5261_v37  ;;  %5474 = vrot.lane.b32.xlu1 %v9451_v61, %s5841_s18  ;;  %5449 = vrot.lane.b32.xlu2 %v7699_v1, %s5842_s19 }
 0x38e   : > { %v5265_v46 = vpop.permute.xlu1 %5264  ;;  %v5285_v38 = vpop.permute.xlu2 %5284  ;;  %5484 = vrot.lane.b32.xlu0 %v5483_v17, %s5840_s17 }
 0x38f   : > { %v5267_v25 = vunpack.i.h.bf16 %v5265_v46  ;;  %v5266_v53 = vunpack.i.l.bf16 %v5265_v46  ;;  %v5287_v58 = vunpack.i.h.bf16 %v5285_v38  ;;  %v5286_v28 = vunpack.i.l.bf16 %v5285_v38 }
 0x390   : > { %v5275_v42 = vpop.permute.xlu0 %5274 }
 0x391   : > { %v8400_v40 = vsel %vm1485_vm7, %v8246_v36, %v5266_v53  ;;  %v8404_v14 = vsel %vm1485_vm7, %v8243_v54, %v5267_v25  ;;  %v8408_v1 = vsel %vm1551_vm10, %v8292_v32, %v5286_v28  ;;  %v8412_v48 = vsel %vm1551_vm10, %v8296_v27, %v5287_v58  ;;  %v9452_v54 = vld [vmem:[#allocation28_spill] sm:$0xff]  ;;  %v5718_v32 = vld [vmem:[#allocation2 + $0x138] sm:$0xff] }
 0x392   : > { %v5277_v21 = vunpack.i.h.bf16 %v5275_v42  ;;  %v5276_v2 = vunpack.i.l.bf16 %v5275_v42  ;;  %v5498_v27 = vpack.i.bf16 %v5719_v50, %v5718_v32  ;;  %vm3972_vm7 = vcmask 1044484  }
 0x394   : > { %v8416_v34 = vsel %vm1551_vm10, %v8226_v35, %v5276_v2  ;;  %v8420_v36 = vsel %vm1551_vm10, %v8230_v6, %v5277_v21  ;;  %5489 = vrot.lane.b32.xlu1 %v9452_v54, %s5841_s18  ;;  %5464 = vrot.lane.b32.xlu2 %v9446_v26, %s5842_s19 }
 0x396   : > { %v5280_v45 = vpop.permute.xlu1 %5279  ;;  %v5300_v3 = vpop.permute.xlu2 %5299  ;;  %5499 = vrot.lane.b32.xlu0 %v5498_v27, %s5840_s17 }
 0x397   : > { %v5282_v41 = vunpack.i.h.bf16 %v5280_v45  ;;  %v5281_v35 = vunpack.i.l.bf16 %v5280_v45  ;;  %v5302_v37 = vunpack.i.h.bf16 %v5300_v3  ;;  %v5301_v61 = vunpack.i.l.bf16 %v5300_v3  ;;  %v9454_v45 = vld [vmem:[#allocation27_spill] sm:$0xff] }
 0x398   : > { %v5290_v29 = vpop.permute.xlu0 %5289 }
 0x399   : > { %v8429_v6 = vsel %vm1551_vm10, %v8275_v44, %v5281_v35  ;;  %v8433_v19 = vsel %vm1551_vm10, %v8271_v49, %v5282_v41  ;;  %v8437_v26 = vsel %vm1551_vm10, %v8321_v15, %v5301_v61  ;;  %v8441_v17 = vsel %vm1551_vm10, %v8325_v8, %v5302_v37  ;;  %v5720_v49 = vld [vmem:[#allocation2 + $0x78] sm:$0xff]  ;;  %v5721_v15 = vld [vmem:[#allocation2 + $0x80] sm:$0xff] }
 0x39a   : > { %v5292_v46 = vunpack.i.h.bf16 %v5290_v29  ;;  %v5291_v38 = vunpack.i.l.bf16 %v5290_v29  ;;  %v5513_v8 = vpack.i.bf16 %v5721_v15, %v5720_v49  ;;  %v5723_v29 = vld [vmem:[#allocation2 + $0x158] sm:$0xff]  ;;  %v9455_v15 = vld [vmem:[#allocation41_spill] sm:$0xff] }
 0x39c   : > { %v8445_v25 = vsel %vm1551_vm10, %v8255_v39, %v5291_v38  ;;  %v8449_v44 = vsel %vm1551_vm10, %v8259_v52, %v5292_v46  ;;  %5504 = vrot.lane.b32.xlu1 %v9444_v59, %s5841_s18  ;;  %5479 = vrot.lane.b32.xlu2 %v9449_v9, %s5842_s19 }
 0x39e   : > { %v5295_v53 = vpop.permute.xlu1 %5294  ;;  %v5315_v58 = vpop.permute.xlu2 %5314  ;;  %5514 = vrot.lane.b32.xlu0 %v5513_v8, %s5840_s17 }
 0x39f   : > { %v5297_v28 = vunpack.i.h.bf16 %v5295_v53  ;;  %v5296_v39 = vunpack.i.l.bf16 %v5295_v53  ;;  %v5317_v42 = vunpack.i.h.bf16 %v5315_v58  ;;  %v5316_v21 = vunpack.i.l.bf16 %v5315_v58 }
 0x3a0   : > { %v5305_v2 = vpop.permute.xlu0 %5304 }
 0x3a1   : > { %v8458_v52 = vsel %vm1551_vm10, %v8304_v11, %v5296_v39  ;;  %v8462_v59 = vsel %vm1551_vm10, %v8300_v10, %v5297_v28  ;;  %v8466_v9 = vsel %vm1551_vm10, %v8350_v23, %v5316_v21  ;;  %v8470_v54 = vsel %vm1551_vm10, %v8354_v13, %v5317_v42  ;;  %v9453_v10 = vld [vmem:[#allocation14_spill] sm:$0xff] }
 0x3a2   : > { %v5307_v32 = vunpack.i.h.bf16 %v5305_v2  ;;  %v5306_v50 = vunpack.i.l.bf16 %v5305_v2 }
 0x3a4   : > { %v8474_v27 = vsel %vm1551_vm10, %v8284_v0, %v5306_v50  ;;  %v8478_v11 = vsel %vm1551_vm10, %v8288_v20, %v5307_v32  ;;  %5519 = vrot.lane.b32.xlu1 %v9453_v10, %s5841_s18  ;;  %5494 = vrot.lane.b32.xlu2 %v9445_v22, %s5842_s19  ;;  %v5722_v22 = vld [vmem:[#allocation2 + $0x150] sm:$0xff]  ;;  %v5725_v10 = vld [vmem:[#allocation2 + $0x98] sm:$0xff] }
 0x3a5   : > { %v5533_v46 = vpack.i.bf16 %v5723_v29, %v5722_v22  ;;  %v5724_v50 = vld [vmem:[#allocation2 + $0x90] sm:$0xff] }
 0x3a6   : > { %v8484_v23 = vpop.permute.xlu1 %5309  ;;  %v5330_v13 = vpop.permute.xlu2 %5329  ;;  %5529 = vrot.lane.b32.xlu0 %v9454_v45, %s5839_s16 }
 0x3a7   : > { %v5332_v3 = vunpack.i.h.bf16 %v5330_v13  ;;  %v5331_v41 = vunpack.i.l.bf16 %v5330_v13  ;;  %v5548_v13 = vpack.i.bf16 %v5725_v10, %v5724_v50  ;;  %v9458_v10 = vld [vmem:[#allocation53_spill] sm:$0xff] }
 0x3a8   : > { %v5320_v0 = vpop.permute.xlu0 %5319 }
 0x3a9   : > { %v8490_v35 = vsel %vm1551_vm10, %v8371_v47, %v5331_v41  ;;  %v8494_v20 = vsel %vm1551_vm10, %v8375_v51, %v5332_v3  ;;  %v5322_v37 = vunpack.i.h.bf16 %v5320_v0  ;;  %v5321_v61 = vunpack.i.l.bf16 %v5320_v0 }
 0x3ab   : > { %v8498_v38 = vsel %vm1551_vm10, %v8313_v5, %v5321_v61  ;;  %v8502_v49 = vsel %vm1551_vm10, %v8317_v43, %v5322_v37 }
 0x3ac   : > { %5534 = vrot.lane.b32.xlu1 %v5533_v46, %s5840_s17  ;;  %5509 = vrot.lane.b32.xlu2 %v9454_v45, %s5842_s19 }
 0x3ae   : > { %v5325_v47 = vpop.permute.xlu1 %5324  ;;  %v5345_v51 = vpop.permute.xlu2 %5344  ;;  %5544 = vrot.lane.b32.xlu0 %v9455_v15, %s5842_s19 }
 0x3af   : > { %v5327_v8 = vunpack.i.h.bf16 %v5325_v47  ;;  %v5326_v53 = vunpack.i.l.bf16 %v5325_v47  ;;  %v5347_v58 = vunpack.i.h.bf16 %v5345_v51  ;;  %v5346_v28 = vunpack.i.l.bf16 %v5345_v51  ;;  %v4318_v47 = vld [vmem:[%s9109_s3 + $0x18] sm:$0xff]  ;;  %v9457_v51 = vld [vmem:[#allocation13_spill] sm:$0xff] }
 0x3b0   : > { %v5335_v5 = vpop.permute.xlu0 %5334 }
 0x3b1   : > { %v8511_v39 = vsel %vm1551_vm10, %v8362_v12, %v5326_v53  ;;  %v8515_v43 = vsel %vm1551_vm10, %v8358_v30, %v5327_v8  ;;  %v8519_v42 = vsel %vm1551_vm10, %v8400_v40, %v5346_v28  ;;  %v8523_v21 = vsel %vm1551_vm10, %v8404_v14, %v5347_v58  ;;  %v3216_v12 = vld [vmem:[%s9109_s3 + $0x20] sm:$0xf] }
 0x3b2   : > { %v5337_v2 = vunpack.i.h.bf16 %v5335_v5  ;;  %v5336_v32 = vunpack.i.l.bf16 %v5335_v5  ;;  %v3238_v14 = vunpack.c.l.b16 %v3216_v12  ;;  %v4316_v5 = vld [vmem:[%s9109_s3 + $0x8] sm:$0xff] }
 0x3b4   : > { %v8530_v30 = vsel %vm1551_vm10, %v8342_v55, %v5336_v32  ;;  %v8534_v40 = vsel %vm1551_vm10, %v8346_v16, %v5337_v2  ;;  %5549 = vrot.lane.b32.xlu1 %v5548_v13, %s5840_s17  ;;  %5524 = vrot.lane.b32.xlu2 %v7743_v56, %s5842_s19  ;;  %v3243_v41 = vpack.c.b16 %v3238_v14, %v3238_v14  ;;  %v4315_v13 = vld [vmem:[%s9109_s3] sm:$0xff] }
 0x3b6   : > { %v5340_v45 = vpop.permute.xlu1 %5339  ;;  %v5360_v3 = vpop.permute.xlu2 %5359  ;;  %5559 = vrot.lane.b32.xlu0 %v9447_v7, %s5842_s19  ;;  %v3299_v22 = vsel %vm3297_vm14, %v3243_v41, 0 }
 0x3b7   : > { %v5342_v55 = vunpack.i.h.bf16 %v5340_v45  ;;  %v5341_v0 = vunpack.i.l.bf16 %v5340_v45  ;;  %v5362_v37 = vunpack.i.h.bf16 %v5360_v3  ;;  %v5361_v61 = vunpack.i.l.bf16 %v5360_v3  ;;  %4324 = vmatpush.bf16.msra.mxu2 %v3299_v22  ;;  %3304 = vmatpush.bf16.msra.mxu1 %v3299_v22  ;;  %v5727_v22 = vld [vmem:[#allocation2 + $0x170] sm:$0xff] }
 0x3b8   : > { %v8541_v16 = vpop.permute.xlu0 %5349 }
 0x3b9   : > { %v8545_v29 = vsel %vm1551_vm10, %v8391_v63, %v5341_v0  ;;  %v8549_v56 = vsel %vm1551_vm10, %v8387_v24, %v5342_v55  ;;  %v8553_v46 = vsel %vm3060_vm15, %v8429_v6, %v5361_v61  ;;  %v8557_v7 = vsel %vm3060_vm15, %v8433_v19, %v5362_v37  ;;  %v9456_v24 = vld [vmem:[#allocation38_spill] sm:$0xff]  ;;  %v4317_v63 = vld [vmem:[%s9109_s3 + $0x10] sm:$0xff]  ;;  %v5726_v61 = vld [vmem:[#allocation2 + $0x168] sm:$0xff] }
 0x3bb   : > { %4325 = vmatpush.bf16.msra.mxu2 %v4318_v47  ;;  %3305 = vmatpush.bf16.msra.mxu1 %v4318_v47  ;;  %v5568_v47 = vpack.i.bf16 %v5727_v22, %v5726_v61 }
 0x3bc   : > { %5564 = vrot.lane.b32.xlu1 %v9455_v15, %s5839_s16  ;;  %5539 = vrot.lane.b32.xlu2 %v9456_v24, %s5841_s18 }
 0x3be   : > { %v8569_v6 = vpop.permute.xlu1 %5354  ;;  %v5375_v19 = vpop.permute.xlu2 %5374  ;;  %5574 = vrot.lane.b32.xlu0 %v9457_v51, %s5841_s18 }
 0x3bf   : > { %v5377_v8 = vunpack.i.h.bf16 %v5375_v19  ;;  %v5376_v53 = vunpack.i.l.bf16 %v5375_v19  ;;  %4326 = vmatpush.bf16.msra.mxu2 %v4317_v63  ;;  %3306 = vmatpush.bf16.msra.mxu1 %v4317_v63  ;;  %v9461_v19 = vld [vmem:[#allocation72_spill] sm:$0xff] }
 0x3c0   : > { %v5365_v58 = vpop.permute.xlu0 %5364 }
 0x3c1   : > { %v8575_v15 = vsel %vm3060_vm15, %v8458_v52, %v5376_v53  ;;  %v8579_v28 = vsel %vm3060_vm15, %v8462_v59, %v5377_v8  ;;  %v5367_v2 = vunpack.i.h.bf16 %v5365_v58  ;;  %v5366_v32 = vunpack.i.l.bf16 %v5365_v58  ;;  %v9459_v59 = vld [vmem:[#allocation71_spill] sm:$0xff]  ;;  %v5729_v58 = vld [vmem:[#allocation2 + $0xb0] sm:$0xff] }
 0x3c3   : > { %v8586_v50 = vsel %vm3060_vm15, %v8408_v1, %v5366_v32  ;;  %v8590_v52 = vsel %vm3060_vm15, %v8412_v48, %v5367_v2  ;;  %4327 = vmatpush.bf16.msra.mxu2 %v4316_v5  ;;  %v9460_v1 = vld [vmem:[#allocation23_spill] sm:$0xff]  ;;  %3307 = vmatpush.bf16.msra.mxu1 %v4316_v5  ;;  %v9463_v2 = vld [vmem:[#allocation65_spill] sm:$0xff] }
 0x3c4   : > { %5579 = vrot.lane.b32.xlu1 %v9458_v10, %s5842_s19  ;;  %5554 = vrot.lane.b32.xlu2 %v9459_v59, %s5841_s18  ;;  %v5730_v32 = vld [vmem:[#allocation2 + $0xc0] sm:$0xff]  ;;  %v5731_v59 = vld [vmem:[#allocation2 + $0xc8] sm:$0xff] }
 0x3c6   : > { %v5370_v12 = vpop.permute.xlu1 %5369  ;;  %v5390_v14 = vpop.permute.xlu2 %5389  ;;  %5589 = vrot.lane.b32.xlu0 %v9460_v1, %s5841_s18 }
 0x3c7   : > { %v5372_v45 = vunpack.i.h.bf16 %v5370_v12  ;;  %v5371_v48 = vunpack.i.l.bf16 %v5370_v12  ;;  %4328 = vmatpush.bf16.msra.mxu2 %v4315_v13  ;;  %3308 = vmatpush.bf16.msra.mxu1 %v4315_v13  ;;  %v5618_v13 = vpack.i.bf16 %v5731_v59, %v5730_v32  ;;  %v5391_v61 = vunpack.i.l.bf16 %v5390_v14  ;;  %v9465_v32 = vld [vmem:[#allocation24_spill] sm:$0xff] }
 0x3c8   : > { %v5380_v3 = vpop.permute.xlu0 %5379 }
 0x3c9   : > { %v8603_v41 = vsel %vm3060_vm15, %v8445_v25, %v5371_v48  ;;  %v8607_v55 = vsel %vm3060_vm15, %v8449_v44, %v5372_v45  ;;  %v5382_v0 = vunpack.i.h.bf16 %v5380_v3  ;;  %v5381_v37 = vunpack.i.l.bf16 %v5380_v3  ;;  %v8640_v45 = vld [vmem:[#allocation2 + $0x198] sm:$0xff]  ;;  %v8644_v48 = vld [vmem:[#allocation2 + $0x1a8] sm:$0x3] }
 0x3ca   : > { %v5312_v3 = vunpack.i.h.bf16 %v8484_v23 }
 0x3cb   : > { %v8611_v24 = vsel %vm3060_vm15, %v8437_v26, %v5381_v37  ;;  %v8615_v63 = vsel %vm3060_vm15, %v8441_v17, %v5382_v0  ;;  %v5311_v0 = vunpack.i.l.bf16 %v8484_v23  ;;  %v5392_v37 = vunpack.i.h.bf16 %v5390_v14 }
 0x3cc   : > { %5594 = vrot.lane.b32.xlu1 %v7839_v18, %s5842_s19  ;;  %5569 = vrot.lane.b32.xlu2 %v5568_v47, %s5840_s17  ;;  %v5728_v18 = vld [vmem:[#allocation2 + $0xa8] sm:$0xff]  ;;  %v2159_v47 = vrot.slane %v8640_v45, 2  ;;  %v3045_v23 = vsel %vm1551_vm10, %v8329_v57, %v5312_v3 }
 0x3cd   : > { %v5583_v5 = vpack.i.bf16 %v5729_v58, %v5728_v18  ;;  %v3044_v18 = vsel %vm1551_vm10, %v8333_v4, %v5311_v0  ;;  %v3078_v58 = vsel %vm3060_vm15, %v3045_v23, %v5392_v37  ;;  %vm3978_vm10 = vcmask 1047559  }
 0x3ce   : > { %v5385_v25 = vpop.permute.xlu1 %5384  ;;  %v8620_v44 = vpop.permute.xlu2 %5404  ;;  %5604 = vrot.lane.b32.xlu0 %v9461_v19, %s5840_s17  ;;  %v3077_v14 = vsel %vm3060_vm15, %v3044_v18, %v5391_v61  ;;  %v5351_v18 = vunpack.i.l.bf16 %v8541_v16 }
 0x3cf   : > { %v5387_v51 = vunpack.i.h.bf16 %v5385_v25  ;;  %v5386_v8 = vunpack.i.l.bf16 %v5385_v25  ;;  %v2162_v25 = vrot.slane %v8644_v48, 2 }
 0x3d0   : > { %v8624_v53 = vpop.permute.xlu0 %5394 }
 0x3d1   : > { %v8628_v26 = vsel %vm3060_vm15, %v8474_v27, %v5386_v8  ;;  %v8632_v17 = vsel %vm3060_vm15, %v8478_v11, %v5387_v51  ;;  %v8642_v11 = vld [vmem:[#allocation2 + $0x1a0] sm:$0xff]  ;;  %v9464_v8 = vld [vmem:[#allocation73_spill] sm:$0xff] }
 0x3d2   : > { %9462 = vst [vmem:[#allocation44_spill] sm:$0xff] %v8632_v17  ;;  %v2160_v22 = vrot.slane %v8642_v11, 2 }
 0x3d4   : > { %5609 = vrot.lane.b32.xlu1 %v9463_v2, %s5841_s18  ;;  %5584 = vrot.lane.b32.xlu2 %v5583_v5, %s5840_s17  ;;  %v2163_v57 = vsel %vm445_vm1, %v2160_v22, %v2162_v25 }
 0x3d6   : > { %v8637_v12 = vpop.permute.xlu1 %5399  ;;  %v5420_v1 = vpop.permute.xlu2 %5419  ;;  %5619 = vrot.lane.b32.xlu0 %v5618_v13, %s5840_s17  ;;  %v2161_v13 = vsel %vm445_vm1, %v2159_v47, %v2160_v22  ;;  %vm3248_vm1 = vcmask 588800  }
 0x3d7   : > { %v5421_v3 = vunpack.i.l.bf16 %v5420_v1  ;;  %v5648_v22 = vpack.i.bf16 %v2163_v57, %v2161_v13 }
 0x3d8   : > { %v5410_v27 = vpop.permute.xlu0 %5409 }
 0x3d9   : > { %v5412_v19 = vunpack.i.h.bf16 %v5410_v27  ;;  %v5411_v51 = vunpack.i.l.bf16 %v5410_v27  ;;  %v5422_v27 = vunpack.i.h.bf16 %v5420_v1 }
 0x3db   : > { %v3110_v0 = vsel %vm3093_vm2, %v3077_v14, %v5411_v51  ;;  %v3111_v37 = vsel %vm3093_vm2, %v3078_v58, %v5412_v19 }
 0x3dc   : > { %5624 = vrot.lane.b32.xlu1 %v9464_v8, %s5841_s18  ;;  %5599 = vrot.lane.b32.xlu2 %v9458_v10, %s5839_s16  ;;  %v5638_v10 = vpack.i.bf16 %v8642_v11, %v8640_v45  ;;  %v5352_v8 = vunpack.i.h.bf16 %v8541_v16  ;;  %v3061_v16 = vsel %vm3060_vm15, %v8379_v31, %v5351_v18 }
 0x3de   : > { %v5415_v5 = vpop.permute.xlu1 %5414  ;;  %v5435_v2 = vpop.permute.xlu2 %5434  ;;  %5634 = vrot.lane.b32.xlu0 %v9465_v32, %s5839_s16  ;;  %v3062_v19 = vsel %vm3060_vm15, %v8383_v60, %v5352_v8  ;;  %s8854_s16 = sand.u32 1, %s5820_s22  }
 0x3df   : > { %v5417_v59 = vunpack.i.h.bf16 %v5415_v5  ;;  %v5416_v4 = vunpack.i.l.bf16 %v5415_v5  ;;  %v5437_v13 = vunpack.i.h.bf16 %v5435_v2  ;;  %v5436_v57 = vunpack.i.l.bf16 %v5435_v2  ;;  %s4183_s26 = sshll.u32 %s8854_s16, 6  ;;  %s4046_s14 = scalar_lea.sflag [#allocation4], %s8854_s16 }
 0x3e0   : > { %v5425_v61 = vpop.permute.xlu0 %5424  ;;  %v5397_v2 = vunpack.i.h.bf16 %v8624_v53  ;;  %s8917_s28 = scalar_lea.vmem [#allocation5], %s4183_s26 }
 0x3e1   : > { %v3143_v23 = vsel %vm3126_vm3, %v3110_v0, %v5416_v4  ;;  %v3144_v17 = vsel %vm3126_vm3, %v3111_v37, %v5417_v59  ;;  %v5427_v25 = vunpack.i.h.bf16 %v5425_v61  ;;  %v5426_v51 = vunpack.i.l.bf16 %v5425_v61  ;;  %v5732_v37 = vld [vmem:[#allocation2 + $0xd8] sm:$0xff]  ;;  %v5733_v61 = vld [vmem:[#allocation2 + $0xe0] sm:$0xff] }
 0x3e2   : > { %v3176_v5 = vsel %vm3159_vm4, %v3143_v23, %v5421_v3  ;;  %v3177_v47 = vsel %vm3159_vm4, %v3144_v17, %v5422_v27  ;;  %v2155_v17 = vrot.slane %v8642_v11, 1  ;;  %v2154_v59 = vrot.slane %v8640_v45, 1 }
 0x3e3   : > { %v3200_v1 = vpack.c.bf16 %v3177_v47, %v3176_v5  ;;  %v3094_v27 = vsel %vm3093_vm2, %v3061_v16, %v5426_v51  ;;  %v3095_v31 = vsel %vm3093_vm2, %v3062_v19, %v5427_v25  ;;  %v5396_v0 = vunpack.i.l.bf16 %v8624_v53 }
 0x3e4   : > { %5639 = vrot.lane.b32.xlu1 %v5638_v10, %s5840_s17  ;;  %5614 = vrot.lane.b32.xlu2 %v9465_v32, %s5842_s19  ;;  %v2157_v32 = vrot.slane %v8644_v48, 1  ;;  %v5653_v45 = vpack.i.bf16 %v5733_v61, %v5732_v37  ;;  %v2156_v47 = vsel %vm364_vm0, %v2154_v59, %v2155_v17  ;;  %v3080_v53 = vsel %vm3060_vm15, %v8470_v54, %v5397_v2 }
 0x3e5   : > { %4233 = vmatmul.msk.bf16.vlgmr.msra.gmra.mxu2 %vm3248_vm1, %v3200_v1  ;;  %v3079_v1 = vsel %vm3060_vm15, %v8466_v9, %v5396_v0  ;;  %v5357_v54 = vunpack.i.h.bf16 %v8569_v6 }
 0x3e6   : > { %v5430_v14 = vpop.permute.xlu1 %5429  ;;  %v5450_v58 = vpop.permute.xlu2 %5449  ;;  %5649 = vrot.lane.b32.xlu0 %v5648_v22, %s5842_s19  ;;  %v2158_v22 = vsel %vm364_vm0, %v2155_v17, %v2157_v32  ;;  %vm3966_vm0 = vcmask 1041409  }
 0x3e7   : > { %v5432_v10 = vunpack.i.h.bf16 %v5430_v14  ;;  %v5431_v4 = vunpack.i.l.bf16 %v5430_v14  ;;  %v5452_v14 = vunpack.i.h.bf16 %v5450_v58  ;;  %v5451_v59 = vunpack.i.l.bf16 %v5450_v58 }
 0x3e8   : > { %v5440_v3 = vpop.permute.xlu0 %5439  ;;  %v3064_v0 = vsel %vm3060_vm15, %v8420_v36, %v5357_v54  ;;  %v5401_v36 = vunpack.i.l.bf16 %v8637_v12 }
 0x3e9   : > { %v3127_v60 = vsel %vm3126_vm3, %v3094_v27, %v5431_v4  ;;  %v3128_v11 = vsel %vm3126_vm3, %v3095_v31, %v5432_v10  ;;  %v5442_v23 = vunpack.i.h.bf16 %v5440_v3  ;;  %v5441_v5 = vunpack.i.l.bf16 %v5440_v3 }
 0x3ea   : > { %v3160_v8 = vsel %vm3159_vm4, %v3127_v60, %v5436_v57  ;;  %v3161_v48 = vsel %vm3159_vm4, %v3128_v11, %v5437_v13  ;;  %v5356_v57 = vunpack.i.l.bf16 %v8569_v6 }
 0x3eb   : > { %v3192_v18 = vpack.c.bf16 %v3161_v48, %v3160_v8  ;;  %v3112_v17 = vsel %vm3093_vm2, %v3079_v1, %v5441_v5  ;;  %v3113_v10 = vsel %vm3093_vm2, %v3080_v53, %v5442_v23 }
 0x3ec   : > { %5654 = vrot.lane.b32.xlu1 %v5653_v45, %s5840_s17  ;;  %5629 = vrot.lane.b32.xlu2 %v7887_v62, %s5842_s19  ;;  %v5643_v62 = vpack.i.bf16 %v2158_v22, %v2156_v47  ;;  %v3063_v11 = vsel %vm3060_vm15, %v8416_v34, %v5356_v57  ;;  %v5402_v47 = vunpack.i.h.bf16 %v8637_v12  ;;  %s5748_s17 = sshra.s32 %s9033_s13, 4  ;;  %s5749_s17 = int_to_ptr.hbm [resolvable:$true] %s5748_s17 }
 0x3ed   : > { %4225 = vmatmul.msk.bf16.vlgmr.msra.gmra.mxu1 %vm3248_vm1, %v3192_v18  ;;  %p5755_p0 = scmp.lt.s32.totalorder %s5749_s17, %s9111_s5 }
 0x3ee   : > { %v5445_v25 = vpop.permute.xlu1 %5444  ;;  %v5465_v51 = vpop.permute.xlu2 %5464  ;;  %5664 = vrot.lane.b32.xlu0 %v7916_v33, %s5842_s19  ;;  %s4182_s19 = sshll.u32 %s8854_s16, 8 }
 0x3ef   : > { %v5447_v16 = vunpack.i.h.bf16 %v5445_v25  ;;  %v5446_v19 = vunpack.i.l.bf16 %v5445_v25  ;;  %v5467_v45 = vunpack.i.h.bf16 %v5465_v51  ;;  %v5466_v8 = vunpack.i.l.bf16 %v5465_v51  ;;  %v9466_v51 = vld [vmem:[#allocation58_spill] sm:$0xff]  ;;  %s8865_s20 = scalar_lea.vmem [#allocation3], %s4182_s19 }
 0x3f0   : > { %v5455_v4 = vpop.permute.xlu0 %5454  ;;  %s4063_s12 = sshll.u32 %s8865_s20, 4  ;;  %s9029_s12 = int_to_ptr.vmem [resolvable:$true] %s4063_s12 }
 0x3f1   : > { %v3145_v9 = vsel %vm3126_vm3, %v3112_v17, %v5446_v19  ;;  %v3146_v32 = vsel %vm3126_vm3, %v3113_v10, %v5447_v16  ;;  %v5457_v31 = vunpack.i.h.bf16 %v5455_v4  ;;  %v5456_v58 = vunpack.i.l.bf16 %v5455_v4 }
 0x3f2   : > { %v3178_v13 = vsel %vm3159_vm4, %v3145_v9, %v5451_v59  ;;  %v3179_v33 = vsel %vm3159_vm4, %v3146_v32, %v5452_v14  ;;  %v3081_v19 = vsel %vm3060_vm15, %v8498_v38, %v5401_v36 }
 0x3f3   : > { %v3201_v27 = vpack.c.bf16 %v3179_v33, %v3178_v13  ;;  %v3096_v6 = vsel %vm3093_vm2, %v3063_v11, %v5456_v58  ;;  %v3097_v48 = vsel %vm3093_vm2, %v3064_v0, %v5457_v31 }
 0x3f4   : > { %5644 = vrot.lane.b32.xlu2 %v5643_v62, %s5841_s18  ;;  %v3082_v62 = vsel %vm3060_vm15, %v8502_v49, %v5402_v47 }
 0x3f5   : > { %4234 = vmatmul.msk.bf16.gmra.mxu2 %vm3248_vm1, %v3201_v27 }
 0x3f6   : > { %v5460_v3 = vpop.permute.xlu1 %5459  ;;  %v5480_v60 = vpop.permute.xlu2 %5479 }
 0x3f7   : > { %v5462_v37 = vunpack.i.h.bf16 %v5460_v3  ;;  %v5461_v61 = vunpack.i.l.bf16 %v5460_v3  ;;  %v5482_v17 = vunpack.i.h.bf16 %v5480_v60  ;;  %v5481_v12 = vunpack.i.l.bf16 %v5480_v60 }
 0x3f8   : > { %v5470_v2 = vpop.permute.xlu0 %5469 }
 0x3f9   : > { %v3129_v18 = vsel %vm3126_vm3, %v3096_v6, %v5461_v61  ;;  %v3130_v23 = vsel %vm3126_vm3, %v3097_v48, %v5462_v37  ;;  %v5472_v1 = vunpack.i.h.bf16 %v5470_v2  ;;  %v5471_v25 = vunpack.i.l.bf16 %v5470_v2 }
 0x3fa   : > { %v3162_v5 = vsel %vm3159_vm4, %v3129_v18, %v5466_v8  ;;  %v3163_v34 = vsel %vm3159_vm4, %v3130_v23, %v5467_v45  ;;  %v5407_v2 = vunpack.i.h.bf16 %v8620_v44  ;;  %v5406_v18 = vunpack.i.l.bf16 %v8620_v44 }
 0x3fb   : > { %v3193_v22 = vpack.c.bf16 %v3163_v34, %v3162_v5  ;;  %v3114_v10 = vsel %vm3093_vm2, %v3081_v19, %v5471_v25  ;;  %v3115_v4 = vsel %vm3093_vm2, %v3082_v62, %v5472_v1 }
 0x3fc   : > { %5659 = vrot.lane.b32.xlu2 %v9466_v51, %s5841_s18  ;;  %v3083_v47 = vsel %vm3060_vm15, %v8511_v39, %v5406_v18  ;;  %v3084_v36 = vsel %vm3060_vm15, %v8515_v43, %v5407_v2  ;;  %s5750_s18 = scalar_lea.hbm %s5749_s17, 256 }
 0x3fd   : > { %4226 = vmatmul.msk.bf16.gmra.mxu1 %vm3248_vm1, %v3193_v22  ;;  %p5751_p11 = scmp.ne.s32.totalorder %s5749_s17, %s5750_s18 }
 0x3fe   : > { %v5475_v53 = vpop.permute.xlu1 %5474  ;;  %v5495_v16 = vpop.permute.xlu2 %5494 }
 0x3ff   : > { %v5477_v14 = vunpack.i.h.bf16 %v5475_v53  ;;  %v5476_v59 = vunpack.i.l.bf16 %v5475_v53  ;;  %v5497_v60 = vunpack.i.h.bf16 %v5495_v16  ;;  %v5496_v11 = vunpack.i.l.bf16 %v5495_v16  ;;  %p5752_p12 = pnand %p5751_p11, %p5917_p5 }
 0x400   : > { %v5485_v9 = vpop.permute.xlu0 %5484 }
 0x401   : > { %v3147_v32 = vsel %vm3126_vm3, %v3114_v10, %v5476_v59  ;;  %v3148_v13 = vsel %vm3126_vm3, %v3115_v4, %v5477_v14  ;;  %v5487_v57 = vunpack.i.h.bf16 %v5485_v9  ;;  %v5486_v49 = vunpack.i.l.bf16 %v5485_v9  ;;  %p5753_p13 = pneg %p5752_p12 }
 0x402   : > { %v3180_v33 = vsel %vm3159_vm4, %v3147_v32, %v5481_v12  ;;  %v3181_v38 = vsel %vm3159_vm4, %v3148_v13, %v5482_v17 }
 0x403   : > { %v3202_v54 = vpack.c.bf16 %v3181_v38, %v3180_v33  ;;  %v3098_v0 = vsel %vm3093_vm2, %v8553_v46, %v5486_v49  ;;  %v3099_v37 = vsel %vm3093_vm2, %v8557_v7, %v5487_v57 }
 0x405   : > { %4235 = vmatmul.msk.bf16.gmra.mxu2 %vm3248_vm1, %v3202_v54 }
 0x406   : > { %v5490_v27 = vpop.permute.xlu1 %5489  ;;  %v5510_v31 = vpop.permute.xlu2 %5509 }
 0x407   : > { %v5492_v58 = vunpack.i.h.bf16 %v5490_v27  ;;  %v5491_v3 = vunpack.i.l.bf16 %v5490_v27  ;;  %v5512_v25 = vunpack.i.h.bf16 %v5510_v31  ;;  %v5511_v51 = vunpack.i.l.bf16 %v5510_v31 }
 0x408   : > { %v5500_v61 = vpop.permute.xlu0 %5499 }
 0x409   : > { %v3131_v45 = vsel %vm3126_vm3, %v3098_v0, %v5491_v3  ;;  %v3132_v8 = vsel %vm3126_vm3, %v3099_v37, %v5492_v58  ;;  %v5502_v5 = vunpack.i.h.bf16 %v5500_v61  ;;  %v5501_v34 = vunpack.i.l.bf16 %v5500_v61 }
 0x40a   : > { %v3164_v6 = vsel %vm3159_vm4, %v3131_v45, %v5496_v11  ;;  %v3165_v48 = vsel %vm3159_vm4, %v3132_v8, %v5497_v60 }
 0x40b   : > { %v3194_v23 = vpack.c.bf16 %v3165_v48, %v3164_v6  ;;  %v3116_v53 = vsel %vm3093_vm2, %v3083_v47, %v5501_v34  ;;  %v3117_v44 = vsel %vm3093_vm2, %v3084_v36, %v5502_v5 }
 0x40d   : > { %4227 = vmatmul.msk.bf16.gmra.mxu1 %vm3248_vm1, %v3194_v23 }
 0x40e   : > { %v5505_v46 = vpop.permute.xlu1 %5504  ;;  %v5525_v7 = vpop.permute.xlu2 %5524 }
 0x40f   : > { %v5507_v22 = vunpack.i.h.bf16 %v5505_v46  ;;  %v5506_v1 = vunpack.i.l.bf16 %v5505_v46  ;;  %v5527_v32 = vunpack.i.h.bf16 %v5525_v7  ;;  %v5526_v13 = vunpack.i.l.bf16 %v5525_v7 }
 0x410   : > { %v5515_v16 = vpop.permute.xlu0 %5514 }
 0x411   : > { %v3149_v19 = vsel %vm3126_vm3, %v3116_v53, %v5506_v1  ;;  %v3150_v62 = vsel %vm3126_vm3, %v3117_v44, %v5507_v22  ;;  %v5517_v17 = vunpack.i.h.bf16 %v5515_v16  ;;  %v5516_v43 = vunpack.i.l.bf16 %v5515_v16 }
 0x412   : > { %v3182_v14 = vsel %vm3159_vm4, %v3149_v19, %v5511_v51  ;;  %v3183_v39 = vsel %vm3159_vm4, %v3150_v62, %v5512_v25 }
 0x413   : > { %v3203_v59 = vpack.c.bf16 %v3183_v39, %v3182_v14  ;;  %v3100_v33 = vsel %vm3093_vm2, %v8586_v50, %v5516_v43  ;;  %v3101_v38 = vsel %vm3093_vm2, %v8590_v52, %v5517_v17 }
 0x415   : > { %4236 = vmatmul.msk.bf16.gmra.mxu2 %vm3248_vm1, %v3203_v59 }
 0x416   : > { %v5520_v12 = vpop.permute.xlu1 %5519  ;;  %v5540_v10 = vpop.permute.xlu2 %5539 }
 0x417   : > { %v5522_v4 = vunpack.i.h.bf16 %v5520_v12  ;;  %v5521_v9 = vunpack.i.l.bf16 %v5520_v12  ;;  %v5542_v61 = vunpack.i.h.bf16 %v5540_v10  ;;  %v5541_v52 = vunpack.i.l.bf16 %v5540_v10 }
 0x418   : > { %v5530_v54 = vpop.permute.xlu0 %5529 }
 0x419   : > { %v3133_v57 = vsel %vm3126_vm3, %v3100_v33, %v5521_v9  ;;  %v3134_v49 = vsel %vm3126_vm3, %v3101_v38, %v5522_v4  ;;  %v5532_v3 = vunpack.i.h.bf16 %v5530_v54  ;;  %v5531_v60 = vunpack.i.l.bf16 %v5530_v54 }
 0x41a   : > { %v3166_v27 = vsel %vm3159_vm4, %v3133_v57, %v5526_v13  ;;  %v3167_v31 = vsel %vm3159_vm4, %v3134_v49, %v5527_v32 }
 0x41b   : > { %v3195_v58 = vpack.c.bf16 %v3167_v31, %v3166_v27  ;;  %v3085_v45 = vsel %vm3060_vm15, %v8490_v35, %v5531_v60  ;;  %v3086_v8 = vsel %vm3060_vm15, %v8494_v20, %v5532_v3 }
 0x41d   : > { %4228 = vmatmul.msk.bf16.gmra.mxu1 %vm3248_vm1, %v3195_v58 }
 0x41e   : > { %v5535_v11 = vpop.permute.xlu1 %5534  ;;  %v5555_v0 = vpop.permute.xlu2 %5554 }
 0x41f   : > { %v5537_v50 = vunpack.i.h.bf16 %v5535_v11  ;;  %v5536_v37 = vunpack.i.l.bf16 %v5535_v11  ;;  %v5557_v1 = vunpack.i.h.bf16 %v5555_v0  ;;  %v5556_v25 = vunpack.i.l.bf16 %v5555_v0 }
 0x420   : > { %v5545_v6 = vpop.permute.xlu0 %5544 }
 0x421   : > { %v3118_v48 = vsel %vm3093_vm2, %v3085_v45, %v5536_v37  ;;  %v3119_v2 = vsel %vm3093_vm2, %v3086_v8, %v5537_v50  ;;  %v5547_v18 = vunpack.i.h.bf16 %v5545_v6  ;;  %v5546_v23 = vunpack.i.l.bf16 %v5545_v6 }
 0x422   : > { %v3151_v5 = vsel %vm3126_vm3, %v3118_v48, %v5541_v52  ;;  %v3152_v34 = vsel %vm3126_vm3, %v3119_v2, %v5542_v61 }
 0x423   : > { %v3184_v46 = vsel %vm3159_vm4, %v3151_v5, %v5546_v23  ;;  %v3185_v7 = vsel %vm3159_vm4, %v3152_v34, %v5547_v18 }
 0x424   : > { %v3204_v47 = vpack.c.bf16 %v3185_v7, %v3184_v46 }
 0x426   : > { %v5550_v35 = vpop.permute.xlu1 %5549  ;;  %v5570_v36 = vpop.permute.xlu2 %5569  ;;  %4237 = vmatmul.msk.bf16.gmra.mxu2 %vm3248_vm1, %v3204_v47 }
 0x427   : > { %v5552_v20 = vunpack.i.h.bf16 %v5550_v35  ;;  %v5551_v22 = vunpack.i.l.bf16 %v5550_v35  ;;  %v5572_v32 = vunpack.i.h.bf16 %v5570_v36  ;;  %v5571_v13 = vunpack.i.l.bf16 %v5570_v36 }
 0x428   : > { %v5560_v51 = vpop.permute.xlu0 %5559 }
 0x429   : > { %v3102_v53 = vsel %vm3093_vm2, %v8603_v41, %v5551_v22  ;;  %v3103_v44 = vsel %vm3093_vm2, %v8607_v55, %v5552_v20  ;;  %v5562_v16 = vunpack.i.h.bf16 %v5560_v51  ;;  %v5561_v19 = vunpack.i.l.bf16 %v5560_v51 }
 0x42a   : > { %v3135_v62 = vsel %vm3126_vm3, %v3102_v53, %v5556_v25  ;;  %v3136_v14 = vsel %vm3126_vm3, %v3103_v44, %v5557_v1 }
 0x42b   : > { %v3168_v39 = vsel %vm3159_vm4, %v3135_v62, %v5561_v19  ;;  %v3169_v59 = vsel %vm3159_vm4, %v3136_v14, %v5562_v16 }
 0x42c   : > { %v3196_v17 = vpack.c.bf16 %v3169_v59, %v3168_v39 }
 0x42e   : > { %v5565_v43 = vpop.permute.xlu1 %5564  ;;  %v5585_v12 = vpop.permute.xlu2 %5584  ;;  %4229 = vmatmul.msk.bf16.gmra.mxu1 %vm3248_vm1, %v3196_v17 }
 0x42f   : > { %v5567_v10 = vunpack.i.h.bf16 %v5565_v43  ;;  %v5566_v41 = vunpack.i.l.bf16 %v5565_v43  ;;  %v5587_v0 = vunpack.i.h.bf16 %v5585_v12  ;;  %v5586_v50 = vunpack.i.l.bf16 %v5585_v12 }
 0x430   : > { %v5575_v4 = vpop.permute.xlu0 %5574 }
 0x431   : > { %v3087_v55 = vsel %vm3060_vm15, %v8530_v30, %v5566_v41  ;;  %v3088_v9 = vsel %vm3060_vm15, %v8534_v40, %v5567_v10  ;;  %v5577_v33 = vunpack.i.h.bf16 %v5575_v4  ;;  %v5576_v38 = vunpack.i.l.bf16 %v5575_v4 }
 0x432   : > { %v3120_v54 = vsel %vm3093_vm2, %v3087_v55, %v5571_v13  ;;  %v3121_v57 = vsel %vm3093_vm2, %v3088_v9, %v5572_v32  ;;  %v3104_v8 = vsel %vm3093_vm2, %v8575_v15, %v5586_v50  ;;  %v3105_v6 = vsel %vm3093_vm2, %v8579_v28, %v5587_v0 }
 0x433   : > { %v3153_v60 = vsel %vm3126_vm3, %v3120_v54, %v5576_v38  ;;  %v3154_v30 = vsel %vm3126_vm3, %v3121_v57, %v5577_v33 }
 0x436   : > { %v5580_v49 = vpop.permute.xlu1 %5579  ;;  %v5600_v27 = vpop.permute.xlu2 %5599 }
 0x437   : > { %v5582_v31 = vunpack.i.h.bf16 %v5580_v49  ;;  %v5581_v58 = vunpack.i.l.bf16 %v5580_v49  ;;  %v5602_v35 = vunpack.i.h.bf16 %v5600_v27  ;;  %v5601_v36 = vunpack.i.l.bf16 %v5600_v27 }
 0x438   : > { %v5590_v3 = vpop.permute.xlu0 %5589 }
 0x439   : > { %v3186_v11 = vsel %vm3159_vm4, %v3153_v60, %v5581_v58  ;;  %v3187_v40 = vsel %vm3159_vm4, %v3154_v30, %v5582_v31  ;;  %v5592_v61 = vunpack.i.h.bf16 %v5590_v3  ;;  %v5591_v52 = vunpack.i.l.bf16 %v5590_v3 }
 0x43a   : > { %v3205_v37 = vpack.c.bf16 %v3187_v40, %v3186_v11  ;;  %v3089_v22 = vsel %vm3060_vm15, %v8545_v29, %v5601_v36  ;;  %v3090_v1 = vsel %vm3060_vm15, %v8549_v56, %v5602_v35  ;;  %v9467_v35 = vld [vmem:[#allocation44_spill] sm:$0xff] }
 0x43b   : > { %v3137_v23 = vsel %vm3126_vm3, %v3104_v8, %v5591_v52  ;;  %v3138_v5 = vsel %vm3126_vm3, %v3105_v6, %v5592_v61 }
 0x43c   : > { %4238 = vmatmul.msk.bf16.gmra.mxu2 %vm3248_vm1, %v3205_v37 }
 0x43e   : > { %v5595_v45 = vpop.permute.xlu1 %5594  ;;  %v5615_v18 = vpop.permute.xlu2 %5614 }
 0x43f   : > { %v5597_v48 = vunpack.i.h.bf16 %v5595_v45  ;;  %v5596_v2 = vunpack.i.l.bf16 %v5595_v45  ;;  %v5617_v53 = vunpack.i.h.bf16 %v5615_v18  ;;  %v5616_v44 = vunpack.i.l.bf16 %v5615_v18 }
 0x440   : > { %v5605_v34 = vpop.permute.xlu0 %5604 }
 0x441   : > { %v3170_v46 = vsel %vm3159_vm4, %v3137_v23, %v5596_v2  ;;  %v3171_v7 = vsel %vm3159_vm4, %v3138_v5, %v5597_v48  ;;  %v5607_v20 = vunpack.i.h.bf16 %v5605_v34  ;;  %v5606_v15 = vunpack.i.l.bf16 %v5605_v34 }
 0x442   : > { %v3197_v47 = vpack.c.bf16 %v3171_v7, %v3170_v46 }
 0x443   : > { %v3122_v16 = vsel %vm3093_vm2, %v3089_v22, %v5606_v15  ;;  %v3123_v19 = vsel %vm3093_vm2, %v3090_v1, %v5607_v20 }
 0x444   : > { %4230 = vmatmul.msk.bf16.gmra.mxu1 %vm3248_vm1, %v3197_v47 }
 0x446   : > { %v5610_v28 = vpop.permute.xlu1 %5609  ;;  %v5630_v59 = vpop.permute.xlu2 %5629 }
 0x447   : > { %v5612_v25 = vunpack.i.h.bf16 %v5610_v28  ;;  %v5611_v51 = vunpack.i.l.bf16 %v5610_v28  ;;  %v5632_v55 = vunpack.i.h.bf16 %v5630_v59  ;;  %v5631_v9 = vunpack.i.l.bf16 %v5630_v59 }
 0x448   : > { %v5620_v62 = vpop.permute.xlu0 %5619 }
 0x449   : > { %v3155_v14 = vsel %vm3126_vm3, %v3122_v16, %v5611_v51  ;;  %v3156_v39 = vsel %vm3126_vm3, %v3123_v19, %v5612_v25  ;;  %v5622_v56 = vunpack.i.h.bf16 %v5620_v62  ;;  %v5621_v12 = vunpack.i.l.bf16 %v5620_v62 }
 0x44a   : > { %v3188_v17 = vsel %vm3159_vm4, %v3155_v14, %v5616_v44  ;;  %v3189_v29 = vsel %vm3159_vm4, %v3156_v39, %v5617_v53 }
 0x44b   : > { %v3206_v43 = vpack.c.bf16 %v3189_v29, %v3188_v17  ;;  %v3106_v32 = vsel %vm3093_vm2, %v8611_v24, %v5621_v12  ;;  %v3107_v13 = vsel %vm3093_vm2, %v8615_v63, %v5622_v56 }
 0x44d   : > { %4239 = vmatmul.msk.bf16.gmra.mxu2 %vm3248_vm1, %v3206_v43 }
 0x44e   : > { %v5625_v10 = vpop.permute.xlu1 %5624  ;;  %v5645_v27 = vpop.permute.xlu2 %5644 }
 0x44f   : > { %v5627_v41 = vunpack.i.h.bf16 %v5625_v10  ;;  %v5626_v4 = vunpack.i.l.bf16 %v5625_v10  ;;  %v5647_v60 = vunpack.i.h.bf16 %v5645_v27  ;;  %v5646_v24 = vunpack.i.l.bf16 %v5645_v27 }
 0x450   : > { %v5635_v33 = vpop.permute.xlu0 %5634 }
 0x451   : > { %v3139_v38 = vsel %vm3126_vm3, %v3106_v32, %v5626_v4  ;;  %v3140_v54 = vsel %vm3126_vm3, %v3107_v13, %v5627_v41  ;;  %v5637_v58 = vunpack.i.h.bf16 %v5635_v33  ;;  %v5636_v3 = vunpack.i.l.bf16 %v5635_v33 }
 0x452   : > { %v3172_v57 = vsel %vm3159_vm4, %v3139_v38, %v5631_v9  ;;  %v3173_v49 = vsel %vm3159_vm4, %v3140_v54, %v5632_v55 }
 0x453   : > { %v3198_v31 = vpack.c.bf16 %v3173_v49, %v3172_v57  ;;  %v3091_v40 = vsel %vm3060_vm15, %v8519_v42, %v5636_v3  ;;  %v3092_v0 = vsel %vm3060_vm15, %v8523_v21, %v5637_v58 }
 0x455   : > { %4231 = vmatmul.msk.bf16.gmra.mxu1 %vm3248_vm1, %v3198_v31 }
 0x456   : > { %v5640_v30 = vpop.permute.xlu1 %5639  ;;  %v5660_v42 = vpop.permute.xlu2 %5659 }
 0x457   : > { %v5642_v11 = vunpack.i.h.bf16 %v5640_v30  ;;  %v5641_v63 = vunpack.i.l.bf16 %v5640_v30  ;;  %v5662_v34 = vunpack.i.h.bf16 %v5660_v42  ;;  %v5661_v46 = vunpack.i.l.bf16 %v5660_v42 }
 0x458   : > { %v5650_v50 = vpop.permute.xlu0 %5649 }
 0x459   : > { %v3124_v37 = vsel %vm3093_vm2, %v3091_v40, %v5641_v63  ;;  %v3125_v61 = vsel %vm3093_vm2, %v3092_v0, %v5642_v11  ;;  %v5652_v52 = vunpack.i.h.bf16 %v5650_v50  ;;  %v5651_v45 = vunpack.i.l.bf16 %v5650_v50 }
 0x45a   : > { %v3157_v8 = vsel %vm3126_vm3, %v3124_v37, %v5646_v24  ;;  %v3158_v6 = vsel %vm3126_vm3, %v3125_v61, %v5647_v60 }
 0x45b   : > { %v3190_v48 = vsel %vm3159_vm4, %v3157_v8, %v5651_v45  ;;  %v3191_v2 = vsel %vm3159_vm4, %v3158_v6, %v5652_v52 }
 0x45c   : > { %v3207_v18 = vpack.c.bf16 %v3191_v2, %v3190_v48 }
 0x45e   : > { %v5655_v23 = vpop.permute.xlu1 %5654  ;;  %4240 = vmatmul.msk.bf16.gmra.mxu2 %vm3248_vm1, %v3207_v18 }
 0x45f   : > { %v5657_v21 = vunpack.i.h.bf16 %v5655_v23  ;;  %v5656_v5 = vunpack.i.l.bf16 %v5655_v23 }
 0x460   : > { %v5665_v7 = vpop.permute.xlu0 %5664 }
 0x461   : > { %v3108_v47 = vsel %vm3093_vm2, %v8628_v26, %v5656_v5  ;;  %v3109_v36 = vsel %vm3093_vm2, %v9467_v35, %v5657_v21  ;;  %v5667_v20 = vunpack.i.h.bf16 %v5665_v7  ;;  %v5666_v15 = vunpack.i.l.bf16 %v5665_v7  ;;  %v8859_v26 = vld [vmem:[%s9110_s4] ss:$0 sm:$0xff] }
 0x462   : > { %v3141_v28 = vsel %vm3126_vm3, %v3108_v47, %v5661_v46  ;;  %v3142_v22 = vsel %vm3126_vm3, %v3109_v36, %v5662_v34 }
 0x463   : > { %v3174_v1 = vsel %vm3159_vm4, %v3141_v28, %v5666_v15  ;;  %v3175_v25 = vsel %vm3159_vm4, %v3142_v22, %v5667_v20 }
 0x464   : > { %v3199_v51 = vpack.c.bf16 %v3175_v25, %v3174_v1 }
 0x466   : > { %4232 = vmatmul.msk.bf16.gmra.mxu1 %vm3248_vm1, %v3199_v51 }
 0x468   : > { %v3350_v53 = vpop.f32.mrf.mxu2 }
 0x469   : > { %v3351_v44 = vadd.f32 %v8859_v26, %v3350_v53 }
 0x46a   : > { %v3310_v16 = vpop.f32.mrf.mxu1 }
 0x46b   : > { %v3406_v19 = vmax.f32 %v3351_v44, 0.0  ;;  %v3311_v62 = vadd.f32 %v8859_v26, %v3310_v16 }
 0x46d   : > { %3438 = vst [vmem:[%s8865_s20 + $0x80] sm:$0xff] %v3406_v19  ;;  %v3390_v14 = vmax.f32 %v3311_v62, 0.0 }
 0x46f   : > { %3422 = vst [vmem:[%s8865_s20] sm:$0xff] %v3390_v14 }
 0x470   : > { %v3352_v39 = vpop.f32.mrf.mxu2 }
 0x471   : > { %v3353_v59 = vadd.f32 %v8859_v26, %v3352_v39 }
 0x472   : > { %v3312_v17 = vpop.f32.mrf.mxu1 }
 0x473   : > { %v3407_v29 = vmax.f32 %v3353_v59, 0.0  ;;  %v8871_v43 = vadd.f32 %v8859_v26, %v3312_v17 }
 0x475   : > { %3439 = vst [vmem:[%s8865_s20 + $0x88] sm:$0xff] %v3407_v29  ;;  %v3391_v56 = vmax.f32 %v8871_v43, 0.0 }
 0x477   : > { %3423 = vst [vmem:[%s8865_s20 + $0x8] sm:$0xff] %v3391_v56 }
 0x478   : > { %v3355_v12 = vpop.f32.mrf.mxu2 }
 0x479   : > { %v3356_v10 = vadd.f32 %v8859_v26, %v3355_v12 }
 0x47a   : > { %v3315_v41 = vpop.f32.mrf.mxu1 }
 0x47b   : > { %v3408_v4 = vmax.f32 %v3356_v10, 0.0  ;;  %v3316_v55 = vadd.f32 %v8859_v26, %v3315_v41 }
 0x47d   : > { %3440 = vst [vmem:[%s8865_s20 + $0x90] sm:$0xff] %v3408_v4  ;;  %v3462_v9 = vmax.f32 %v3406_v19, %v3408_v4  ;;  %v3392_v32 = vmax.f32 %v3316_v55, 0.0 }
 0x47f   : > { %v3510_v13 = vrot.slane %v3462_v9, 2  ;;  %v3511_v33 = vrot.slane %v3462_v9, 4  ;;  %v3512_v38 = vrot.slane %v3462_v9, 6  ;;  %v4273_v54 = vrot.slane %v3462_v9, 9  ;;  %3424 = vst [vmem:[%s8865_s20 + $0x10] sm:$0xff] %v3392_v32 }
 0x480   : > { %v3454_v57 = vmax.f32 %v3390_v14, %v3392_v32  ;;  %v3357_v49 = vpop.f32.mrf.mxu2 }
 0x481   : > { %v4274_v27 = vrot.slane %v3510_v13, 9  ;;  %v4275_v31 = vrot.slane %v3511_v33, 9  ;;  %v4276_v58 = vrot.slane %v3512_v38, 9  ;;  %v3806_v3 = vmax.f32 %v3462_v9, %v4273_v54 }
 0x482   : > { %v3486_v60 = vrot.slane %v3454_v57, 2  ;;  %v3487_v24 = vrot.slane %v3454_v57, 4  ;;  %v3488_v30 = vrot.slane %v3454_v57, 6  ;;  %v4241_v11 = vrot.slane %v3454_v57, 9  ;;  %v3317_v63 = vpop.f32.mrf.mxu1 }
 0x483   : > { %v3807_v40 = vmax.f32 %v3510_v13, %v4274_v27  ;;  %v3808_v0 = vmax.f32 %v3511_v33, %v4275_v31  ;;  %v3809_v50 = vmax.f32 %v3512_v38, %v4276_v58  ;;  %v3934_v8 = vperm.slane %v3806_v3, 0 }
 0x484   : > { %v4242_v37 = vrot.slane %v3486_v60, 9  ;;  %v4243_v61 = vrot.slane %v3487_v24, 9  ;;  %v4244_v52 = vrot.slane %v3488_v30, 9  ;;  %v3774_v45 = vmax.f32 %v3454_v57, %v4241_v11 }
 0x485   : > { %v3935_v6 = vperm.slane %v3807_v40, 0  ;;  %v3936_v48 = vperm.slane %v3808_v0, 0  ;;  %v3358_v2 = vadd.f32 %v8859_v26, %v3357_v49  ;;  %v3318_v34 = vadd.f32 %v8859_v26, %v3317_v63 }
 0x486   : > { %v3775_v18 = vmax.f32 %v3486_v60, %v4242_v37  ;;  %v3776_v42 = vmax.f32 %v3487_v24, %v4243_v61  ;;  %v8883_v23 = vmax.f32 %v3488_v30, %v4244_v52  ;;  %v3902_v7 = vperm.slane %v3774_v45, 0 }
 0x487   : > { %v4001_v21 = vsel %vm3966_vm0, %v3935_v6, %v3934_v8  ;;  %v3409_v5 = vmax.f32 %v3358_v2, 0.0  ;;  %v3937_v20 = vperm.slane %v3809_v50, 0  ;;  %v3393_v28 = vmax.f32 %v3318_v34, 0.0 }
 0x488   : > { %v4002_v46 = vsel %vm3968_vm5, %v3936_v48, %v4001_v21  ;;  %v3903_v47 = vperm.slane %v3775_v18, 0  ;;  %v3904_v35 = vperm.slane %v3776_v42, 0  ;;  %v3360_v36 = vpop.f32.mrf.mxu2  ;;  %v3905_v1 = vperm.slane %v8883_v23, 0 }
 0x489   : > { %3441 = vst [vmem:[%s8865_s20 + $0x98] sm:$0xff] %v3409_v5  ;;  %v3463_v15 = vmax.f32 %v3407_v29, %v3409_v5  ;;  %v8890_v22 = vadd.f32 %v8859_v26, %v3360_v36  ;;  %v4003_v53 = vsel %vm3970_vm6, %v3937_v20, %v4002_v46  ;;  %v3455_v39 = vmax.f32 %v3391_v56, %v3393_v28 }
 0x48a   : > { %v3967_v25 = vsel %vm3966_vm0, %v3903_v47, %v3902_v7  ;;  %v3320_v51 = vpop.f32.mrf.mxu1  ;;  %3425 = vst [vmem:[%s8865_s20 + $0x18] sm:$0xff] %v3393_v28 }
 0x48b   : > { %v3513_v44 = vrot.slane %v3463_v15, 2  ;;  %v3514_v16 = vrot.slane %v3463_v15, 4  ;;  %v3515_v19 = vrot.slane %v3463_v15, 6  ;;  %v3969_v62 = vsel %vm3968_vm5, %v3904_v35, %v3967_v25 }
 0x48c   : > { %v4277_v14 = vrot.slane %v3463_v15, 9  ;;  %v3410_v59 = vmax.f32 %v8890_v22, 0.0  ;;  %v3321_v10 = vadd.f32 %v8859_v26, %v3320_v51  ;;  %v3489_v4 = vrot.slane %v3455_v39, 2 }
 0x48d   : > { %v4278_v17 = vrot.slane %v3513_v44, 9  ;;  %v4279_v29 = vrot.slane %v3514_v16, 9  ;;  %v4280_v12 = vrot.slane %v3515_v19, 9  ;;  %v3490_v55 = vrot.slane %v3455_v39, 4 }
 0x48e   : > { %v3810_v41 = vmax.f32 %v3463_v15, %v4277_v14  ;;  %v3491_v9 = vrot.slane %v3455_v39, 6  ;;  %3442 = vst [vmem:[%s8865_s20 + $0xa0] sm:$0xff] %v3410_v59  ;;  %v4245_v38 = vrot.slane %v3455_v39, 9  ;;  %v4246_v54 = vrot.slane %v3489_v4, 9 }
 0x48f   : > { %v3811_v32 = vmax.f32 %v3513_v44, %v4278_v17  ;;  %v3812_v13 = vmax.f32 %v3514_v16, %v4279_v29  ;;  %v3813_v33 = vmax.f32 %v3515_v19, %v4280_v12  ;;  %v4247_v56 = vrot.slane %v3490_v55, 9 }
 0x490   : > { %v3938_v43 = vperm.slane %v3810_v41, 0  ;;  %v4248_v57 = vrot.slane %v3491_v9, 9  ;;  %v3362_v49 = vpop.f32.mrf.mxu2  ;;  %v3778_v3 = vmax.f32 %v3455_v39, %v4245_v38  ;;  %v3779_v24 = vmax.f32 %v3489_v4, %v4246_v54 }
 0x491   : > { %v3939_v27 = vperm.slane %v3811_v32, 0  ;;  %v3940_v31 = vperm.slane %v3812_v13, 0  ;;  %v3941_v58 = vperm.slane %v3813_v33, 0  ;;  %v3780_v30 = vmax.f32 %v3490_v55, %v4247_v56 }
 0x492   : > { %v4004_v60 = vsel %vm3972_vm7, %v3938_v43, %v4003_v53  ;;  %v3781_v11 = vmax.f32 %v3491_v9, %v4248_v57  ;;  %v3322_v63 = vpop.f32.mrf.mxu1  ;;  %v3906_v0 = vperm.slane %v3778_v3, 0  ;;  %v3394_v50 = vmax.f32 %v3321_v10, 0.0 }
 0x493   : > { %v4005_v40 = vsel %vm3974_vm8, %v3939_v27, %v4004_v60  ;;  %v8906_v37 = vadd.f32 %v8859_v26, %v3362_v49  ;;  %v3971_v61 = vsel %vm3970_vm6, %v3905_v1, %v3969_v62  ;;  %v3907_v45 = vperm.slane %v3779_v24, 0 }
 0x494   : > { %v4006_v52 = vsel %vm3976_vm9, %v3940_v31, %v4005_v40  ;;  %v3908_v8 = vperm.slane %v3780_v30, 0  ;;  %v3973_v48 = vsel %vm3972_vm7, %v3906_v0, %v3971_v61  ;;  %3426 = vst [vmem:[%s8865_s20 + $0x20] sm:$0xff] %v3394_v50  ;;  %v8915_v18 = vadd.f32 %v8859_v26, %v3322_v63 }
 0x495   : > { %v4007_v6 = vsel %vm3978_vm10, %v3941_v58, %v4006_v52  ;;  %v3411_v2 = vmax.f32 %v8906_v37, 0.0  ;;  %v3909_v42 = vperm.slane %v3781_v11, 0  ;;  %v3975_v23 = vsel %vm3974_vm8, %v3907_v45, %v3973_v48 }
 0x496   : > { %4041 = vst [vmem:[%s8917_s28 + $0x20] sm:$0xff] %v4007_v6  ;;  %v3977_v21 = vsel %vm3976_vm9, %v3908_v8, %v3975_v23  ;;  %v3395_v5 = vmax.f32 %v8915_v18, 0.0 }
 0x497   : > { %3443 = vst [vmem:[%s8865_s20 + $0xa8] sm:$0xff] %v3411_v2  ;;  %v3979_v34 = vsel %vm3978_vm10, %v3909_v42, %v3977_v21 }
 0x498   : > { %v3365_v46 = vpop.f32.mrf.mxu2  ;;  %4037 = vst [vmem:[%s8917_s28] sm:$0xff] %v3979_v34 }
 0x499   : > { %v3366_v7 = vadd.f32 %v8859_v26, %v3365_v46  ;;  %3427 = vst [vmem:[%s8865_s20 + $0x28] sm:$0xff] %v3395_v5 }
 0x49a   : > { %v3325_v47 = vpop.f32.mrf.mxu1 }
 0x49b   : > { %v3412_v35 = vmax.f32 %v3366_v7, 0.0  ;;  %v3326_v36 = vadd.f32 %v8859_v26, %v3325_v47 }
 0x49d   : > { %3444 = vst [vmem:[%s8865_s20 + $0xb0] sm:$0xff] %v3412_v35  ;;  %v3464_v20 = vmax.f32 %v3410_v59, %v3412_v35  ;;  %v3396_v15 = vmax.f32 %v3326_v36, 0.0 }
 0x49f   : > { %v3516_v28 = vrot.slane %v3464_v20, 2  ;;  %v3517_v22 = vrot.slane %v3464_v20, 4  ;;  %v3518_v1 = vrot.slane %v3464_v20, 6  ;;  %v4281_v25 = vrot.slane %v3464_v20, 9  ;;  %3428 = vst [vmem:[%s8865_s20 + $0x30] sm:$0xff] %v3396_v15 }
 0x4a0   : > { %v3456_v51 = vmax.f32 %v3394_v50, %v3396_v15  ;;  %v3367_v53 = vpop.f32.mrf.mxu2 }
 0x4a1   : > { %v4282_v44 = vrot.slane %v3516_v28, 9  ;;  %v4283_v16 = vrot.slane %v3517_v22, 9  ;;  %v4284_v19 = vrot.slane %v3518_v1, 9  ;;  %v3814_v62 = vmax.f32 %v3464_v20, %v4281_v25 }
 0x4a2   : > { %v3492_v14 = vrot.slane %v3456_v51, 2  ;;  %v3493_v39 = vrot.slane %v3456_v51, 4  ;;  %v3494_v17 = vrot.slane %v3456_v51, 6  ;;  %v4249_v29 = vrot.slane %v3456_v51, 9  ;;  %v3327_v12 = vpop.f32.mrf.mxu1 }
 0x4a3   : > { %v3815_v10 = vmax.f32 %v3516_v28, %v4282_v44  ;;  %v3816_v41 = vmax.f32 %v3517_v22, %v4283_v16  ;;  %v3817_v59 = vmax.f32 %v3518_v1, %v4284_v19  ;;  %v3942_v13 = vperm.slane %v3814_v62, 0 }
 0x4a4   : > { %v4250_v4 = vrot.slane %v3492_v14, 9  ;;  %v4251_v55 = vrot.slane %v3493_v39, 9  ;;  %v4252_v9 = vrot.slane %v3494_v17, 9  ;;  %v3782_v32 = vmax.f32 %v3456_v51, %v4249_v29 }
 0x4a5   : > { %v3943_v33 = vperm.slane %v3815_v10, 0  ;;  %v3944_v38 = vperm.slane %v3816_v41, 0  ;;  %v3368_v43 = vadd.f32 %v8859_v26, %v3367_v53  ;;  %v3328_v31 = vadd.f32 %v8859_v26, %v3327_v12 }
 0x4a6   : > { %v3783_v54 = vmax.f32 %v3492_v14, %v4250_v4  ;;  %v3784_v56 = vmax.f32 %v3493_v39, %v4251_v55  ;;  %v3785_v57 = vmax.f32 %v3494_v17, %v4252_v9  ;;  %v3910_v3 = vperm.slane %v3782_v32, 0 }
 0x4a7   : > { %v4008_v49 = vsel %vm3966_vm0, %v3943_v33, %v3942_v13  ;;  %v3413_v27 = vmax.f32 %v3368_v43, 0.0  ;;  %v3945_v30 = vperm.slane %v3817_v59, 0  ;;  %v3397_v63 = vmax.f32 %v3328_v31, 0.0 }
 0x4a8   : > { %v4009_v58 = vsel %vm3968_vm5, %v3944_v38, %v4008_v49  ;;  %v3911_v60 = vperm.slane %v3783_v54, 0  ;;  %v3912_v24 = vperm.slane %v3784_v56, 0  ;;  %v3913_v0 = vperm.slane %v3785_v57, 0 }
 0x4a9   : > { %3445 = vst [vmem:[%s8865_s20 + $0xb8] sm:$0xff] %v3413_v27  ;;  %v3465_v11 = vmax.f32 %v3411_v2, %v3413_v27  ;;  %v3370_v40 = vpop.f32.mrf.mxu2  ;;  %v4010_v61 = vsel %vm3970_vm6, %v3945_v30, %v4009_v58  ;;  %v3457_v2 = vmax.f32 %v3395_v5, %v3397_v63 }
 0x4aa   : > { %v3980_v50 = vsel %vm3966_vm0, %v3911_v60, %v3910_v3  ;;  %v8940_v37 = vadd.f32 %v8859_v26, %v3370_v40  ;;  %3429 = vst [vmem:[%s8865_s20 + $0x38] sm:$0xff] %v3397_v63 }
 0x4ab   : > { %v3519_v52 = vrot.slane %v3465_v11, 2  ;;  %v3520_v45 = vrot.slane %v3465_v11, 4  ;;  %v3521_v8 = vrot.slane %v3465_v11, 6  ;;  %v3330_v6 = vpop.f32.mrf.mxu1  ;;  %v3981_v48 = vsel %vm3968_vm5, %v3912_v24, %v3980_v50 }
 0x4ac   : > { %v4285_v42 = vrot.slane %v3465_v11, 9  ;;  %v3414_v23 = vmax.f32 %v8940_v37, 0.0  ;;  %v3331_v7 = vadd.f32 %v8859_v26, %v3330_v6  ;;  %v3495_v35 = vrot.slane %v3457_v2, 2 }
 0x4ad   : > { %v4286_v21 = vrot.slane %v3519_v52, 9  ;;  %v4287_v34 = vrot.slane %v3520_v45, 9  ;;  %v4288_v46 = vrot.slane %v3521_v8, 9  ;;  %v3496_v36 = vrot.slane %v3457_v2, 4 }
 0x4ae   : > { %v3818_v47 = vmax.f32 %v3465_v11, %v4285_v42  ;;  %v3497_v20 = vrot.slane %v3457_v2, 6  ;;  %3446 = vst [vmem:[%s8865_s20 + $0xc0] sm:$0xff] %v3414_v23  ;;  %v4253_v1 = vrot.slane %v3457_v2, 9  ;;  %v4254_v51 = vrot.slane %v3495_v35, 9 }
 0x4af   : > { %v3819_v15 = vmax.f32 %v3519_v52, %v4286_v21  ;;  %v3820_v28 = vmax.f32 %v3520_v45, %v4287_v34  ;;  %v3821_v22 = vmax.f32 %v3521_v8, %v4288_v46  ;;  %v4255_v18 = vrot.slane %v3496_v36, 9 }
 0x4b0   : > { %v3946_v25 = vperm.slane %v3818_v47, 0  ;;  %v4256_v5 = vrot.slane %v3497_v20, 9  ;;  %v3786_v19 = vmax.f32 %v3457_v2, %v4253_v1  ;;  %v3787_v39 = vmax.f32 %v3495_v35, %v4254_v51 }
 0x4b1   : > { %v3947_v53 = vperm.slane %v3819_v15, 0  ;;  %v3948_v44 = vperm.slane %v3820_v28, 0  ;;  %v3949_v16 = vperm.slane %v3821_v22, 0  ;;  %v3372_v62 = vpop.f32.mrf.mxu2  ;;  %v3788_v17 = vmax.f32 %v3496_v36, %v4255_v18 }
 0x4b2   : > { %v4011_v14 = vsel %vm3972_vm7, %v3946_v25, %v4010_v61  ;;  %v3789_v29 = vmax.f32 %v3497_v20, %v4256_v5  ;;  %v3914_v10 = vperm.slane %v3786_v19, 0  ;;  %v3398_v41 = vmax.f32 %v3331_v7, 0.0 }
 0x4b3   : > { %v4012_v12 = vsel %vm3974_vm8, %v3947_v53, %v4011_v14  ;;  %v8953_v59 = vadd.f32 %v8859_v26, %v3372_v62  ;;  %v3332_v4 = vpop.f32.mrf.mxu1  ;;  %v3982_v55 = vsel %vm3970_vm6, %v3913_v0, %v3981_v48  ;;  %v3915_v32 = vperm.slane %v3787_v39, 0 }
 0x4b4   : > { %v4013_v9 = vsel %vm3976_vm9, %v3948_v44, %v4012_v12  ;;  %v3916_v13 = vperm.slane %v3788_v17, 0  ;;  %v3983_v38 = vsel %vm3972_vm7, %v3914_v10, %v3982_v55  ;;  %3430 = vst [vmem:[%s8865_s20 + $0x40] sm:$0xff] %v3398_v41  ;;  %v8962_v54 = vadd.f32 %v8859_v26, %v3332_v4 }
 0x4b5   : > { %v4014_v33 = vsel %vm3978_vm10, %v3949_v16, %v4013_v9  ;;  %v3415_v43 = vmax.f32 %v8953_v59, 0.0  ;;  %v3917_v56 = vperm.slane %v3789_v29, 0  ;;  %v3984_v57 = vsel %vm3974_vm8, %v3915_v32, %v3983_v38 }
 0x4b6   : > { %4042 = vst [vmem:[%s8917_s28 + $0x28] sm:$0xff] %v4014_v33  ;;  %v3985_v49 = vsel %vm3976_vm9, %v3916_v13, %v3984_v57  ;;  %v3399_v27 = vmax.f32 %v8962_v54, 0.0 }
 0x4b7   : > { %3447 = vst [vmem:[%s8865_s20 + $0xc8] sm:$0xff] %v3415_v43  ;;  %v3986_v31 = vsel %vm3978_vm10, %v3917_v56, %v3985_v49 }
 0x4b8   : > { %4038 = vst [vmem:[%s8917_s28 + $0x8] sm:$0xff] %v3986_v31 }
 0x4b9   : > { %3431 = vst [vmem:[%s8865_s20 + $0x48] sm:$0xff] %v3399_v27 }
 0x4bf   : > { %v3375_v58 = vpop.f32.mrf.mxu2 }
 0x4c0   : > { %v3376_v3 = vadd.f32 %v8859_v26, %v3375_v58 }
 0x4c1   : > { %v3335_v60 = vpop.f32.mrf.mxu1 }
 0x4c2   : > { %v3336_v24 = vadd.f32 %v8859_v26, %v3335_v60  ;;  %v3416_v30 = vmax.f32 %v3376_v3, 0.0 }
 0x4c4   : > { %v3400_v11 = vmax.f32 %v3336_v24, 0.0  ;;  %3448 = vst [vmem:[%s8865_s20 + $0xd0] sm:$0xff] %v3416_v30  ;;  %v3466_v63 = vmax.f32 %v3414_v23, %v3416_v30 }
 0x4c6   : > { %3432 = vst [vmem:[%s8865_s20 + $0x50] sm:$0xff] %v3400_v11  ;;  %v3458_v40 = vmax.f32 %v3398_v41, %v3400_v11  ;;  %v3522_v0 = vrot.slane %v3466_v63, 2  ;;  %v3523_v50 = vrot.slane %v3466_v63, 4  ;;  %v3524_v37 = vrot.slane %v3466_v63, 6 }
 0x4c7   : > { %v4289_v61 = vrot.slane %v3466_v63, 9  ;;  %v3377_v48 = vpop.f32.mrf.mxu2 }
 0x4c8   : > { %v3498_v52 = vrot.slane %v3458_v40, 2  ;;  %v3499_v45 = vrot.slane %v3458_v40, 4  ;;  %v3500_v8 = vrot.slane %v3458_v40, 6  ;;  %v4257_v6 = vrot.slane %v3458_v40, 9 }
 0x4c9   : > { %v4290_v42 = vrot.slane %v3522_v0, 9  ;;  %v4291_v2 = vrot.slane %v3523_v50, 9  ;;  %v4292_v21 = vrot.slane %v3524_v37, 9  ;;  %v3822_v34 = vmax.f32 %v3466_v63, %v4289_v61  ;;  %v3337_v46 = vpop.f32.mrf.mxu1 }
 0x4ca   : > { %v4258_v7 = vrot.slane %v3498_v52, 9  ;;  %v4259_v47 = vrot.slane %v3499_v45, 9  ;;  %v4260_v35 = vrot.slane %v3500_v8, 9  ;;  %v3790_v23 = vmax.f32 %v3458_v40, %v4257_v6 }
 0x4cb   : > { %v3823_v36 = vmax.f32 %v3522_v0, %v4290_v42  ;;  %v3824_v20 = vmax.f32 %v3523_v50, %v4291_v2  ;;  %v3825_v15 = vmax.f32 %v3524_v37, %v4292_v21  ;;  %v3950_v28 = vperm.slane %v3822_v34, 0 }
 0x4cc   : > { %v3791_v22 = vmax.f32 %v3498_v52, %v4258_v7  ;;  %v3792_v1 = vmax.f32 %v3499_v45, %v4259_v47  ;;  %v3793_v18 = vmax.f32 %v3500_v8, %v4260_v35  ;;  %v3378_v5 = vadd.f32 %v8859_v26, %v3377_v48 }
 0x4cd   : > { %v3951_v25 = vperm.slane %v3823_v36, 0  ;;  %v3952_v51 = vperm.slane %v3824_v20, 0  ;;  %v3918_v53 = vperm.slane %v3790_v23, 0  ;;  %v3338_v19 = vadd.f32 %v8859_v26, %v3337_v46 }
 0x4ce   : > { %v3919_v44 = vperm.slane %v3791_v22, 0  ;;  %v3920_v16 = vperm.slane %v3792_v1, 0  ;;  %v3417_v14 = vmax.f32 %v3378_v5, 0.0  ;;  %v3953_v39 = vperm.slane %v3825_v15, 0 }
 0x4cf   : > { %v4015_v62 = vsel %vm3966_vm0, %v3951_v25, %v3950_v28  ;;  %v3401_v12 = vmax.f32 %v3338_v19, 0.0  ;;  %v3921_v41 = vperm.slane %v3793_v18, 0 }
 0x4d0   : > { %v4016_v17 = vsel %vm3968_vm5, %v3952_v51, %v4015_v62  ;;  %v3987_v29 = vsel %vm3966_vm0, %v3919_v44, %v3918_v53  ;;  %v3380_v10 = vpop.f32.mrf.mxu2  ;;  %3449 = vst [vmem:[%s8865_s20 + $0xd8] sm:$0xff] %v3417_v14  ;;  %v3467_v59 = vmax.f32 %v3415_v43, %v3417_v14 }
 0x4d1   : > { %v4017_v4 = vsel %vm3970_vm6, %v3953_v39, %v4016_v17  ;;  %v3988_v55 = vsel %vm3968_vm5, %v3920_v16, %v3987_v29  ;;  %3433 = vst [vmem:[%s8865_s20 + $0x58] sm:$0xff] %v3401_v12  ;;  %v3459_v9 = vmax.f32 %v3399_v27, %v3401_v12  ;;  %v8986_v32 = vadd.f32 %v8859_v26, %v3380_v10 }
 0x4d2   : > { %v3340_v13 = vpop.f32.mrf.mxu1  ;;  %v3525_v33 = vrot.slane %v3467_v59, 2  ;;  %v3526_v38 = vrot.slane %v3467_v59, 4  ;;  %v3527_v54 = vrot.slane %v3467_v59, 6  ;;  %v4293_v56 = vrot.slane %v3467_v59, 9 }
 0x4d3   : > { %v3501_v57 = vrot.slane %v3459_v9, 2  ;;  %v3502_v49 = vrot.slane %v3459_v9, 4  ;;  %v3503_v31 = vrot.slane %v3459_v9, 6  ;;  %v4261_v58 = vrot.slane %v3459_v9, 9 }
 0x4d4   : > { %v4294_v3 = vrot.slane %v3525_v33, 9  ;;  %v4295_v43 = vrot.slane %v3526_v38, 9  ;;  %v4296_v60 = vrot.slane %v3527_v54, 9  ;;  %v3826_v24 = vmax.f32 %v3467_v59, %v4293_v56 }
 0x4d5   : > { %v4262_v30 = vrot.slane %v3501_v57, 9  ;;  %v4263_v11 = vrot.slane %v3502_v49, 9  ;;  %v4264_v63 = vrot.slane %v3503_v31, 9  ;;  %v3794_v27 = vmax.f32 %v3459_v9, %v4261_v58 }
 0x4d6   : > { %v3827_v40 = vmax.f32 %v3525_v33, %v4294_v3  ;;  %v3828_v0 = vmax.f32 %v3526_v38, %v4295_v43  ;;  %v3829_v50 = vmax.f32 %v3527_v54, %v4296_v60  ;;  %v3954_v37 = vperm.slane %v3826_v24, 0 }
 0x4d7   : > { %v3795_v61 = vmax.f32 %v3501_v57, %v4262_v30  ;;  %v3796_v52 = vmax.f32 %v3502_v49, %v4263_v11  ;;  %v3797_v45 = vmax.f32 %v3503_v31, %v4264_v63  ;;  %v3922_v8 = vperm.slane %v3794_v27, 0 }
 0x4d8   : > { %v3382_v6 = vpop.f32.mrf.mxu2  ;;  %v3989_v48 = vsel %vm3970_vm6, %v3921_v41, %v3988_v55  ;;  %v3955_v42 = vperm.slane %v3827_v40, 0  ;;  %v3956_v2 = vperm.slane %v3828_v0, 0  ;;  %v4018_v21 = vsel %vm3972_vm7, %v3954_v37, %v4017_v4 }
 0x4d9   : > { %v3957_v34 = vperm.slane %v3829_v50, 0  ;;  %v3923_v46 = vperm.slane %v3795_v61, 0  ;;  %v3924_v7 = vperm.slane %v3796_v52, 0  ;;  %v3990_v47 = vsel %vm3972_vm7, %v3922_v8, %v3989_v48 }
 0x4da   : > { %v3342_v35 = vpop.f32.mrf.mxu1  ;;  %v4019_v23 = vsel %vm3974_vm8, %v3955_v42, %v4018_v21  ;;  %v3418_v36 = vmax.f32 %v8986_v32, 0.0  ;;  %v3341_v20 = vadd.f32 %v8859_v26, %v3340_v13  ;;  %v8995_v15 = vadd.f32 %v8859_v26, %v3382_v6 }
 0x4db   : > { %v4020_v28 = vsel %vm3976_vm9, %v3956_v2, %v4019_v23  ;;  %v3925_v22 = vperm.slane %v3797_v45, 0  ;;  %v3991_v1 = vsel %vm3974_vm8, %v3923_v46, %v3990_v47  ;;  %v9000_v25 = vadd.f32 %v8859_v26, %v3342_v35 }
 0x4dc   : > { %v4021_v51 = vsel %vm3978_vm10, %v3957_v34, %v4020_v28  ;;  %v3992_v18 = vsel %vm3976_vm9, %v3924_v7, %v3991_v1  ;;  %3450 = vst [vmem:[%s8865_s20 + $0xe0] sm:$0xff] %v3418_v36  ;;  %v3402_v5 = vmax.f32 %v3341_v20, 0.0  ;;  %v3419_v53 = vmax.f32 %v8995_v15, 0.0 }
 0x4dd   : > { %4043 = vst [vmem:[%s8917_s28 + $0x30] sm:$0xff] %v4021_v51  ;;  %v3993_v44 = vsel %vm3978_vm10, %v3925_v22, %v3992_v18  ;;  %v3403_v16 = vmax.f32 %v9000_v25, 0.0 }
 0x4de   : > { %4039 = vst [vmem:[%s8917_s28 + $0x10] sm:$0xff] %v3993_v44 }
 0x4df   : > { %3434 = vst [vmem:[%s8865_s20 + $0x60] sm:$0xff] %v3402_v5 }
 0x4e0   : > { %3451 = vst [vmem:[%s8865_s20 + $0xe8] sm:$0xff] %v3419_v53 }
 0x4e1   : > { %v3385_v19 = vpop.f32.mrf.mxu2  ;;  %3435 = vst [vmem:[%s8865_s20 + $0x68] sm:$0xff] %v3403_v16 }
 0x4e2   : > { %v3386_v62 = vadd.f32 %v8859_v26, %v3385_v19 }
 0x4e3   : > { %v3345_v14 = vpop.f32.mrf.mxu1 }
 0x4e4   : > { %v3420_v39 = vmax.f32 %v3386_v62, 0.0  ;;  %v3346_v17 = vadd.f32 %v8859_v26, %v3345_v14 }
 0x4e6   : > { %3452 = vst [vmem:[%s8865_s20 + $0xf0] sm:$0xff] %v3420_v39  ;;  %v3468_v29 = vmax.f32 %v3418_v36, %v3420_v39  ;;  %v3404_v12 = vmax.f32 %v3346_v17, 0.0 }
 0x4e8   : > { %v3528_v10 = vrot.slane %v3468_v29, 2  ;;  %v3529_v41 = vrot.slane %v3468_v29, 4  ;;  %v3530_v59 = vrot.slane %v3468_v29, 6  ;;  %v4297_v4 = vrot.slane %v3468_v29, 9  ;;  %3436 = vst [vmem:[%s8865_s20 + $0x70] sm:$0xff] %v3404_v12 }
 0x4e9   : > { %v3460_v55 = vmax.f32 %v3402_v5, %v3404_v12  ;;  %v3387_v49 = vpop.f32.mrf.mxu2 }
 0x4ea   : > { %v4298_v9 = vrot.slane %v3528_v10, 9  ;;  %v4299_v32 = vrot.slane %v3529_v41, 9  ;;  %v4300_v13 = vrot.slane %v3530_v59, 9  ;;  %v3830_v33 = vmax.f32 %v3468_v29, %v4297_v4 }
 0x4eb   : > { %v3504_v38 = vrot.slane %v3460_v55, 2  ;;  %v3505_v54 = vrot.slane %v3460_v55, 4  ;;  %v3506_v56 = vrot.slane %v3460_v55, 6  ;;  %v4265_v57 = vrot.slane %v3460_v55, 9  ;;  %v3347_v24 = vpop.f32.mrf.mxu1 }
 0x4ec   : > { %v3831_v31 = vmax.f32 %v3528_v10, %v4298_v9  ;;  %v3832_v58 = vmax.f32 %v3529_v41, %v4299_v32  ;;  %v3958_v30 = vperm.slane %v3830_v33, 0  ;;  %v3388_v27 = vadd.f32 %v8859_v26, %v3387_v49 }
 0x4ed   : > { %v4266_v3 = vrot.slane %v3504_v38, 9  ;;  %v4267_v43 = vrot.slane %v3505_v54, 9  ;;  %v4268_v60 = vrot.slane %v3506_v56, 9  ;;  %v3833_v40 = vmax.f32 %v3530_v59, %v4300_v13 }
 0x4ee   : > { %v3959_v11 = vperm.slane %v3831_v31, 0  ;;  %v3960_v63 = vperm.slane %v3832_v58, 0  ;;  %v3798_v0 = vmax.f32 %v3460_v55, %v4265_v57  ;;  %v3421_v52 = vmax.f32 %v3388_v27, 0.0 }
 0x4ef   : > { %v3799_v50 = vmax.f32 %v3504_v38, %v4266_v3  ;;  %v3800_v61 = vmax.f32 %v3505_v54, %v4267_v43  ;;  %v3348_v45 = vadd.f32 %v8859_v26, %v3347_v24  ;;  %v9027_v8 = vmax.f32 %v3506_v56, %v4268_v60 }
 0x4f0   : > { %v4022_v37 = vsel %vm3966_vm0, %v3959_v11, %v3958_v30  ;;  %3453 = vst [vmem:[%s8865_s20 + $0xf8] sm:$0xff] %v3421_v52  ;;  %v3469_v42 = vmax.f32 %v3419_v53, %v3421_v52  ;;  %v3961_v21 = vperm.slane %v3833_v40, 0  ;;  %v3926_v34 = vperm.slane %v3798_v0, 0 }
 0x4f1   : > { %v4023_v6 = vsel %vm3968_vm5, %v3960_v63, %v4022_v37  ;;  %v3927_v48 = vperm.slane %v3799_v50, 0  ;;  %v3405_v2 = vmax.f32 %v3348_v45, 0.0  ;;  %v3928_v46 = vperm.slane %v3800_v61, 0 }
 0x4f2   : > { %v3531_v7 = vrot.slane %v3469_v42, 2  ;;  %v3532_v26 = vrot.slane %v3469_v42, 4  ;;  %v3533_v47 = vrot.slane %v3469_v42, 6  ;;  %v4024_v35 = vsel %vm3970_vm6, %v3961_v21, %v4023_v6 }
 0x4f3   : > { %3437 = vst [vmem:[%s8865_s20 + $0x78] sm:$0xff] %v3405_v2  ;;  %v3929_v23 = vperm.slane %v9027_v8, 0  ;;  %v4301_v36 = vrot.slane %v3469_v42, 9  ;;  %v3461_v20 = vmax.f32 %v3403_v16, %v3405_v2  ;;  %s5754_s20 = scalar_lea.hbm %s9111_s5, 512 }
 0x4f4   : > { %p5756_p1 = scmp.lt.s32.totalorder %s5754_s20, %s5750_s18 }
 0x4f6   : > { %p5757_p2 = por %p5756_p1, %p5755_p0 }
 0x4f8   : > { %p5758_p3 = pnand %p5757_p2, %p5753_p13 }
 0x4fa   : > { %5761 = shalt.err (!%p5758_p3)
}
 0x4fb   : > { %s5843_s10 = smov 128   ;;  %v3994_v15 = vsel %vm3966_vm0, %v3927_v48, %v3926_v34  ;;  %v4302_v28 = vrot.slane %v3531_v7, 9  ;;  %v4303_v22 = vrot.slane %v3532_v26, 9  ;;  %v4304_v1 = vrot.slane %v3533_v47, 9  ;;  %s4320_s11 = sshll.u32 %s5900_s25, 6 }
 0x4fc   : > { %4330 = dma.vmem_to_hbm [thread:$0]  (%p5917_p5), %s9029_s12, 4096, %s9033_s13, %s4046_s14, %s5843_s10, %s5843_s10, %s5831_s15   ;;  %v3834_v25 = vmax.f32 %v3469_v42, %v4301_v36  ;;  %v3507_v51 = vrot.slane %v3461_v20, 2  ;;  %v3508_v18 = vrot.slane %v3461_v20, 4  ;;  %v3509_v5 = vrot.slane %v3461_v20, 6 }
 0x4fd   : > { %v3835_v53 = vmax.f32 %v3531_v7, %v4302_v28  ;;  %v3836_v44 = vmax.f32 %v3532_v26, %v4303_v22  ;;  %v3837_v16 = vmax.f32 %v3533_v47, %v4304_v1  ;;  %v4269_v19 = vrot.slane %v3461_v20, 9  ;;  %s4079_s14 = scalar_lea.hbm %s9112_s6, %s4320_s11  ;;  %s4080_s25 = sshll.u32 %s8917_s28, 4  ;;  %s4081_s25 = int_to_ptr.vmem [resolvable:$true] %s4080_s25 }
 0x4fe   : > { %v3962_v62 = vperm.slane %v3834_v25, 0  ;;  %v4270_v14 = vrot.slane %v3507_v51, 9  ;;  %v4271_v39 = vrot.slane %v3508_v18, 9  ;;  %v4272_v17 = vrot.slane %v3509_v5, 9  ;;  %s4082_s17 = sshll.u32 %s4079_s14, 4  ;;  %s4051_s18 = scalar_lea.sflag [#allocation6], %s8854_s16  ;;  %s4083_s17 = int_to_ptr.hbm [resolvable:$true] %s4082_s17 }
 0x4ff   : > { %v3995_v29 = vsel %vm3968_vm5, %v3928_v46, %v3994_v15  ;;  %v3963_v12 = vperm.slane %v3835_v53, 0  ;;  %v3964_v10 = vperm.slane %v3836_v44, 0  ;;  %v3802_v41 = vmax.f32 %v3461_v20, %v4269_v19  ;;  %s5776_s19 = sshra.s32 %s4083_s17, 4  ;;  %s5782_s9 = scalar_lea.hbm %s9112_s6, 128  ;;  %s5777_s19 = int_to_ptr.hbm [resolvable:$true] %s5776_s19 }
 0x500   : > { %v4025_v59 = vsel %vm3972_vm7, %v3962_v62, %v4024_v35  ;;  %v3803_v4 = vmax.f32 %v3507_v51, %v4270_v14  ;;  %v3804_v55 = vmax.f32 %v3508_v18, %v4271_v39  ;;  %v3805_v9 = vmax.f32 %v3509_v5, %v4272_v17  ;;  %s5778_s26 = scalar_lea.hbm %s5777_s19, 64  ;;  %p5783_p9 = scmp.lt.s32.totalorder %s5777_s19, %s9112_s6 }
 0x501   : > { %v3965_v32 = vperm.slane %v3837_v16, 0  ;;  %v4026_v13 = vsel %vm3974_vm8, %v3963_v12, %v4025_v59  ;;  %v3930_v33 = vperm.slane %v3802_v41, 0  ;;  %v3996_v38 = vsel %vm3970_vm6, %v3929_v23, %v3995_v29  ;;  %p5779_p4 = scmp.ne.s32.totalorder %s5777_s19, %s5778_s26  ;;  %p5784_p10 = scmp.lt.s32.totalorder %s5782_s9, %s5778_s26 }
 0x502   : > { %v4027_v54 = vsel %vm3976_vm9, %v3964_v10, %v4026_v13  ;;  %v3931_v56 = vperm.slane %v3803_v4, 0  ;;  %v3932_v57 = vperm.slane %v3804_v55, 0  ;;  %v3933_v58 = vperm.slane %v3805_v9, 0 }
 0x503   : > { %v4028_v49 = vsel %vm3978_vm10, %v3965_v32, %v4027_v54  ;;  %v3997_v31 = vsel %vm3972_vm7, %v3930_v33, %v3996_v38  ;;  %p5780_p7 = pnand %p5779_p4, %p5917_p5  ;;  %p5785_p11 = por %p5784_p10, %p5783_p9 }
 0x504   : > { %4044 = vst [vmem:[%s8917_s28 + $0x38] sm:$0xff] %v4028_v49  ;;  %v3998_v3 = vsel %vm3974_vm8, %v3931_v56, %v3997_v31 }
 0x505   : > { %v3999_v43 = vsel %vm3976_vm9, %v3932_v57, %v3998_v3  ;;  %p5781_p8 = pneg %p5780_p7 }
 0x506   : > { %v4000_v60 = vsel %vm3978_vm10, %v3933_v58, %v3999_v43 }
 0x507   : > { %4040 = vst [vmem:[%s8917_s28 + $0x18] sm:$0xff] %v4000_v60  ;;  %p5786_p12 = pnand %p5785_p11, %p5781_p8 }
 0x509   : > { %5789 = shalt.err (!%p5786_p12)
}
 0x50a   : > { %4331 = dma.vmem_to_hbm [thread:$0]  (%p5917_p5), %s4081_s25, 1024, %s4083_s17, %s4051_s18, %s5843_s10, %s5843_s10, %s5831_s15  }
 0x50b PF: > { %p4341_p13 = scmp.ge.s32.totalorder %s5828_s24, 2  ;;  %s4097_s16 = sand.u32 1, %s5816_s21  }
 0x50c   : > { %s4098_s28 = scalar_lea.sflag [#allocation4], %s4097_s16 }
 0x50d   : > { %p4335_p0 = pnand %p4341_p13, %p5921_p6 }
 0x50f   : > { %p4336_p1 = pneg %p4335_p0 }
 0x511   : > { %5807 = dma.done.wait (%p4336_p1), %s4098_s28, 4096  }
 0x512   : > { %5809 = vsyncadd (%p4336_p1), %s4098_s28, 4294963200  ;;  %s4108_s13 = scalar_lea.sflag [#allocation6], %s4097_s16 }
 0x513   : > { %5811 = dma.done.wait (%p4336_p1), %s4108_s13, 1024  }
 0x514   : > { %5813 = vsyncadd (%p4336_p1), %s4108_s13, 4294966272  ;;  %p20_p5 = scmp.ge.s32.totalorder %s5904_s27, 4   ;;  %s9468_s21 = smov %s5820_s22 }
 0x515   : > { %s9469_s22 = smov %s5824_s23  ;;  %s9470_s23 = smov %s5915_s30 }
 0x516   : > { %s9471_s24 = smov %s5904_s27  ;;  %22 = sbr.rel (!%p20_p5) target bundleno = 5 (0x5), region = 94 }
 0x51b   :  { %4114 = vsyncpa [#allocation4], 1 }
 0x51c   :  { %4116 = vsyncpa [#allocation4 + $0x1], 1 }
 0x51d   :  { %4117 = vsyncpa [#allocation6], 1 }
 0x51e   :  { %4119 = vsyncpa [#allocation6 + $0x1], 1 }

</bundles_post_ra>
